<compile_context>
chip_gen: v7x
topology: tpu7x:2x2x1
jax: 0.10.0
libtpu: 0.0.40
codegen_flags: <defaults>
</compile_context>

<pallas_src>
import functools

import jax
import jax.numpy as jnp
from jax.experimental import pallas as pl
from jax.experimental.pallas import tpu as pltpu


def _round_up(x, m):
    return ((x + m - 1) // m) * m


# ---------------------------------------------------------------------------
# Fused kernel: lin_in -> [(adj @ h) -> Fourier-KAN] * n_kan -> out linear
#               -> log_softmax (over the real output columns only).
# ---------------------------------------------------------------------------

def _kangnn_fused_kernel(kvals_ref, x_ref, adj_ref, w_in_ref, c_ref, w_out_ref,
                         o_ref, *, n_kan, grid_dim, out_dim):
    n_rows = x_ref.shape[0]
    hg = kvals_ref.shape[1]

    adj = adj_ref[...]                                            # [N, N]
    # Hoisted broadcast of per-column frequencies (k + 1), col = k*H + i.
    kvals_b = jnp.broadcast_to(kvals_ref[...], (n_rows, hg))      # [N, H*G]

    # lin_in (no bias)
    h = jnp.dot(x_ref[...], w_in_ref[...],
                preferred_element_type=jnp.float32)               # [N, H]

    # KAN message-passing layers; h never leaves VMEM.
    for l in range(n_kan):
        agg = jnp.dot(adj, h, preferred_element_type=jnp.float32)     # spmm(adj, h)
        # Fourier feature expansion: col = k*H + i  ->  agg[b, i] * (k + 1)
        arg = jnp.tile(agg, (1, grid_dim)) * kvals_b                   # [N, H*G]
        feats = jnp.concatenate([jnp.cos(arg), jnp.sin(arg)], axis=1)  # [N, 2*H*G]
        # Single K = 2*H*G contraction against the stacked [cos; sin] weights.
        h = jnp.dot(feats, c_ref[l], preferred_element_type=jnp.float32)  # [N, H]

    # Final linear (output dim zero-padded to a lane-dense width).
    logits = jnp.dot(h, w_out_ref[...], preferred_element_type=jnp.float32)
    if logits.shape[-1] > out_dim:
        col = jax.lax.broadcasted_iota(jnp.int32, logits.shape, 1)
        logits = jnp.where(col < out_dim, logits, -1e30)          # padded cols -> ~ -inf

    # Numerically stable log_softmax.
    m = jnp.max(logits, axis=-1, keepdims=True)
    z = logits - m
    lse = jnp.log(jnp.sum(jnp.exp(z), axis=-1, keepdims=True))
    o_ref[...] = z - lse


def kangnn_forward(x, adj, w_in, c_stacked, w_out_pad, kvals, *,
                   grid_dim, n_layers, output_dim):
    N, _ = x.shape
    OP = w_out_pad.shape[1]
    n_kan = n_layers - 1

    kern = functools.partial(
        _kangnn_fused_kernel, n_kan=n_kan, grid_dim=grid_dim, out_dim=output_dim
    )
    vmem_spec = pl.BlockSpec(memory_space=pltpu.MemorySpace.VMEM)
    out = pl.pallas_call(
        kern,
        out_shape=jax.ShapeDtypeStruct((N, OP), jnp.float32),
        in_specs=[vmem_spec] * 6,
        out_specs=vmem_spec,
    )(kvals, x, adj, w_in, c_stacked, w_out_pad)
    return out[:, :output_dim]


# ---------------------------------------------------------------------------
# Parameter init (matches the torch module's shapes) + one-time kernel prep.
# ---------------------------------------------------------------------------

def init_kangnn_params(key, n_features, hidden_dim, output_dim, grid_dim, n_layers):
    keys = jax.random.split(key, n_layers + 2)
    bound_in = 1.0 / float(n_features) ** 0.5
    w_in = jax.random.uniform(
        keys[0], (n_features, hidden_dim), jnp.float32, -bound_in, bound_in
    )
    # KANLayer coeffs: [2, out_feat, in_feat, grid] ~ N(0,1)/(sqrt(in)*sqrt(grid))
    scale = 1.0 / (float(hidden_dim) ** 0.5 * float(grid_dim) ** 0.5)
    kan_coeffs = [
        jax.random.normal(
            keys[1 + l], (2, hidden_dim, hidden_dim, grid_dim), jnp.float32
        ) * scale
        for l in range(n_layers)
    ]
    bound_out = 1.0 / float(hidden_dim) ** 0.5
    w_out = jax.random.uniform(
        keys[-1], (hidden_dim, output_dim), jnp.float32, -bound_out, bound_out
    )
    return w_in, kan_coeffs, w_out


def prepare_kernel_params(w_in, kan_coeffs, w_out, grid_dim, n_layers, *, lane=128):
    """One-time reorder/stack of weights so the forward has zero wrapper-side
    transposes: stacked KAN weights are [n_kan, 2*G*H, H] (cos rows then sin
    rows, each row index = k*H + i), w_out is zero-padded to a lane-dense width,
    and kvals holds the per-column frequency (k + 1)."""
    hidden_dim = w_in.shape[1]
    output_dim = w_out.shape[1]
    n_kan = n_layers - 1

    def reorder(c_half):  # [out, in, grid] -> [grid*in, out], row = k*H + i
        out_f, in_f, g = c_half.shape
        return jnp.transpose(c_half, (2, 1, 0)).reshape(g * in_f, out_f)

    c_stacked = jnp.stack(
        [
            jnp.concatenate(
                [reorder(kan_coeffs[l][0]), reorder(kan_coeffs[l][1])], axis=0
            )
            for l in range(n_kan)
        ],
        axis=0,
    )  # [n_kan, 2*G*H, H]

    out_pad = _round_up(max(output_dim, lane), lane)
    w_out_pad = jnp.zeros((hidden_dim, out_pad), jnp.float32)
    w_out_pad = w_out_pad.at[:, :output_dim].set(w_out)

    kvals = jnp.repeat(
        jnp.arange(1, grid_dim + 1, dtype=jnp.float32), hidden_dim
    ).reshape(1, grid_dim * hidden_dim)

    return w_in, c_stacked, w_out_pad, kvals


# ---------------------------------------------------------------------------
# Pure-JAX reference
# ---------------------------------------------------------------------------

def kangnn_reference(x, adj, w_in, kan_coeffs, w_out, grid_dim, n_layers):
    h = x @ w_in
    ks = jnp.arange(1, grid_dim + 1, dtype=jnp.float32)
    for l in range(n_layers - 1):
        agg = adj @ h
        arg = agg[:, :, None] * ks[None, None, :]          # [N, H, G]
        c = kan_coeffs[l]
        h = jnp.einsum("bik,jik->bj", jnp.cos(arg), c[0]) + jnp.einsum(
            "bik,jik->bj", jnp.sin(arg), c[1]
        )
    logits = h @ w_out
    return jax.nn.log_softmax(logits, axis=-1)


# ---------------------------------------------------------------------------

if __name__ == "__main__":
    N = 64          # number of graph nodes
    n_features = 16
    hidden_dim = 32
    output_dim = 8
    grid_dim = 4
    n_layers = 3    # forward uses n_layers-1 = 2 KAN layers (matches torch module)

    key = jax.random.PRNGKey(0)
    kx, ka, kp = jax.random.split(key, 3)

    x = jax.random.normal(kx, (N, n_features), jnp.float32)
    # Dense "sparse" adjacency: random binary with self-loops, row-normalized.
    adj_raw = (jax.random.uniform(ka, (N, N)) < 0.1).astype(jnp.float32)
    adj_raw = adj_raw + jnp.eye(N, dtype=jnp.float32)
    adj = adj_raw / jnp.sum(adj_raw, axis=1, keepdims=True)

    w_in, kan_coeffs, w_out = init_kangnn_params(
        kp, n_features, hidden_dim, output_dim, grid_dim, n_layers
    )
    # One-time weight reorder / stack / pad (not re-done per forward).
    w_in_k, c_stacked, w_out_pad, kvals = prepare_kernel_params(
        w_in, kan_coeffs, w_out, grid_dim, n_layers
    )

    fwd = jax.jit(
        functools.partial(
            kangnn_forward,
            grid_dim=grid_dim,
            n_layers=n_layers,
            output_dim=output_dim,
        )
    )
    out = fwd(x, adj, w_in_k, c_stacked, w_out_pad, kvals)
    out = jax.block_until_ready(out)

    ref = kangnn_reference(x, adj, w_in, kan_coeffs, w_out, grid_dim, n_layers)
    assert out.shape == (N, output_dim)
    assert jnp.allclose(out, ref, atol=1e-3, rtol=1e-3)

    print("KERNEL_OK")
</pallas_src>

<mosaic_0001>
module attributes {stable_mosaic.version = 11 : i64} {
  func.func @_kangnn_fused_kernel(%arg0: memref<1x128xf32, #tpu.memory_space<vmem>>, %arg1: memref<64x16xf32, #tpu.memory_space<vmem>>, %arg2: memref<64x64xf32, #tpu.memory_space<vmem>>, %arg3: memref<16x32xf32, #tpu.memory_space<vmem>>, %arg4: memref<2x256x32xf32, #tpu.memory_space<vmem>>, %arg5: memref<32x128xf32, #tpu.memory_space<vmem>>, %arg6: memref<64x128xf32, #tpu.memory_space<vmem>>) attributes {dimension_semantics = [], scalar_prefetch = 0 : i64, scratch_operands = 0 : i64, tpu.core_type = #tpu.core_type<tc>} {
    %c0 = arith.constant 0 : index
    %c0_0 = arith.constant 0 : index
    %0 = vector.load %arg2[%c0, %c0_0] : memref<64x64xf32, #tpu.memory_space<vmem>>, vector<64x64xf32>
    %c0_1 = arith.constant 0 : index
    %c0_2 = arith.constant 0 : index
    %1 = vector.load %arg0[%c0_1, %c0_2] : memref<1x128xf32, #tpu.memory_space<vmem>>, vector<1x128xf32>
    %2 = vector.shape_cast %1 : vector<1x128xf32> to vector<1x128xf32>
    %3 = vector.broadcast %2 : vector<1x128xf32> to vector<64x128xf32>
    %c0_3 = arith.constant 0 : index
    %c0_4 = arith.constant 0 : index
    %4 = vector.load %arg1[%c0_3, %c0_4] : memref<64x16xf32, #tpu.memory_space<vmem>>, vector<64x16xf32>
    %c0_5 = arith.constant 0 : index
    %c0_6 = arith.constant 0 : index
    %5 = vector.load %arg3[%c0_5, %c0_6] : memref<16x32xf32, #tpu.memory_space<vmem>>, vector<16x32xf32>
    %cst = arith.constant dense<0.000000e+00> : vector<64x32xf32>
    %6 = tpu.matmul %4, %5, %cst {dimension_numbers = #tpu.dot_dimension_numbers<[1], [0], [0], [1], [0, 0, 1, 1], [], []>} : vector<64x16xf32>, vector<16x32xf32>, vector<64x32xf32> -> vector<64x32xf32>
    %cst_7 = arith.constant dense<0.000000e+00> : vector<64x32xf32>
    %7 = tpu.matmul %0, %6, %cst_7 {dimension_numbers = #tpu.dot_dimension_numbers<[1], [0], [0], [1], [0, 0, 1, 1], [], []>} : vector<64x64xf32>, vector<64x32xf32>, vector<64x32xf32> -> vector<64x32xf32>
    %8 = tpu.concatenate %7, %7, %7, %7 in 1 : vector<64x32xf32>, vector<64x32xf32>, vector<64x32xf32>, vector<64x32xf32> -> vector<64x128xf32>
    %9 = arith.mulf %8, %3 : vector<64x128xf32>
    %10 = math.cos %9 : vector<64x128xf32>
    %11 = math.sin %9 : vector<64x128xf32>
    %12 = tpu.concatenate %10, %11 in 1 : vector<64x128xf32>, vector<64x128xf32> -> vector<64x256xf32>
    %c0_8 = arith.constant 0 : index
    %c0_9 = arith.constant 0 : index
    %c0_10 = arith.constant 0 : index
    %13 = vector.load %arg4[%c0_8, %c0_9, %c0_10] : memref<2x256x32xf32, #tpu.memory_space<vmem>>, vector<1x256x32xf32>
    %14 = vector.shape_cast %13 : vector<1x256x32xf32> to vector<256x32xf32>
    %cst_11 = arith.constant dense<0.000000e+00> : vector<64x32xf32>
    %15 = tpu.matmul %12, %14, %cst_11 {dimension_numbers = #tpu.dot_dimension_numbers<[1], [0], [0], [1], [0, 0, 1, 1], [], []>} : vector<64x256xf32>, vector<256x32xf32>, vector<64x32xf32> -> vector<64x32xf32>
    %cst_12 = arith.constant dense<0.000000e+00> : vector<64x32xf32>
    %16 = tpu.matmul %0, %15, %cst_12 {dimension_numbers = #tpu.dot_dimension_numbers<[1], [0], [0], [1], [0, 0, 1, 1], [], []>} : vector<64x64xf32>, vector<64x32xf32>, vector<64x32xf32> -> vector<64x32xf32>
    %17 = tpu.concatenate %16, %16, %16, %16 in 1 : vector<64x32xf32>, vector<64x32xf32>, vector<64x32xf32>, vector<64x32xf32> -> vector<64x128xf32>
    %18 = arith.mulf %17, %3 : vector<64x128xf32>
    %19 = math.cos %18 : vector<64x128xf32>
    %20 = math.sin %18 : vector<64x128xf32>
    %21 = tpu.concatenate %19, %20 in 1 : vector<64x128xf32>, vector<64x128xf32> -> vector<64x256xf32>
    %c1 = arith.constant 1 : index
    %c0_13 = arith.constant 0 : index
    %c0_14 = arith.constant 0 : index
    %22 = vector.load %arg4[%c1, %c0_13, %c0_14] : memref<2x256x32xf32, #tpu.memory_space<vmem>>, vector<1x256x32xf32>
    %23 = vector.shape_cast %22 : vector<1x256x32xf32> to vector<256x32xf32>
    %cst_15 = arith.constant dense<0.000000e+00> : vector<64x32xf32>
    %24 = tpu.matmul %21, %23, %cst_15 {dimension_numbers = #tpu.dot_dimension_numbers<[1], [0], [0], [1], [0, 0, 1, 1], [], []>} : vector<64x256xf32>, vector<256x32xf32>, vector<64x32xf32> -> vector<64x32xf32>
    %c0_16 = arith.constant 0 : index
    %c0_17 = arith.constant 0 : index
    %25 = vector.load %arg5[%c0_16, %c0_17] : memref<32x128xf32, #tpu.memory_space<vmem>>, vector<32x128xf32>
    %cst_18 = arith.constant dense<0.000000e+00> : vector<64x128xf32>
    %26 = tpu.matmul %24, %25, %cst_18 {dimension_numbers = #tpu.dot_dimension_numbers<[1], [0], [0], [1], [0, 0, 1, 1], [], []>} : vector<64x32xf32>, vector<32x128xf32>, vector<64x128xf32> -> vector<64x128xf32>
    %27 = tpu.iota {dimensions = array<i32: 1>} : vector<64x128xi32>
    %c8_i32 = arith.constant 8 : i32
    %28 = vector.broadcast %c8_i32 : i32 to vector<64x128xi32>
    %29 = arith.cmpi slt, %27, %28 : vector<64x128xi32>
    %cst_19 = arith.constant -1.000000e+30 : f32
    %30 = vector.broadcast %cst_19 : f32 to vector<64x128xf32>
    %31 = arith.select %29, %26, %30 : vector<64x128xi1>, vector<64x128xf32>
    %cst_20 = arith.constant dense<0xFF800000> : vector<64xf32>
    %32 = vector.multi_reduction <maximumf>, %31, %cst_20 [1] : vector<64x128xf32> to vector<64xf32>
    %33 = vector.shape_cast %32 : vector<64xf32> to vector<64x1xf32>
    %34 = vector.broadcast %33 : vector<64x1xf32> to vector<64x128xf32>
    %35 = arith.subf %31, %34 : vector<64x128xf32>
    %36 = math.exp %35 : vector<64x128xf32>
    %cst_21 = arith.constant dense<0.000000e+00> : vector<64xf32>
    %37 = vector.multi_reduction <add>, %36, %cst_21 [1] : vector<64x128xf32> to vector<64xf32>
    %38 = vector.shape_cast %37 : vector<64xf32> to vector<64x1xf32>
    %39 = math.log %38 : vector<64x1xf32>
    %40 = vector.broadcast %39 : vector<64x1xf32> to vector<64x128xf32>
    %41 = arith.subf %35, %40 : vector<64x128xf32>
    %c0_22 = arith.constant 0 : index
    %c0_23 = arith.constant 0 : index
    %42 = vector.load %arg6[%c0_22, %c0_23] : memref<64x128xf32, #tpu.memory_space<vmem>>, vector<64x128xf32>
    tpu.vector_store %arg6[%c0_22, %c0_23], %41 {strides = array<i32>} : memref<64x128xf32, #tpu.memory_space<vmem>>, vector<64x128xf32>,
    return
  }
}

</mosaic_0001>

<bundles_post_ra>
// kernel: kangnn_forward.1
= control target key start
LH: loop header
LB: loop body
LE: loop exit
PB: predicated region body
PF: predicated region fallthrough
CT: control target
= control target key end

     0   :  { %vm48_vm0 = vcmask 130048   ;;  %vm7778_vm1 = vcmask 523264   ;;  %s5199_s7 = smov 32   ;;  %s5200_s8 = smov 96   ;;  %vm7777_vm2 = vcmask 261120   ;;  %vm7776_vm3 = vcmask 785408   ;;  %s7757_s3 = inlined_call_operand.vmem [shape: f32[16,32], index: 3, kind: input, shape index: {}]   ;;  %s7758_s1 = inlined_call_operand.vmem [shape: f32[64,16], index: 1, kind: input, shape index: {}]   ;;  %s7759_s2 = inlined_call_operand.vmem [shape: f32[64,64], index: 2, kind: input, shape index: {}]   ;;  %s7760_s4 = inlined_call_operand.vmem [shape: f32[2,256,32], index: 4, kind: input, shape index: {}]   ;;  %s7761_s0 = inlined_call_operand.vmem [shape: f32[1,128], index: 0, kind: input, shape index: {}]   ;;  %s7762_s5 = inlined_call_operand.vmem [shape: f32[32,128], index: 5, kind: input, shape index: {}]   ;;  %s7763_s6 = inlined_call_operand.vmem [shape: f32[64,128], index: 6, kind: output, shape index: {}]  }
   0x1   :  { %v46_v0 = vld [vmem:[%s7757_s3] sm:$0xff]  ;;  %v47_v1 = vld [vmem:[%s7757_s3 + $0x8] sm:$0xff]  ;;  %v40_v5 = vld [vmem:[%s7758_s1 + $0x10] sm:$0xff]  ;;  %s5198_s3 = smov 64  }
   0x2   :  { %v38_v2 = vld [vmem:[%s7758_s1] sm:$0xff]  ;;  %v4913_v3 = vpack.c.bf16 %v47_v1, %v46_v0  ;;  %v39_v4 = vld [vmem:[%s7758_s1 + $0x8] sm:$0xff]  ;;  %v41_v6 = vld [vmem:[%s7758_s1 + $0x18] sm:$0xff] }
   0x3   :  { %4825 = vmatprep.mubr.msk.f32.mxu0 %vm48_vm0, %v38_v2  ;;  %v42_v7 = vld [vmem:[%s7758_s1 + $0x20] sm:$0xff]  ;;  %v43_v8 = vld [vmem:[%s7758_s1 + $0x28] sm:$0xff]  ;;  %v44_v9 = vld [vmem:[%s7758_s1 + $0x30] sm:$0xff] }
   0x4   :  { %4914 = vmatprep.subr.bf16.mxu0 %v4913_v3  ;;  %v45_v10 = vld [vmem:[%s7758_s1 + $0x38] sm:$0xff]  ;;  %v23_v11 = vld [vmem:[%s7759_s2] sm:$0xff]  ;;  %v24_v24 = vld [vmem:[%s7759_s2 + $0x8] sm:$0xff] }
   0x5   :  { %4916 = vmatpush3.bf16.msra.mxu0 %v4913_v3  ;;  %4853 = vmatprep.mubr.msk.f32.mxu1 %vm7778_vm1, %v23_v11  ;;  %v25_v25 = vld [vmem:[%s7759_s2 + $0x10] sm:$0xff]  ;;  %v26_v26 = vld [vmem:[%s7759_s2 + $0x18] sm:$0xff]  ;;  %v27_v27 = vld [vmem:[%s7759_s2 + $0x20] sm:$0xff] }
   0x6   :  { %v28_v28 = vld [vmem:[%s7759_s2 + $0x28] sm:$0xff]  ;;  %v29_v29 = vld [vmem:[%s7759_s2 + $0x30] sm:$0xff]  ;;  %v30_v30 = vld [vmem:[%s7759_s2 + $0x38] sm:$0xff] }
   0x7   :  { %v2094_v39 = vld [vmem:[%s7760_s4 + $0x80] sm:$0xff]  ;;  %v2095_v40 = vld [vmem:[%s7760_s4 + $0x88] sm:$0xff]  ;;  %v2096_v44 = vld [vmem:[%s7760_s4 + $0x90] sm:$0xff] }
   0x8   :  { %4826 = vmatmul.mubr.msk.f32.vlgmr.msra.gmra.mrb[0].mxu0 %vm48_vm0, %v39_v4  ;;  %v4933_v41 = vpack.c.bf16 %v2095_v40, %v2094_v39  ;;  %v2078_v42 = vld [vmem:[%s7760_s4] sm:$0xff]  ;;  %v2079_v43 = vld [vmem:[%s7760_s4 + $0x8] sm:$0xff]  ;;  %v2097_v46 = vld [vmem:[%s7760_s4 + $0x98] sm:$0xff] }
   0x9   :  { %4828 = vmatprep.mubr.msk.f32.mxu0 %vm48_vm0, %v40_v5  ;;  %v4935_v45 = vpack.c.bf16 %v2079_v43, %v2078_v42  ;;  %v2080_v47 = vld [vmem:[%s7760_s4 + $0x10] sm:$0xff]  ;;  %v2081_v48 = vld [vmem:[%s7760_s4 + $0x18] sm:$0xff]  ;;  %v4937_v49 = vpack.c.bf16 %v2097_v46, %v2096_v44  ;;  %v2098_v50 = vld [vmem:[%s7760_s4 + $0xa0] sm:$0xff] }
   0xa   :  { %4934 = vmatprep.subr.bf16.mxu0 %v4933_v41  ;;  %v2099_v51 = vld [vmem:[%s7760_s4 + $0xa8] sm:$0xff]  ;;  %v4939_v52 = vpack.c.bf16 %v2081_v48, %v2080_v47  ;;  %v2082_v54 = vld [vmem:[%s7760_s4 + $0x20] sm:$0xff]  ;;  %v2100_v56 = vld [vmem:[%s7760_s4 + $0xb0] sm:$0xff] }
   0xb   :  { %4936 = vmatpush3.bf16.msra.mxu0 %v4935_v45  ;;  %v4941_v53 = vpack.c.bf16 %v2099_v51, %v2098_v50  ;;  %v2083_v55 = vld [vmem:[%s7760_s4 + $0x28] sm:$0xff]  ;;  %v2101_v57 = vld [vmem:[%s7760_s4 + $0xb8] sm:$0xff]  ;;  %v2084_v60 = vld [vmem:[%s7760_s4 + $0x30] sm:$0xff] }
   0xc   :  { %4829 = vmatmul.mubr.msk.f32.gmra.mrb[2].mxu0 %vm48_vm0, %v41_v6  ;;  %4938 = vmatprep.subr.bf16.mxu0 %v4937_v49  ;;  %v4943_v58 = vpack.c.bf16 %v2083_v55, %v2082_v54  ;;  %v4945_v59 = vpack.c.bf16 %v2101_v57, %v2100_v56  ;;  %v2085_v61 = vld [vmem:[%s7760_s4 + $0x38] sm:$0xff]  ;;  %v2102_v62 = vld [vmem:[%s7760_s4 + $0xc0] sm:$0xff]  ;;  %v2103_v63 = vld [vmem:[%s7760_s4 + $0xc8] sm:$0xff] }
   0xd   :  { %4831 = vmatprep.mubr.msk.f32.mxu0 %vm48_vm0, %v42_v7  ;;  %v4947_v0 = vpack.c.bf16 %v2085_v61, %v2084_v60  ;;  %v4949_v1 = vpack.c.bf16 %v2103_v63, %v2102_v62  ;;  %v2086_v2 = vld [vmem:[%s7760_s4 + $0x40] sm:$0xff]  ;;  %v2087_v3 = vld [vmem:[%s7760_s4 + $0x48] sm:$0xff]  ;;  %v2104_v4 = vld [vmem:[%s7760_s4 + $0xd0] sm:$0xff] }
   0xe   :  { %v2105_v5 = vld [vmem:[%s7760_s4 + $0xd8] sm:$0xff]  ;;  %v4951_v6 = vpack.c.bf16 %v2087_v3, %v2086_v2 }
   0xf   :  { %4940 = vmatpush3.bf16.msra.mxu0 %v4939_v52  ;;  %v4953_v7 = vpack.c.bf16 %v2105_v5, %v2104_v4 }
  0x10   :  { %4832 = vmatmul.mubr.msk.f32.gmra.mrb[4].mxu0 %vm48_vm0, %v43_v8  ;;  %4942 = vmatprep.subr.bf16.mxu0 %v4941_v53  ;;  %v2088_v8 = vld [vmem:[%s7760_s4 + $0x50] sm:$0xff] }
  0x11   :  { %4834 = vmatprep.mubr.msk.f32.mxu0 %vm48_vm0, %v44_v9  ;;  %v2089_v9 = vld [vmem:[%s7760_s4 + $0x58] sm:$0xff] }
  0x13   :  { %4944 = vmatpush3.bf16.msra.mxu0 %v4943_v58 }
  0x14   :  { %4835 = vmatmul.mubr.msk.f32.gmra.mrb[6].mxu0 %vm48_vm0, %v45_v10  ;;  %4946 = vmatprep.subr.bf16.mxu0 %v4945_v59  ;;  %v2106_v10 = vld [vmem:[%s7760_s4 + $0xe0] sm:$0xff] }
  0x17   :  { %4948 = vmatpush3.bf16.msra.mxu0 %v4947_v0 }
  0x18   :  { %4950 = vmatprep.subr.bf16.mxu0 %v4949_v1 }
  0x1b   :  { %4952 = vmatpush3.bf16.msra.mxu0 %v4951_v6 }
  0x1c   :  { %4954 = vmatprep.subr.bf16.mxu0 %v4953_v7 }
  0xdb   :  { %v4827_v12 = vpop.f32.mrb[0].mxu0 }
  0xdc   :  { %v139_v13 = vpop.f32.mrb[1].mxu0 }
  0xdd   :  { %v4917_v14 = vpack.c.bf16 %v4827_v12, %v139_v13  ;;  %v4955_v12 = vpack.c.bf16 %v2089_v9, %v2088_v8 }
  0xdf   :  { %v4830_v15 = vpop.f32.mrb[2].mxu0  ;;  %4918 = vmatprep.subr.bf16.mxu1 %v4917_v14  ;;  %4956 = vmatpush3.bf16.msra.mxu0 %v4955_v12 }
  0xe0   :  { %v149_v16 = vpop.f32.mrb[3].mxu0  ;;  %4920 = vmatpush3.bf16.msra.mxu1 %v4917_v14  ;;  %v2090_v14 = vld [vmem:[%s7760_s4 + $0x60] sm:$0xff] }
  0xe1   :  { %v4921_v17 = vpack.c.bf16 %v4830_v15, %v149_v16  ;;  %v2091_v15 = vld [vmem:[%s7760_s4 + $0x68] sm:$0xff]  ;;  %v2108_v16 = vld [vmem:[%s7760_s4 + $0xf0] sm:$0xff] }
  0xe3   :  { %v4833_v18 = vpop.f32.mrb[4].mxu0  ;;  %4922 = vmatprep.subr.bf16.mxu1 %v4921_v17 }
  0xe4   :  { %v159_v19 = vpop.f32.mrb[5].mxu0  ;;  %4924 = vmatpush3.bf16.msra.mxu1 %v4921_v17  ;;  %v2109_v17 = vld [vmem:[%s7760_s4 + $0xf8] sm:$0xff] }
  0xe5   :  { %v4925_v20 = vpack.c.bf16 %v4833_v18, %v159_v19  ;;  %v4959_v18 = vpack.c.bf16 %v2091_v15, %v2090_v14  ;;  %v4961_v19 = vpack.c.bf16 %v2109_v17, %v2108_v16 }
  0xe7   :  { %v4836_v21 = vpop.f32.mrb[6].mxu0  ;;  %4926 = vmatprep.subr.bf16.mxu1 %v4925_v20 }
  0xe8   :  { %v169_v22 = vpop.f32.mrb[7].mxu0  ;;  %4928 = vmatpush3.bf16.msra.mxu1 %v4925_v20  ;;  %v2092_v20 = vld [vmem:[%s7760_s4 + $0x70] sm:$0xff] }
  0xe9   :  { %v4929_v23 = vpack.c.bf16 %v4836_v21, %v169_v22  ;;  %v2093_v21 = vld [vmem:[%s7760_s4 + $0x78] sm:$0xff] }
  0xea   :  { %v4963_v22 = vpack.c.bf16 %v2093_v21, %v2092_v20 }
  0xeb   :  { %4930 = vmatprep.subr.bf16.mxu1 %v4929_v23 }
  0xec   :  { %4932 = vmatpush3.bf16.msra.mxu1 %v4929_v23 }
  0xef   :  { %4854 = vmatmul.mubr.msk.f32.vlgmr.msra.gmra.mrb[0].mxu1 %vm7778_vm1, %v24_v24 }
  0xf0   :  { %4856 = vmatprep.mubr.msk.f32.mxu1 %vm7778_vm1, %v25_v25 }
  0xf3   :  { %4857 = vmatmul.mubr.msk.f32.gmra.mrb[2].mxu1 %vm7778_vm1, %v26_v26  ;;  %v5478_v26 = vld [vmem:[%s7761_s0] ss:$0 sm:$0xff] }
  0xf4   :  { %4859 = vmatprep.mubr.msk.f32.mxu1 %vm7778_vm1, %v27_v27 }
  0xf7   :  { %4860 = vmatmul.mubr.msk.f32.gmra.mrb[4].mxu1 %vm7778_vm1, %v28_v28 }
  0xf8   :  { %4862 = vmatprep.mubr.msk.f32.mxu1 %vm7778_vm1, %v29_v29 }
  0xfb   :  { %4863 = vmatmul.mubr.msk.f32.gmra.mrb[6].mxu1 %vm7778_vm1, %v30_v30 }
  0xfc   :  { %4881 = vmatprep.mubr.msk.f32.mxu1 %vm7778_vm1, %v23_v11  ;;  %v2107_v11 = vld [vmem:[%s7760_s4 + $0xe8] sm:$0xff] }
  0xfd   :  { %v4957_v13 = vpack.c.bf16 %v2107_v11, %v2106_v10 }
  0xff   :  { %4958 = vmatprep.subr.bf16.mxu0 %v4957_v13 }
 0x100   :  { %4960 = vmatpush3.bf16.msra.mxu0 %v4959_v18 }
 0x101   :  { %4962 = vmatprep.subr.bf16.mxu0 %v4961_v19 }
 0x104   :  { %4964 = vmatpush3.bf16.msra.mxu0 %v4963_v22 }
 0x1c2   :  { %v5313_v31 = vpop.f32.mrb[0].mxu1 }
 0x1c3   :  { %342 = vrot.lane.b32.xlu0 %v5313_v31, %s5198_s3  ;;  %318 = vrot.lane.b32.xlu1 %v5313_v31, %s5199_s7  ;;  %v5319_v32 = vpop.f32.mrb[1].mxu1 }
 0x1c6   :  { %v5321_v33 = vpop.f32.mrb[2].mxu1 }
 0x1c7   :  { %366 = vrot.lane.b32.xlu1 %v5313_v31, %s5200_s8  ;;  %316 = vrot.lane.b32.xlu0 %v5319_v32, %s5199_s7  ;;  %v5327_v34 = vpop.f32.mrb[3].mxu1 }
 0x1ca   :  { %v5329_v35 = vpop.f32.mrb[4].mxu1 }
 0x1cb   :  { %364 = vrot.lane.b32.xlu1 %v5319_v32, %s5200_s8  ;;  %340 = vrot.lane.b32.xlu0 %v5319_v32, %s5198_s3  ;;  %v5335_v36 = vpop.f32.mrb[5].mxu1 }
 0x1ce   :  { %v5337_v37 = vpop.f32.mrb[6].mxu1 }
 0x1cf   :  { %346 = vrot.lane.b32.xlu0 %v5321_v33, %s5198_s3  ;;  %322 = vrot.lane.b32.xlu1 %v5321_v33, %s5199_s7  ;;  %v5343_v38 = vpop.f32.mrb[7].mxu1 }
 0x1d3   :  { %370 = vrot.lane.b32.xlu1 %v5321_v33, %s5200_s8  ;;  %320 = vrot.lane.b32.xlu0 %v5327_v34, %s5199_s7 }
 0x1d7   :  { %344 = vrot.lane.b32.xlu1 %v5327_v34, %s5198_s3  ;;  %368 = vrot.lane.b32.xlu0 %v5327_v34, %s5200_s8 }
 0x1db   :  { %350 = vrot.lane.b32.xlu0 %v5329_v35, %s5198_s3  ;;  %326 = vrot.lane.b32.xlu1 %v5329_v35, %s5199_s7 }
 0x1df   :  { %348 = vrot.lane.b32.xlu1 %v5335_v36, %s5198_s3  ;;  %324 = vrot.lane.b32.xlu0 %v5335_v36, %s5199_s7 }
 0x1e3   :  { %374 = vrot.lane.b32.xlu1 %v5329_v35, %s5200_s8  ;;  %372 = vrot.lane.b32.xlu0 %v5335_v36, %s5200_s8 }
 0x1e7   :  { %352 = vrot.lane.b32.xlu1 %v5343_v38, %s5198_s3  ;;  %328 = vrot.lane.b32.xlu0 %v5343_v38, %s5199_s7 }
 0x1eb   :  { %330 = vrot.lane.b32.xlu1 %v5337_v37, %s5199_s7  ;;  %376 = vrot.lane.b32.xlu0 %v5343_v38, %s5200_s8 }
 0x1ef   :  { %378 = vrot.lane.b32.xlu1 %v5337_v37, %s5200_s8  ;;  %354 = vrot.lane.b32.xlu0 %v5337_v37, %s5198_s3 }
 0x235   :  { %v343_v23 = vpop.permute.xlu0 %342  ;;  %v319_v24 = vpop.permute.xlu1 %318 }
 0x236   :  { %v390_v25 = vsel %vm7777_vm2, %v5313_v31, %v319_v24 }
 0x237   :  { %v398_v27 = vsel %vm7778_vm1, %v390_v25, %v343_v23  ;;  %v7765_v25 = vmov 920167782  }
 0x239   :  { %v367_v28 = vpop.permute.xlu1 %366  ;;  %v317_v29 = vpop.permute.xlu0 %316 }
 0x23a   :  { %v407_v30 = vsel %vm7776_vm3, %v398_v27, %v367_v28  ;;  %v389_v31 = vsel %vm7777_vm2, %v5319_v32, %v317_v29 }
 0x23b   :  { %v5483_v39 = vmul.f32 %v5478_v26, %v407_v30 }
 0x23d   :  { %v528_v40 = vand.u32 2139095040, %v5483_v39  ;;  %v365_v41 = vpop.permute.xlu1 %364  ;;  %v341_v42 = vpop.permute.xlu0 %340  ;;  %v525_v10 = vand.u32 2147483647, %v5483_v39 }
 0x23e   :  { %v397_v43 = vsel %vm7778_vm1, %v389_v31, %v341_v42  ;;  %v7785_v31 = vmov 2102212464   ;;  %v7767_v42 = vmov 1326507024  }
 0x23f   :  { %v529_v44 = vshrl.u32 %v528_v40, 23  ;;  %v406_v45 = vsel %vm7776_vm3, %v397_v43, %v365_v41  ;;  %v532_v19 = vand.u32 8388607, %v525_v10 }
 0x240   :  { %v5491_v46 = vmul.f32 %v5478_v26, %v406_v45 }
 0x241   :  { %v347_v47 = vpop.permute.xlu0 %346  ;;  %v323_v48 = vpop.permute.xlu1 %322  ;;  %v4483_v49 = vadd.s32 4294967169, %v529_v44  ;;  %v533_v40 = vor.u32 8388608, %v532_v19 }
 0x242   :  { %v425_v50 = vand.u32 2139095040, %v5491_v46  ;;  %v392_v51 = vsel %vm7777_vm2, %v5321_v33, %v323_v48  ;;  %v422_v13 = vand.u32 2147483647, %v5491_v46 }
 0x243   :  { %v400_v32 = vsel %vm7778_vm1, %v392_v51, %v347_v47  ;;  %v535_v55 = vadd.s32 1, %v4483_v49 }
 0x244   :  { %v426_v52 = vshrl.u32 %v425_v50, 23  ;;  %v429_v21 = vand.u32 8388607, %v422_v13 }
 0x245   :  { %v371_v53 = vpop.permute.xlu1 %370  ;;  %v321_v54 = vpop.permute.xlu0 %320  ;;  %vm536_vm4 = vcmp.gt.s32.totalorder %v535_v55, 0 }
 0x246   :  { %v409_v56 = vsel %vm7776_vm3, %v400_v32, %v371_v53  ;;  %v4479_v58 = vadd.s32 4294967169, %v426_v52  ;;  %v391_v59 = vsel %vm7777_vm2, %v5327_v34, %v321_v54  ;;  %v537_v2 = vsel %vm536_vm4, %v535_v55, 0 }
 0x247   :  { %v5499_v57 = vmul.f32 %v5478_v26, %v409_v56  ;;  %v5510_v7 = vand.u32 31, %v537_v2  ;;  %v5531_v29 = vshrl.u32 %v537_v2, 5  ;;  %v430_v48 = vor.u32 8388608, %v429_v21 }
 0x248   :  { %v432_v3 = vadd.s32 1, %v4479_v58  ;;  %v5550_v52 = vshll.u32 %v533_v40, 8  ;;  %v7774_v2 = vmov 683565275  }
 0x249   :  { %v345_v60 = vpop.permute.xlu1 %344  ;;  %v369_v61 = vpop.permute.xlu0 %368  ;;  %v734_v33 = vand.u32 2139095040, %v5499_v57  ;;  %v5517_v16 = vsub.s32 32, %v5510_v7  ;;  %v551_v41 = vshll.u32 %v7785_v31, %v5510_v7  ;;  %v554_v50 = vshll.u32 %v7765_v25, %v5510_v7 }
 0x24a   :  { %v399_v62 = vsel %vm7778_vm1, %v391_v59, %v345_v60  ;;  %vm433_vm5 = vcmp.gt.s32.totalorder %v432_v3, 0  ;;  %vm560_vm8 = vcmp.lt.s32.totalorder %v5531_v29, 4  ;;  %v7772_v59 = vmov 2475754826  }
 0x24b   :  { %v408_v63 = vsel %vm7776_vm3, %v399_v62, %v369_v61  ;;  %v735_v0 = vshrl.u32 %v734_v33, 23  ;;  %v434_v17 = vsel %vm433_vm5, %v432_v3, 0  ;;  %v552_v27 = vshrl.u32 %v7765_v25, %v5517_v16 }
 0x24c   :  { %v5507_v1 = vmul.f32 %v5478_v26, %v408_v63  ;;  %v5524_v22 = vand.u32 31, %v434_v17  ;;  %v555_v43 = vshrl.u32 %v7767_v42, %v5517_v16  ;;  %v5556_v56 = vshrl.u32 %v434_v17, 5 }
 0x24d   :  { %v351_v4 = vpop.permute.xlu0 %350  ;;  %v327_v5 = vpop.permute.xlu1 %326  ;;  %v4491_v6 = vadd.s32 4294967169, %v735_v0  ;;  %v5543_v49 = vor.u32 %v552_v27, %v551_v41  ;;  %v7787_v61 = vmov 2131351028   ;;  %v5560_v62 = vshll.u32 %v430_v48, 8 }
 0x24e   :  { %v631_v34 = vand.u32 2139095040, %v5507_v1  ;;  %v394_v15 = vsel %vm7777_vm2, %v5329_v35, %v327_v5  ;;  %v437_v45 = vsub.s32 32, %v5524_v22  ;;  %v556_v32 = vor.u32 %v555_v43, %v554_v50 }
 0x24f   :  { %v741_v11 = vadd.s32 1, %v4491_v6  ;;  %v402_v20 = vsel %vm7778_vm1, %v394_v15, %v351_v4  ;;  %v5565_v63 = vsel %vm560_vm8, %v5543_v49, 920167782  ;;  %v5572_v3 = vshrl.u32 %v7774_v2, %v5517_v16 }
 0x250   :  { %v632_v8 = vshrl.u32 %v631_v34, 23  ;;  %v440_v60 = vshrl.u32 %v7772_v59, %v437_v45  ;;  %v443_v33 = vshrl.u32 %v7787_v61, %v437_v45  ;;  %v5576_v4 = vshll.u32 %v7774_v2, %v5510_v7 }
 0x251   :  { %v349_v9 = vpop.permute.xlu1 %348  ;;  %v325_v12 = vpop.permute.xlu0 %324  ;;  %vm742_vm6 = vcmp.gt.s32.totalorder %v741_v11, 0  ;;  %v439_v6 = vshll.u32 %v7774_v2, %v5524_v22  ;;  %v442_v34 = vshll.u32 %v7772_v59, %v5524_v22  ;;  %v438_v17 = vshrl.u32 %v7774_v2, %v437_v45 }
 0x252   :  { %v4487_v14 = vadd.s32 4294967169, %v632_v8  ;;  %v393_v35 = vsel %vm7777_vm2, %v5335_v36, %v325_v12  ;;  %v743_v30 = vsel %vm742_vm6, %v741_v11, 0  ;;  %v446_v8 = vshrl.u32 %v7785_v31, %v437_v45 }
 0x253   :  { %v401_v44 = vsel %vm7778_vm1, %v393_v35, %v349_v9  ;;  %v5547_v51 = vand.u32 31, %v743_v30  ;;  %v5587_v9 = vsel %vm560_vm8, %v556_v32, 1326507024  ;;  %v5592_v19 = vor.u32 %v443_v33, %v442_v34 }
 0x254   :  { %v638_v23 = vadd.s32 1, %v4487_v14  ;;  %v449_v14 = vshrl.u32 %v7765_v25, %v437_v45  ;;  %v5596_v21 = vshrl.u32 %v743_v30, 5  ;;  %v452_v30 = vshrl.u32 %v7767_v42, %v437_v45 }
 0x255   :  { %v375_v18 = vpop.permute.xlu1 %374  ;;  %v373_v28 = vpop.permute.xlu0 %372  ;;  %v5568_v0 = vsub.s32 32, %v5547_v51  ;;  %v757_v43 = vshll.u32 %v7785_v31, %v5547_v51  ;;  %vm454_vm10 = vcmp.lt.s32.totalorder %v5556_v56, 1  ;;  %vm457_vm11 = vcmp.lt.s32.totalorder %v5556_v56, 4 }
 0x256   :  { %v411_v24 = vsel %vm7776_vm3, %v402_v20, %v375_v18  ;;  %vm639_vm7 = vcmp.gt.s32.totalorder %v638_v23, 0  ;;  %v410_v47 = vsel %vm7776_vm3, %v401_v44, %v373_v28  ;;  %v441_v18 = vor.u32 %v440_v60, %v439_v6 }
 0x257   :  { %v5538_v36 = vmul.f32 %v5478_v26, %v411_v24  ;;  %v640_v53 = vsel %vm639_vm7, %v638_v23, 0  ;;  %v5554_v55 = vmul.f32 %v5478_v26, %v410_v47  ;;  %v445_v20 = vshll.u32 %v7787_v61, %v5524_v22 }
 0x258   :  { %v5578_v5 = vand.u32 31, %v640_v53  ;;  %v758_v23 = vshrl.u32 %v7765_v25, %v5568_v0  ;;  %v448_v24 = vshll.u32 %v7785_v31, %v5524_v22  ;;  %v761_v27 = vshrl.u32 %v7767_v42, %v5568_v0 }
 0x259   :  { %v940_v54 = vand.u32 2139095040, %v5538_v36  ;;  %v329_v58 = vpop.permute.xlu0 %328  ;;  %v837_v12 = vand.u32 2139095040, %v5554_v55  ;;  %v353_v15 = vpop.permute.xlu1 %352  ;;  %v447_v41 = vor.u32 %v446_v8, %v445_v20  ;;  %v5614_v50 = vshrl.u32 %v640_v53, 5 }
 0x25a   :  { %v395_v35 = vsel %vm7777_vm2, %v5343_v38, %v329_v58  ;;  %v5607_v28 = vsub.s32 32, %v5578_v5  ;;  %v450_v48 = vor.u32 %v449_v14, %v448_v24  ;;  %v760_v38 = vshll.u32 %v7765_v25, %v5547_v51 }
 0x25b   :  { %v941_v11 = vshrl.u32 %v940_v54, 23  ;;  %v838_v47 = vshrl.u32 %v837_v12, 23  ;;  %v403_v32 = vsel %vm7778_vm1, %v395_v35, %v353_v15  ;;  %v451_v54 = vshll.u32 %v7765_v25, %v5524_v22 }
 0x25c   :  { %v5619_v58 = vor.u32 %v758_v23, %v757_v43  ;;  %vm766_vm9 = vcmp.lt.s32.totalorder %v5596_v21, 4  ;;  %v762_v60 = vor.u32 %v761_v27, %v760_v38  ;;  %v655_v33 = vshrl.u32 %v7765_v25, %v5607_v28 }
 0x25d   :  { %v377_v40 = vpop.permute.xlu0 %376  ;;  %v4499_v44 = vadd.s32 4294967169, %v941_v11  ;;  %v331_v6 = vpop.permute.xlu1 %330  ;;  %v453_v53 = vor.u32 %v452_v30, %v451_v54  ;;  %v658_v34 = vshrl.u32 %v7767_v42, %v5607_v28  ;;  %v4495_v8 = vadd.s32 4294967169, %v838_v47 }
 0x25e   :  { %v412_v45 = vsel %vm7776_vm3, %v403_v32, %v377_v40  ;;  %v463_v11 = vsel %vm457_vm11, %v450_v48, 920167782  ;;  %v654_v12 = vshll.u32 %v7785_v31, %v5578_v5  ;;  %v657_v14 = vshll.u32 %v7765_v25, %v5578_v5 }
 0x25f   :  { %v947_v22 = vadd.s32 1, %v4499_v44  ;;  %vm663_vm12 = vcmp.lt.s32.totalorder %v5614_v50, 4  ;;  %v5637_v15 = vmul.f32 %v5478_v26, %v412_v45  ;;  %v5642_v20 = vsel %vm766_vm9, %v5619_v58, 920167782 }
 0x260   :  { %v396_v23 = vsel %vm7777_vm2, %v5337_v37, %v331_v6  ;;  %vm455_vm13 = vcmp.lt.s32.totalorder %v5556_v56, 2  ;;  %vm456_vm14 = vcmp.lt.s32.totalorder %v5556_v56, 3  ;;  %v462_v24 = vsel %vm454_vm10, %v441_v18, %v5592_v19 }
 0x261   :  { %v355_v35 = vpop.permute.xlu0 %354  ;;  %v464_v27 = vsel %vm456_vm14, %v447_v41, %v463_v11  ;;  %v466_v40 = vsel %vm454_vm10, %v5592_v19, %v447_v41  ;;  %v467_v30 = vsel %vm457_vm11, %v453_v53, 1326507024  ;;  %v5658_v37 = vor.u32 %v655_v33, %v654_v12  ;;  %v379_v38 = vpop.permute.xlu1 %378 }
 0x262   :  { %v659_v43 = vor.u32 %v658_v34, %v657_v14  ;;  %vm948_vm15 = vcmp.gt.s32.totalorder %v947_v22, 0  ;;  %v844_v44 = vadd.s32 1, %v4495_v8  ;;  %v1043_v47 = vand.u32 2139095040, %v5637_v15 }
 0x263   :  { %v404_v32 = vsel %vm7778_vm1, %v396_v23, %v355_v35  ;;  %v459_v54 = vsel %vm457_vm11, %v447_v41, 2102212464  ;;  %v468_v45 = vsel %vm456_vm14, %v450_v48, %v467_v30  ;;  %v5668_v6 = vsel %vm766_vm9, %v762_v60, 1326507024 }
 0x264   :  { %v458_v33 = vsel %vm454_vm10, %v438_v17, %v441_v18  ;;  %v465_v53 = vsel %vm455_vm13, %v462_v24, %v464_v27  ;;  %v469_v34 = vsel %vm455_vm13, %v466_v40, %v468_v45  ;;  %v949_v8 = vsel %vm948_vm15, %v947_v22, 0 }
 0x265   :  { %v5677_v11 = vmul.u32.u64.low %v5560_v62, %v469_v34  ;;  %v5678_v41 = vmul.u32.u64.high %v5560_v62, %v469_v34, %v5677_v11  ;;  %v543_v48 = vshrl.u32 %v7772_v59, %v5517_v16  ;;  %v5685_v60 = vsel %vm663_vm12, %v5658_v37, 920167782 }
 0x266   :  { %vm845_vm0 = vcmp.gt.s32.totalorder %v844_v44, 0  ;;  %v413_v17 = vsel %vm7776_vm3, %v404_v32, %v379_v38  ;;  %v460_v18 = vsel %vm456_vm14, %v5592_v19, %v459_v54  ;;  %v5693_v22 = vsel %vm663_vm12, %v659_v43, 1326507024 }
 0x267   :  { %v1044_v12 = vshrl.u32 %v1043_v47, 23  ;;  %v5696_v14 = vmul.u32.u64.low %v5560_v62, %v465_v53  ;;  %v5697_v23 = vmul.u32.u64.high %v5560_v62, %v465_v53, %v5696_v14  ;;  %v5700_v35 = vshrl.u32 %v949_v8, 5 }
 0x268   :  { %v544_v24 = vor.u32 %v543_v48, %v5576_v4  ;;  %v545_v27 = vshll.u32 %v7772_v59, %v5510_v7  ;;  %v546_v19 = vshrl.u32 %v7787_v61, %v5517_v16  ;;  %v5707_v40 = vand.u32 31, %v949_v8 }
 0x269   :  { %v846_v30 = vsel %vm845_vm0, %v844_v44, 0  ;;  %v5710_v43 = vmul.f32 %v5478_v26, %v413_v17  ;;  %v461_v47 = vsel %vm455_vm13, %v458_v33, %v460_v18  ;;  %vm479_vm4 = vc.u32 %v5678_v41, %v5696_v14 }
 0x26a   :  { %v547_v38 = vor.u32 %v546_v19, %v545_v27  ;;  %v548_v4 = vshll.u32 %v7787_v61, %v5510_v7  ;;  %v549_v32 = vshrl.u32 %v7785_v31, %v5517_v16  ;;  %v4503_v54 = vadd.s32 4294967169, %v1044_v12 }
 0x26b   :  { %7799 = vst [vmem:[#allocation2_spill] sm:$0xff] %v5710_v43  ;;  %v480_v45 = vadd.s32 1, %v5697_v23  ;;  %vm557_vm5 = vcmp.lt.s32.totalorder %v5531_v29, 1  ;;  %vm559_vm6 = vcmp.lt.s32.totalorder %v5531_v29, 3  ;;  %v477_v26 = vmul.u32 %v5560_v62, %v461_v47 }
 0x26c   :  { %v550_v56 = vor.u32 %v549_v32, %v548_v4  ;;  %v565_v44 = vsel %vm557_vm5, %v544_v24, %v547_v38  ;;  %v571_v33 = vsel %vm559_vm6, %v5543_v49, %v5587_v9  ;;  %v5727_v53 = vsub.s32 32, %v5707_v40 }
 0x26d   :  { %v481_v7 = vsel %vm479_vm4, %v480_v45, %v5697_v23  ;;  %vm558_vm7 = vcmp.lt.s32.totalorder %v5531_v29, 2  ;;  %v7764_v16 = vand.u32 2147483647, %v5507_v1  ;;  %v561_v48 = vsel %vm557_vm5, %v5572_v3, %v544_v24 }
 0x26e   :  { %v482_v34 = vadd.s32 %v481_v7, %v477_v26  ;;  %v562_v8 = vsel %vm560_vm8, %v550_v56, 2102212464  ;;  %v567_v62 = vsel %vm559_vm6, %v550_v56, %v5565_v63  ;;  %v569_v11 = vsel %vm557_vm5, %v547_v38, %v550_v56 }
 0x26f   :  { %v563_v17 = vsel %vm559_vm6, %v547_v38, %v562_v8  ;;  %v568_v49 = vsel %vm558_vm7, %v565_v44, %v567_v62  ;;  %v572_v9 = vsel %vm558_vm7, %v569_v11, %v571_v33  ;;  %v963_v18 = vshll.u32 %v7785_v31, %v5707_v40 }
 0x270   :  { %v483_v12 = vadd.s32 536870912, %v482_v34  ;;  %v5743_v23 = vmul.u32.u64.low %v5550_v52, %v572_v9  ;;  %v5744_v27 = vmul.u32.u64.high %v5550_v52, %v572_v9, %v5743_v23  ;;  %v5748_v63 = vshll.u32 %v7765_v25, %v5707_v40 }
 0x271   :  { %v5751_v3 = vmul.u32.u64.low %v5550_v52, %v568_v49  ;;  %v5752_v24 = vmul.u32.u64.high %v5550_v52, %v568_v49, %v5751_v3  ;;  %v635_v19 = vand.u32 8388607, %v7764_v16  ;;  %v564_v38 = vsel %vm558_vm7, %v561_v48, %v563_v17 }
 0x272   :  { %v5757_v47 = vshrl.u32 %v483_v12, 30  ;;  %v646_v4 = vshrl.u32 %v7772_v59, %v5607_v28  ;;  %v649_v32 = vshrl.u32 %v7787_v61, %v5607_v28  ;;  %v645_v45 = vshll.u32 %v7774_v2, %v5578_v5 }
 0x273   :  { %v648_v26 = vshll.u32 %v7772_v59, %v5578_v5  ;;  %v651_v56 = vshll.u32 %v7787_v61, %v5578_v5  ;;  %v652_v44 = vshrl.u32 %v7785_v31, %v5607_v28  ;;  %v5773_v29 = vshrl.u32 %v846_v30, 5 }
 0x274   :  { %v5775_v33 = vand.u32 31, %v846_v30  ;;  %v485_v7 = vshll.u32 %v5757_v47, 30  ;;  %vm582_vm8 = vc.u32 %v5744_v27, %v5751_v3  ;;  %v583_v8 = vadd.s32 1, %v5752_v24 }
 0x275   :  { %v647_v62 = vor.u32 %v646_v4, %v645_v45  ;;  %v650_v11 = vor.u32 %v649_v32, %v648_v26  ;;  %v653_v48 = vor.u32 %v652_v44, %v651_v56  ;;  %v1050_v17 = vadd.s32 1, %v4503_v54 }
 0x276   :  { %v5781_v49 = vsub.s32 %v482_v34, %v485_v7  ;;  %v580_v5 = vmul.u32 %v5550_v52, %v564_v38  ;;  %v636_v9 = vor.u32 8388608, %v635_v19  ;;  %v964_v30 = vshrl.u32 %v7765_v25, %v5727_v53 }
 0x277   :  { %v5788_v12 = vshrl.u32 %v7767_v42, %v5727_v53  ;;  %v1146_v23 = vand.u32 2139095040, %v5710_v43  ;;  %v584_v16 = vsel %vm582_vm8, %v583_v8, %v5752_v24  ;;  %vm660_vm10 = vcmp.lt.s32.totalorder %v5614_v50, 1 }
 0x278   :  { %v488_v4 = vsub.s32 0, %v5781_v49  ;;  %v585_v32 = vadd.s32 %v584_v16, %v580_v5  ;;  %vm662_vm11 = vcmp.lt.s32.totalorder %v5614_v50, 3  ;;  %v5796_v52 = vsub.s32 32, %v5775_v33 }
 0x279   :  { %v860_v54 = vshll.u32 %v7785_v31, %v5775_v33  ;;  %v668_v34 = vsel %vm660_vm10, %v647_v62, %v650_v11  ;;  %v670_v24 = vsel %vm662_vm11, %v653_v48, %v5685_v60  ;;  %v5807_v16 = vshll.u32 %v7765_v25, %v5775_v33 }
 0x27a   :  { %v4480_v19 = vmin.u32 %v488_v4, %v5781_v49  ;;  %vm661_vm13 = vcmp.lt.s32.totalorder %v5614_v50, 2  ;;  %v5811_v38 = vshll.u32 %v636_v9, 8  ;;  %v5813_v45 = vor.u32 %v964_v30, %v963_v18 }
 0x27b   :  { %v586_v26 = vadd.s32 536870912, %v585_v32  ;;  %v671_v56 = vsel %vm661_vm13, %v668_v34, %v670_v24  ;;  %v672_v44 = vsel %vm660_vm10, %v650_v11, %v653_v48  ;;  %vm424_vm14 = vcmp.lt.s32.totalorder %v5491_v46, 0 }
 0x27c   :  { %v490_v60 = vclz %v4480_v19  ;;  %v674_v7 = vsel %vm662_vm11, %v5658_v37, %v5693_v22  ;;  %v5825_v8 = vmul.u32.u64.low %v5811_v38, %v671_v56  ;;  %v5826_v5 = vmul.u32.u64.high %v5811_v38, %v671_v56, %v5825_v8 }
 0x27d   :  { %vm1051_vm15 = vcmp.gt.s32.totalorder %v1050_v17, 0  ;;  %v587_v9 = vshrl.u32 %v586_v26, 30  ;;  %v665_v30 = vsel %vm663_vm12, %v653_v48, 2102212464  ;;  %vm7779_vm0 = vcmp.lt.s32.totalorder %v5700_v35, 4 }
 0x27e   :  { %vm869_vm4 = vcmp.lt.s32.totalorder %v5773_v29, 4  ;;  %v1147_v4 = vshrl.u32 %v1146_v23, 23  ;;  %v4481_v34 = vadd.s32 4294967294, %v490_v60  ;;  %v644_v37 = vshrl.u32 %v7774_v2, %v5607_v28 }
 0x27f   :  { %v675_v22 = vsel %vm661_vm13, %v672_v44, %v674_v7  ;;  %v861_v24 = vshrl.u32 %v7765_v25, %v5796_v52  ;;  %vm5843_vm5 = vcmp.le.f32.partialorder %v422_v13, 0.7853982  ;;  %vm527_vm12 = vcmp.lt.s32.totalorder %v5483_v39, 0 }
 0x280   :  { %v588_v48 = vshll.u32 %v587_v9, 30  ;;  %v5849_v23 = vmul.u32.u64.low %v5811_v38, %v675_v22  ;;  %v5850_v26 = vmul.u32.u64.high %v5811_v38, %v675_v22, %v5849_v23  ;;  %v864_v28 = vshrl.u32 %v7767_v42, %v5796_v52 }
 0x281   :  { %vm4482_vm6 = vcmp.lt.s32.totalorder %v4481_v34, 0  ;;  %v664_v56 = vsel %vm660_vm10, %v644_v37, %v647_v62  ;;  %v666_v13 = vsel %vm662_vm11, %v650_v11, %v665_v30  ;;  %v5859_v44 = vsel %vm1051_vm15, %v1050_v17, 0 }
 0x282   :  { %v493_v60 = vsel %vm4482_vm6, 0, %v4481_v34  ;;  %v508_v7 = vsub.s32 4, %v5757_v47  ;;  %v5862_v25 = vsub.s32 %v585_v32, %v588_v48  ;;  %v478_v22 = vadd.s32 %v5696_v14, %v5678_v41 }
 0x283   :  { %v494_v23 = vsub.s32 32, %v493_v60  ;;  %v498_v42 = vsub.s32 4294967266, %v493_v60  ;;  %vm5868_vm7 = vcmp.le.f32.partialorder %v525_v10, 0.7853982  ;;  %v686_v11 = vadd.s32 1, %v5826_v5 }
 0x284   :  { %v5873_v17 = vor.u32 %v861_v24, %v860_v54  ;;  %v591_v30 = vsub.s32 0, %v5862_v25  ;;  %v611_v34 = vsub.s32 4, %v587_v9  ;;  %v667_v32 = vsel %vm661_vm13, %v664_v56, %v666_v13 }
 0x285   :  { %v495_v41 = vshll.u32 %v5781_v49, %v493_v60  ;;  %v496_v14 = vshrl.u32 %v478_v22, %v494_v23  ;;  %v499_v37 = vadd.s32 127, %v498_v42  ;;  %vm685_vm8 = vc.u32 %v5850_v26, %v5825_v8 }
 0x286   :  { %v865_v10 = vor.u32 %v864_v28, %v5807_v16  ;;  %v5883_v48 = vand.u32 31, %v5859_v44  ;;  %v509_v54 = vsel %vm424_vm14, %v508_v7, %v5757_v47  ;;  %v4484_v24 = vmin.u32 %v591_v30, %v5862_v25 }
 0x287   :  { %v497_v50 = vor.u32 %v496_v14, %v495_v41  ;;  %v500_v56 = vshll.u32 %v499_v37, 23  ;;  %v683_v49 = vmul.u32 %v5811_v38, %v667_v32  ;;  %v687_v42 = vsel %vm685_vm8, %v686_v11, %v5826_v5 }
 0x288   :  { %v5894_v13 = vsel %vm7779_vm0, %v5813_v45, 920167782  ;;  %v5899_v16 = vsel %vm869_vm4, %v5873_v17, 920167782  ;;  %v5901_v28 = vadd.s32 4294967169, %v1147_v4  ;;  %v593_v47 = vclz %v4484_v24 }
 0x289   :  { %v501_v60 = vor.u32 4788187, %v500_v56  ;;  %v511_v7 = vsel %vm5843_vm5, 0, %v509_v54  ;;  %v612_v38 = vsel %vm527_vm12, %v611_v34, %v587_v9  ;;  %v688_v5 = vadd.s32 %v687_v42, %v683_v49 }
 0x28a   :  { %v5909_v22 = vsel %vm869_vm4, %v865_v10, 1326507024  ;;  %v5912_v23 = vsub.s32 32, %v5883_v48  ;;  %v4485_v11 = vadd.s32 4294967294, %v593_v47  ;;  %v7769_v4 = vand.u32 2147483647, %v5499_v57 }
 0x28b   :  { %v502_v30 = vand.u32 2147483647, %v501_v60  ;;  %v504_v32 = vcvt.s32.f32 %v497_v50  ;;  %v581_v41 = vadd.s32 %v5751_v3, %v5744_v27  ;;  %v689_v14 = vadd.s32 536870912, %v688_v5 }
 0x28c   :  { %v5917_v37 = vand.u32 3, %v511_v7  ;;  %v1339_v9 = vadd.s32 3, %v511_v7  ;;  %vm4486_vm10 = vcmp.lt.s32.totalorder %v4485_v11, 0  ;;  %v614_v34 = vsel %vm5868_vm7, 0, %v612_v38 }
 0x28d   :  { %v505_v10 = vmul.f32 %v504_v32, %v502_v30  ;;  %v596_v54 = vsel %vm4486_vm10, 0, %v4485_v11  ;;  %v5921_v24 = vshrl.u32 %v689_v14, 30  ;;  %v749_v56 = vshrl.u32 %v7772_v59, %v5568_v0 }
 0x28e   :  { %v597_v49 = vsub.s32 32, %v596_v54  ;;  %v601_v50 = vsub.s32 4294967266, %v596_v54  ;;  %v738_v27 = vand.u32 8388607, %v7769_v4  ;;  %v752_v3 = vshrl.u32 %v7787_v61, %v5568_v0 }
 0x28f   :  { %v506_v42 = vxor.u32 2147483648, %v505_v10  ;;  %v691_v47 = vshll.u32 %v5921_v24, 30  ;;  %v748_v60 = vshll.u32 %v7774_v2, %v5547_v51  ;;  %v751_v7 = vshll.u32 %v7772_v59, %v5547_v51 }
 0x290   :  { %v598_v38 = vshll.u32 %v5862_v25, %v596_v54  ;;  %v599_v11 = vshrl.u32 %v581_v41, %v597_v49  ;;  %v602_v30 = vadd.s32 127, %v601_v50  ;;  %v755_v32 = vshrl.u32 %v7785_v31, %v5568_v0 }
 0x291   :  { %v507_v14 = vsel %vm424_vm14, %v506_v42, %v505_v10  ;;  %v5939_v4 = vsub.s32 %v688_v5, %v691_v47  ;;  %v750_v18 = vor.u32 %v749_v56, %v748_v60  ;;  %v754_v43 = vshll.u32 %v7787_v61, %v5547_v51 }
 0x292   :  { %v510_v59 = vsel %vm5843_vm5, %v5491_v46, %v507_v14  ;;  %v600_v2 = vor.u32 %v599_v11, %v598_v38  ;;  %v603_v25 = vshll.u32 %v602_v30, 23  ;;  %v753_v41 = vor.u32 %v752_v3, %v751_v7 }
 0x293   :  { %5094 = vcosq.f32 %v510_v59  ;;  %v5946_v54 = vand.u32 3, %v1339_v9  ;;  %v694_v49 = vsub.s32 0, %v5939_v4  ;;  %v7804_v10 = vmov 683565275  }
 0x294   :  { %v747_v5 = vshrl.u32 %v7804_v10, %v5568_v0  ;;  %5096 = vsinq.f32 %v510_v59  ;;  %v604_v56 = vor.u32 4788187, %v603_v25  ;;  %v1443_v50 = vadd.s32 3, %v614_v34 }
 0x295   :  { %vm630_vm11 = vcmp.lt.s32.totalorder %v5507_v1, 0  ;;  %v756_v51 = vor.u32 %v755_v32, %v754_v43  ;;  %v5952_v42 = vand.u32 3, %v614_v34  ;;  %v4488_v19 = vmin.u32 %v694_v49, %v5939_v4 }
 0x296   :  { %v739_v47 = vor.u32 8388608, %v738_v27  ;;  %vm763_vm13 = vcmp.lt.s32.totalorder %v5596_v21, 1  ;;  %v605_v9 = vand.u32 2147483647, %v604_v56  ;;  %v607_v3 = vcvt.s32.f32 %v600_v2 }
 0x297   :  { %v684_v60 = vadd.s32 %v5825_v8, %v5850_v26  ;;  %v771_v59 = vsel %vm763_vm13, %v750_v18, %v753_v41  ;;  %vm520_vm14 = vcmp.eq.s32.totalorder %v5917_v37, 2  ;;  %vm1345_vm15 = vcmp.eq.s32.totalorder %v5946_v54, 2 }
 0x298   :  { %v696_v0 = vclz %v4488_v19  ;;  %v714_v43 = vsub.s32 4, %v5921_v24  ;;  %vm764_vm5 = vcmp.lt.s32.totalorder %v5596_v21, 2  ;;  %vm765_vm6 = vcmp.lt.s32.totalorder %v5596_v21, 3 }
 0x299   :  { %vm517_vm8 = vcmp.eq.s32.totalorder %v5917_v37, 0  ;;  %vm1342_vm10 = vcmp.eq.s32.totalorder %v5946_v54, 0  ;;  %v608_v2 = vmul.f32 %v607_v3, %v605_v9  ;;  %v768_v8 = vsel %vm766_vm9, %v756_v51, 2102212464 }
 0x29a   :  { %v773_v26 = vsel %vm765_vm6, %v756_v51, %v5642_v20  ;;  %v775_v34 = vsel %vm763_vm13, %v753_v41, %v756_v51  ;;  %vm516_vm3 = vcmp.lt.s32.totalorder %v5917_v37, 2  ;;  %vm1341_vm2 = vcmp.lt.s32.totalorder %v5946_v54, 2 }
 0x29b   :  { %v4489_v27 = vadd.s32 4294967294, %v696_v0  ;;  %v774_v7 = vsel %vm764_vm5, %v771_v59, %v773_v26  ;;  %v777_v38 = vsel %vm765_vm6, %v5619_v58, %v5668_v6  ;;  %v779_v11 = vshll.u32 %v739_v47, 8 }
 0x29c   :  { %vm514_vm9 = vweird.f32 %v5491_v46  ;;  %v609_v20 = vxor.u32 2147483648, %v608_v2  ;;  %v5983_v30 = vand.u32 3, %v1443_v50  ;;  %v767_v32 = vsel %vm763_vm13, %v747_v5, %v750_v18 }
 0x29d   :  { %v778_v14 = vsel %vm764_vm5, %v775_v34, %v777_v38  ;;  %v7805_v25 = vand.u32 2147483647, %v5507_v1  ;;  %vm4490_vm0 = vcmp.lt.s32.totalorder %v4489_v27, 0  ;;  %v769_v58 = vsel %vm765_vm6, %v753_v41, %v768_v8  ;;  %v5095_v19 = vpop.eup %5094 }
 0x29e   :  { %v5997_v6 = vmul.u32.u64.low %v779_v11, %v778_v14  ;;  %v5998_v56 = vmul.u32.u64.high %v779_v11, %v778_v14, %v5997_v6  ;;  %v610_v50 = vsel %vm527_vm12, %v609_v20, %v608_v2  ;;  %v699_v18 = vsel %vm4490_vm0, 0, %v4489_v27  ;;  %v5097_v59 = vpop.eup %5096 }
 0x29f   :  { %vm5991_vm1 = vcmp.le.f32.partialorder %v7805_v25, 0.7853982  ;;  %v6002_v5 = vmul.u32.u64.low %v779_v11, %v774_v7  ;;  %v6003_v51 = vmul.u32.u64.high %v779_v11, %v774_v7, %v6002_v5  ;;  %v613_v47 = vsel %vm5868_vm7, %v5483_v39, %v610_v50 }
 0x2a0   :  { %v700_v9 = vsub.s32 32, %v699_v18  ;;  %v704_v3 = vsub.s32 4294967266, %v699_v18  ;;  %v715_v41 = vsel %vm630_vm11, %v714_v43, %v5921_v24  ;;  %v521_v0 = vxor.u32 2147483648, %v5095_v19 }
 0x2a1   :  { %5098 = vcosq.f32 %v613_v47  ;;  %v701_v2 = vshll.u32 %v5939_v4, %v699_v18  ;;  %v770_v8 = vsel %vm764_vm5, %v767_v32, %v769_v58  ;;  %v518_v26 = vxor.u32 2147483648, %v5097_v59 }
 0x2a2   :  { %5100 = vsinq.f32 %v613_v47  ;;  %v702_v34 = vshrl.u32 %v684_v60, %v700_v9  ;;  %v705_v27 = vadd.s32 127, %v704_v3  ;;  %v522_v62 = vsel %vm520_vm14, %v521_v0, %v5097_v59 }
 0x2a3   :  { %v1347_v7 = vsel %vm1345_vm15, %v521_v0, %v5097_v59  ;;  %vm788_vm0 = vc.u32 %v5998_v56, %v6002_v5  ;;  %v834_v24 = vand.u32 2147483647, %v5554_v55  ;;  %v519_v4 = vsel %vm517_vm8, %v5095_v19, %v518_v26 }
 0x2a4   :  { %v1344_v21 = vsel %vm1342_vm10, %v5095_v19, %v518_v26  ;;  %v703_v43 = vor.u32 %v702_v34, %v701_v2  ;;  %v706_v60 = vshll.u32 %v705_v27, 23  ;;  %v523_v38 = vsel %vm516_vm3, %v519_v4, %v522_v62 }
 0x2a5   :  { %v1348_v20 = vsel %vm1341_vm2, %v1344_v21, %v1347_v7  ;;  %vm1449_vm12 = vcmp.eq.s32.totalorder %v5983_v30, 2  ;;  %vm623_vm7 = vcmp.eq.s32.totalorder %v5952_v42, 2  ;;  %v789_v32 = vadd.s32 1, %v6003_v51 }
 0x2a6   :  { %v524_v14 = vsel %vm514_vm9, nan, %v523_v38  ;;  %v1349_v25 = vsel %vm514_vm9, nan, %v1348_v20  ;;  %vm1446_vm13 = vcmp.eq.s32.totalorder %v5983_v30, 0  ;;  %vm620_vm14 = vcmp.eq.s32.totalorder %v5952_v42, 0 }
 0x2a7   :  { %v707_v37 = vor.u32 4788187, %v706_v60  ;;  %v786_v58 = vmul.u32 %v779_v11, %v770_v8  ;;  %2174 = vmatprep.mubr.f32.mxu0 %v1349_v25  ;;  %vm1445_vm2 = vcmp.lt.s32.totalorder %v5983_v30, 2  ;;  %vm619_vm3 = vcmp.lt.s32.totalorder %v5952_v42, 2 }
 0x2a8   :  { %v710_v54 = vcvt.s32.f32 %v703_v43  ;;  %v717_v6 = vsel %vm5991_vm1, 0, %v715_v41  ;;  %v790_v46 = vsel %vm788_vm0, %v789_v32, %v6003_v51  ;;  %v841_v50 = vand.u32 8388607, %v834_v24  ;;  %2175 = vmatmul.mubr.f32.vlgmr.msra.gmra.mrb[8].mxu0 %v524_v14 }
 0x2a9   :  { %vm617_vm15 = vweird.f32 %v5483_v39  ;;  %v708_v11 = vand.u32 2147483647, %v707_v37  ;;  %v791_v18 = vadd.s32 %v790_v46, %v786_v58  ;;  %v851_v19 = vshll.u32 %v7804_v10, %v5775_v33 }
 0x2aa   :  { %v7808_v47 = vmov 2475754826   ;;  %v855_v51 = vshrl.u32 %v7787_v61, %v5796_v52  ;;  %v857_v41 = vshll.u32 %v7787_v61, %v5775_v33  ;;  %v858_v59 = vshrl.u32 %v7785_v31, %v5796_v52 }
 0x2ab   :  { %v852_v9 = vshrl.u32 %v7808_v47, %v5796_v52  ;;  %v854_v3 = vshll.u32 %v7808_v47, %v5775_v33  ;;  %v711_v0 = vmul.f32 %v710_v54, %v708_v11  ;;  %v1547_v2 = vadd.s32 3, %v717_v6  ;;  %v5099_v34 = vpop.eup %5098 }
 0x2ac   :  { %v792_v8 = vadd.s32 536870912, %v791_v18  ;;  %v6062_v27 = vand.u32 3, %v717_v6  ;;  %v842_v62 = vor.u32 8388608, %v841_v50  ;;  %v859_v4 = vor.u32 %v858_v59, %v857_v41  ;;  %v5101_v21 = vpop.eup %5100 }
 0x2ad   :  { %v853_v26 = vor.u32 %v852_v9, %v851_v19  ;;  %v856_v7 = vor.u32 %v855_v51, %v854_v3  ;;  %v624_v43 = vxor.u32 2147483648, %v5099_v34  ;;  %v712_v60 = vxor.u32 2147483648, %v711_v0 }
 0x2ae   :  { %v6064_v38 = vshrl.u32 %v792_v8, 30  ;;  %vm866_vm5 = vcmp.lt.s32.totalorder %v5773_v29, 1  ;;  %v621_v33 = vxor.u32 2147483648, %v5101_v21  ;;  %vm868_vm6 = vcmp.lt.s32.totalorder %v5773_v29, 3 }
 0x2af   :  { %v871_v20 = vsel %vm869_vm4, %v859_v4, 2102212464  ;;  %v874_v32 = vsel %vm866_vm5, %v853_v26, %v856_v7  ;;  %v1451_v14 = vsel %vm1449_vm12, %v624_v43, %v5101_v21  ;;  %v625_v25 = vsel %vm623_vm7, %v624_v43, %v5101_v21 }
 0x2b0   :  { %v713_v37 = vsel %vm630_vm11, %v712_v60, %v711_v0  ;;  %v794_v58 = vshll.u32 %v6064_v38, 30  ;;  %v1448_v54 = vsel %vm1446_vm13, %v5099_v34, %v621_v33  ;;  %v622_v6 = vsel %vm620_vm14, %v5099_v34, %v621_v33 }
 0x2b1   :  { %v716_v46 = vsel %vm5991_vm1, %v5507_v1, %v713_v37  ;;  %v876_v50 = vsel %vm868_vm6, %v859_v4, %v5899_v16  ;;  %v1452_v11 = vsel %vm1445_vm2, %v1448_v54, %v1451_v14  ;;  %v626_v19 = vsel %vm619_vm3, %v622_v6, %v625_v25 }
 0x2b2   :  { %5102 = vcosq.f32 %v716_v46  ;;  %v6093_v9 = vsub.s32 %v791_v18, %v794_v58  ;;  %v1453_v3 = vsel %vm617_vm15, nan, %v1452_v11  ;;  %v850_v49 = vshrl.u32 %v7804_v10, %v5796_v52 }
 0x2b3   :  { %5104 = vsinq.f32 %v716_v46  ;;  %vm867_vm1 = vcmp.lt.s32.totalorder %v5773_v29, 2  ;;  %2179 = vmatprep.mubr.f32.mxu0 %v1453_v3  ;;  %v627_v16 = vsel %vm617_vm15, nan, %v626_v19  ;;  %v6105_v18 = vshll.u32 %v842_v62, 8 }
 0x2b4   :  { %v797_v30 = vsub.s32 0, %v6093_v9  ;;  %v877_v42 = vsel %vm867_vm1, %v874_v32, %v876_v50  ;;  %2180 = vmatmul.mubr.f32.gmra.mrb[10].mxu0 %v627_v16  ;;  %v1548_v51 = vand.u32 3, %v1547_v2  ;;  %v870_v41 = vsel %vm866_vm5, %v850_v49, %v853_v26 }
 0x2b5   :  { %v872_v52 = vsel %vm868_vm6, %v856_v7, %v871_v20  ;;  %v878_v59 = vsel %vm866_vm5, %v856_v7, %v859_v4  ;;  %v880_v0 = vsel %vm868_vm6, %v5873_v17, %v5909_v22  ;;  %v7809_v2 = vor.u32 %v5788_v12, %v5748_v63 }
 0x2b6   :  { %v4492_v39 = vmin.u32 %v797_v30, %v6093_v9  ;;  %v6119_v8 = vmul.u32.u64.low %v6105_v18, %v877_v42  ;;  %v6120_v34 = vmul.u32.u64.high %v6105_v18, %v877_v42, %v6119_v8  ;;  %vm7810_vm4 = vcmp.lt.s32.totalorder %v5700_v35, 4 }
 0x2b7   :  { %v6128_v26 = vsel %vm7810_vm4, %v7809_v2, 1326507024  ;;  %v6132_v62 = vshll.u32 %v7785_v31, %v5883_v48  ;;  %v7811_v7 = vmov 920167782   ;;  %v6139_v17 = vadd.s32 1, %v5901_v28 }
 0x2b8   :  { %v6136_v4 = vshrl.u32 %v7811_v7, %v5912_v23  ;;  %vm722_vm11 = vcmp.lt.s32.totalorder %v6062_v27, 2  ;;  %vm723_vm8 = vcmp.eq.s32.totalorder %v6062_v27, 0  ;;  %v799_v63 = vclz %v4492_v39 }
 0x2b9   :  { %v873_v12 = vsel %vm867_vm1, %v870_v41, %v872_v52  ;;  %v881_v22 = vsel %vm867_vm1, %v878_v59, %v880_v0  ;;  %vm720_vm10 = vweird.f32 %v5507_v1  ;;  %vm1549_vm9 = vcmp.lt.s32.totalorder %v1548_v51, 2 }
 0x2ba   :  { %vm1550_vm0 = vcmp.eq.s32.totalorder %v1548_v51, 0  ;;  %vm726_vm12 = vcmp.eq.s32.totalorder %v6062_v27, 2  ;;  %v937_v28 = vand.u32 2147483647, %v5538_v36  ;;  %vm1553_vm7 = vcmp.eq.s32.totalorder %v1548_v51, 2 }
 0x2bb   :  { %v4493_v21 = vadd.s32 4294967294, %v799_v63  ;;  %v6151_v43 = vmul.u32.u64.low %v6105_v18, %v881_v22  ;;  %v6152_v60 = vmul.u32.u64.high %v6105_v18, %v881_v22, %v6151_v43  ;;  %vm733_vm13 = vcmp.lt.s32.totalorder %v5499_v57, 0 }
 0x2bc   :  { %v787_v29 = vadd.s32 %v6002_v5, %v5998_v56  ;;  %v817_v33 = vsub.s32 4, %v6064_v38  ;;  %v889_v20 = vmul.u32 %v6105_v18, %v873_v12  ;;  %v944_v32 = vand.u32 8388607, %v937_v28  ;;  %v5103_v14 = vpop.eup %5102 }
 0x2bd   :  { %vm4494_vm14 = vcmp.lt.s32.totalorder %v4493_v21, 0  ;;  %v892_v25 = vadd.s32 1, %v6120_v34  ;;  %v954_v37 = vshll.u32 %v7804_v10, %v5707_v40  ;;  %v955_v58 = vshrl.u32 %v7808_v47, %v5727_v53  ;;  %v5105_v54 = vpop.eup %5104 }
 0x2be   :  { %v727_v6 = vxor.u32 2147483648, %v5103_v14  ;;  %v802_v56 = vsel %vm4494_vm14, 0, %v4493_v21  ;;  %v945_v5 = vor.u32 8388608, %v944_v32  ;;  %v957_v46 = vshll.u32 %v7808_v47, %v5707_v40 }
 0x2bf   :  { %vm1154_vm2 = vcmp.gt.s32.totalorder %v6139_v17, 0  ;;  %v724_v50 = vxor.u32 2147483648, %v5105_v54  ;;  %v803_v11 = vsub.s32 32, %v802_v56  ;;  %v807_v19 = vsub.s32 4294967266, %v802_v56 }
 0x2c0   :  { %v958_v3 = vshrl.u32 %v7787_v61, %v5727_v53  ;;  %v1555_v49 = vsel %vm1553_vm7, %v727_v6, %v5105_v54  ;;  %v728_v16 = vsel %vm726_vm12, %v727_v6, %v5105_v54  ;;  %v804_v30 = vshll.u32 %v6093_v9, %v802_v56 }
 0x2c1   :  { %vm891_vm3 = vc.u32 %v6152_v60, %v6119_v8  ;;  %v1552_v42 = vsel %vm1550_vm0, %v5103_v14, %v724_v50  ;;  %v725_v18 = vsel %vm723_vm8, %v5103_v14, %v724_v50  ;;  %v7812_v41 = vand.u32 2147483647, %v5499_v57 }
 0x2c2   :  { %v805_v59 = vshrl.u32 %v787_v29, %v803_v11  ;;  %v808_v39 = vadd.s32 127, %v807_v19  ;;  %v1556_v0 = vsel %vm1549_vm9, %v1552_v42, %v1555_v49  ;;  %v729_v9 = vsel %vm722_vm11, %v725_v18, %v728_v16 }
 0x2c3   :  { %vm6182_vm15 = vcmp.le.f32.partialorder %v7812_v41, 0.7853982  ;;  %v893_v2 = vsel %vm891_vm3, %v892_v25, %v6120_v34  ;;  %v956_v63 = vor.u32 %v955_v58, %v954_v37  ;;  %v1557_v12 = vsel %vm720_vm10, nan, %v1556_v0 }
 0x2c4   :  { %v730_v22 = vsel %vm720_vm10, nan, %v729_v9  ;;  %v806_v21 = vor.u32 %v805_v59, %v804_v30  ;;  %v809_v43 = vshll.u32 %v808_v39, 23  ;;  %2184 = vmatprep.mubr.f32.mxu0 %v1557_v12  ;;  %v894_v32 = vadd.s32 %v893_v2, %v889_v20 }
 0x2c5   :  { %v959_v29 = vor.u32 %v958_v3, %v957_v46  ;;  %v960_v51 = vshll.u32 %v7787_v61, %v5707_v40  ;;  %v961_v27 = vshrl.u32 %v7785_v31, %v5727_v53  ;;  %2185 = vmatmul.mubr.f32.gmra.mrb[12].mxu0 %v730_v22  ;;  %v818_v25 = vsel %vm733_vm13, %v817_v33, %v6064_v38 }
 0x2c6   :  { %v810_v34 = vor.u32 4788187, %v809_v43  ;;  %v813_v14 = vcvt.s32.f32 %v806_v21  ;;  %v953_v1 = vshrl.u32 %v7804_v10, %v5727_v53  ;;  %v895_v37 = vadd.s32 536870912, %v894_v32 }
 0x2c7   :  { %v962_v58 = vor.u32 %v961_v27, %v960_v51  ;;  %vm969_vm5 = vcmp.lt.s32.totalorder %v5700_v35, 1  ;;  %vm971_vm6 = vcmp.lt.s32.totalorder %v5700_v35, 3  ;;  %vm970_vm1 = vcmp.lt.s32.totalorder %v5700_v35, 2 }
 0x2c8   :  { %v811_v40 = vand.u32 2147483647, %v810_v34  ;;  %v977_v20 = vsel %vm969_vm5, %v956_v63, %v959_v29  ;;  %v983_v38 = vsel %vm971_vm6, %v5813_v45, %v6128_v26  ;;  %v896_v33 = vshrl.u32 %v895_v37, 30 }
 0x2c9   :  { %v979_v53 = vsel %vm971_vm6, %v962_v58, %v5894_v13  ;;  %v981_v54 = vsel %vm969_vm5, %v959_v29, %v962_v58  ;;  %v985_v6 = vshll.u32 %v945_v5, 8  ;;  %v974_v46 = vsel %vm7810_vm4, %v962_v58, 2102212464 }
 0x2ca   :  { %v814_v56 = vmul.f32 %v813_v14, %v811_v40  ;;  %v980_v50 = vsel %vm970_vm1, %v977_v20, %v979_v53  ;;  %v984_v11 = vsel %vm970_vm1, %v981_v54, %v983_v38  ;;  %v7815_v45 = vmov 1326507024  }
 0x2cb   :  { %v1070_v26 = vshrl.u32 %v7815_v45, %v5912_v23  ;;  %v6228_v13 = vsel %vm1154_vm2, %v6139_v17, 0  ;;  %v820_v5 = vsel %vm6182_vm15, 0, %v818_v25  ;;  %v897_v19 = vshll.u32 %v896_v33, 30 }
 0x2cc   :  { %v815_v3 = vxor.u32 2147483648, %v814_v56  ;;  %v973_v49 = vsel %vm969_vm5, %v953_v1, %v956_v63  ;;  %v6234_v16 = vmul.u32.u64.low %v985_v6, %v984_v11  ;;  %v6235_v30 = vmul.u32.u64.high %v985_v6, %v984_v11, %v6234_v16 }
 0x2cd   :  { %v6237_v42 = vsub.s32 %v894_v32, %v897_v19  ;;  %v975_v18 = vsel %vm971_vm6, %v959_v29, %v974_v46  ;;  %v6241_v41 = vmul.u32.u64.low %v985_v6, %v980_v50  ;;  %v6242_v59 = vmul.u32.u64.high %v985_v6, %v980_v50, %v6241_v41 }
 0x2ce   :  { %v6246_v17 = vshrl.u32 %v5859_v44, 5  ;;  %v1069_v39 = vshll.u32 %v7811_v7, %v5883_v48  ;;  %v816_v0 = vsel %vm733_vm13, %v815_v3, %v814_v56  ;;  %v1651_v9 = vadd.s32 3, %v820_v5 }
 0x2cf   :  { %v6254_v2 = vor.u32 %v6136_v4, %v6132_v62  ;;  %v819_v63 = vsel %vm6182_vm15, %v5499_v57, %v816_v0  ;;  %v900_v12 = vsub.s32 0, %v6237_v42  ;;  %v6261_v44 = vand.u32 31, %v6228_v13 }
 0x2d0   :  { %v1071_v22 = vor.u32 %v1070_v26, %v1069_v39  ;;  %5106 = vcosq.f32 %v819_v63  ;;  %v976_v21 = vsel %vm970_vm1, %v973_v49, %v975_v18  ;;  %v824_v43 = vand.u32 3, %v820_v5 }
 0x2d1   :  { %5108 = vsinq.f32 %v819_v63  ;;  %v4496_v32 = vmin.u32 %v900_v12, %v6237_v42  ;;  %vm994_vm11 = vc.u32 %v6235_v30, %v6241_v41  ;;  %vm1075_vm8 = vcmp.lt.s32.totalorder %v6246_v17, 4 }
 0x2d2   :  { %v1652_v62 = vand.u32 3, %v1651_v9  ;;  %v995_v4 = vadd.s32 1, %v6242_v59  ;;  %v6273_v52 = vsel %vm1075_vm8, %v6254_v2, 920167782  ;;  %v920_v35 = vsub.s32 4, %v896_v33 }
 0x2d3   :  { %v902_v29 = vclz %v4496_v32  ;;  %v992_v51 = vmul.u32 %v985_v6, %v976_v21  ;;  %v6277_v27 = vsel %vm1075_vm8, %v1071_v22, 1326507024  ;;  %v6280_v34 = vsub.s32 32, %v6261_v44 }
 0x2d4   :  { %vm836_vm10 = vcmp.lt.s32.totalorder %v5554_v55, 0  ;;  %v996_v14 = vsel %vm994_vm11, %v995_v4, %v6242_v59  ;;  %vm826_vm9 = vcmp.eq.s32.totalorder %v824_v43, 0  ;;  %v1040_v37 = vand.u32 2147483647, %v5637_v15 }
 0x2d5   :  { %v4497_v25 = vadd.s32 4294967294, %v902_v29  ;;  %v997_v1 = vadd.s32 %v996_v14, %v992_v51  ;;  %vm1653_vm0 = vcmp.lt.s32.totalorder %v1652_v62, 2  ;;  %vm1654_vm12 = vcmp.eq.s32.totalorder %v1652_v62, 0 }
 0x2d6   :  { %vm1657_vm7 = vcmp.eq.s32.totalorder %v1652_v62, 2  ;;  %vm825_vm13 = vcmp.lt.s32.totalorder %v824_v43, 2  ;;  %vm829_vm14 = vcmp.eq.s32.totalorder %v824_v43, 2  ;;  %vm823_vm2 = vweird.f32 %v5499_v57 }
 0x2d7   :  { %v890_v58 = vadd.s32 %v6119_v8, %v6152_v60  ;;  %vm4498_vm3 = vcmp.lt.s32.totalorder %v4497_v25, 0  ;;  %v921_v40 = vsel %vm836_vm10, %v920_v35, %v896_v33  ;;  %v998_v20 = vadd.s32 536870912, %v997_v1 }
 0x2d8   :  { %v905_v38 = vsel %vm4498_vm3, 0, %v4497_v25  ;;  %v1058_v53 = vshrl.u32 %v7808_v47, %v5912_v23  ;;  %v1061_v54 = vshrl.u32 %v7787_v61, %v5912_v23  ;;  %v1064_v6 = vshrl.u32 %v7785_v31, %v5912_v23 }
 0x2d9   :  { %v906_v56 = vsub.s32 32, %v905_v38  ;;  %v910_v46 = vsub.s32 4294967266, %v905_v38  ;;  %v6296_v50 = vshrl.u32 %v998_v20, 30  ;;  %v1047_v8 = vand.u32 8388607, %v1040_v37 }
 0x2da   :  { %v5107_v60 = vpop.eup %5106  ;;  %vm6302_vm15 = vcmp.le.f32.partialorder %v834_v24, 0.7853982  ;;  %v907_v11 = vshll.u32 %v6237_v42, %v905_v38  ;;  %v1057_v26 = vshll.u32 %v7804_v10, %v5883_v48  ;;  %v1060_v5 = vshll.u32 %v7808_v47, %v5883_v48 }
 0x2db   :  { %v1063_v19 = vshll.u32 %v7787_v61, %v5883_v48  ;;  %v5109_v3 = vpop.eup %5108  ;;  %v830_v49 = vxor.u32 2147483648, %v5107_v60  ;;  %v908_v16 = vshrl.u32 %v890_v58, %v906_v56  ;;  %v911_v18 = vadd.s32 127, %v910_v46 }
 0x2dc   :  { %v1000_v24 = vshll.u32 %v6296_v50, 30  ;;  %v827_v59 = vxor.u32 2147483648, %v5109_v3  ;;  %v1059_v39 = vor.u32 %v1058_v53, %v1057_v26  ;;  %v1062_v0 = vor.u32 %v1061_v54, %v1060_v5 }
 0x2dd   :  { %v1065_v9 = vor.u32 %v1064_v6, %v1063_v19  ;;  %v1659_v42 = vsel %vm1657_vm7, %v830_v49, %v5109_v3  ;;  %v831_v63 = vsel %vm829_vm14, %v830_v49, %v5109_v3  ;;  %v909_v12 = vor.u32 %v908_v16, %v907_v11 }
 0x2de   :  { %v912_v22 = vshll.u32 %v911_v18, 23  ;;  %v1656_v21 = vsel %vm1654_vm12, %v5107_v60, %v827_v59  ;;  %v828_v48 = vsel %vm826_vm9, %v5107_v60, %v827_v59  ;;  %v6318_v32 = vsub.s32 %v997_v1, %v1000_v24 }
 0x2df   :  { %v1048_v4 = vor.u32 8388608, %v1047_v8  ;;  %v1660_v29 = vsel %vm1653_vm0, %v1656_v21, %v1659_v42  ;;  %v832_v35 = vsel %vm825_vm13, %v828_v48, %v831_v63  ;;  %vm1072_vm5 = vcmp.lt.s32.totalorder %v6246_v17, 1 }
 0x2e0   :  { %v913_v51 = vor.u32 4788187, %v912_v22  ;;  %v1661_v14 = vsel %vm823_vm2, nan, %v1660_v29  ;;  %v1003_v25 = vsub.s32 0, %v6318_v32  ;;  %vm1074_vm6 = vcmp.lt.s32.totalorder %v6246_v17, 3 }
 0x2e1   :  { %v1080_v58 = vsel %vm1072_vm5, %v1059_v39, %v1062_v0  ;;  %2189 = vmatprep.mubr.f32.mxu0 %v1661_v14  ;;  %v833_v62 = vsel %vm823_vm2, nan, %v832_v35  ;;  %v916_v43 = vcvt.s32.f32 %v909_v12  ;;  %v1082_v20 = vsel %vm1074_vm6, %v1065_v9, %v6273_v52 }
 0x2e2   :  { %v914_v1 = vand.u32 2147483647, %v913_v51  ;;  %2190 = vmatmul.mubr.f32.gmra.mrb[14].mxu0 %v833_v62  ;;  %v4500_v38 = vmin.u32 %v1003_v25, %v6318_v32  ;;  %v1077_v53 = vsel %vm1075_vm8, %v1065_v9, 2102212464  ;;  %v1084_v54 = vsel %vm1072_vm5, %v1062_v0, %v1065_v9 }
 0x2e3   :  { %v1086_v57 = vsel %vm1074_vm6, %v6254_v2, %v6277_v27  ;;  %v923_v56 = vsel %vm6302_vm15, 0, %v921_v40  ;;  %v1056_v52 = vshrl.u32 %v7804_v10, %v5912_v23  ;;  %vm1073_vm1 = vcmp.lt.s32.totalorder %v6246_v17, 2 }
 0x2e4   :  { %v917_v6 = vmul.f32 %v916_v43, %v914_v1  ;;  %v1005_v46 = vclz %v4500_v38  ;;  %v1083_v8 = vsel %vm1073_vm1, %v1080_v58, %v1082_v20  ;;  %v1087_v60 = vsel %vm1073_vm1, %v1084_v54, %v1086_v57 }
 0x2e5   :  { %v1088_v11 = vshll.u32 %v1048_v4, 8  ;;  %vm939_vm4 = vcmp.lt.s32.totalorder %v5538_v36, 0  ;;  %v1076_v2 = vsel %vm1072_vm5, %v1056_v52, %v1059_v39  ;;  %v1078_v27 = vsel %vm1074_vm6, %v1062_v0, %v1077_v53  ;;  %v7818_v39 = vld [vmem:[#allocation2_spill] sm:$0xff] }
 0x2e6   :  { %v918_v26 = vxor.u32 2147483648, %v917_v6  ;;  %v1755_v23 = vadd.s32 3, %v923_v56  ;;  %v4501_v40 = vadd.s32 4294967294, %v1005_v46  ;;  %v1023_v49 = vsub.s32 4, %v6296_v50 }
 0x2e7   :  { %v6357_v5 = vmul.u32.u64.low %v1088_v11, %v1087_v60  ;;  %v6358_v19 = vmul.u32.u64.high %v1088_v11, %v1087_v60, %v6357_v5  ;;  %v6363_v16 = vmul.u32.u64.low %v1088_v11, %v1083_v8  ;;  %v6364_v18 = vmul.u32.u64.high %v1088_v11, %v1083_v8, %v6363_v16 }
 0x2e8   :  { %v919_v3 = vsel %vm836_vm10, %v918_v26, %v917_v6  ;;  %vm4502_vm11 = vcmp.lt.s32.totalorder %v4501_v40, 0  ;;  %v1079_v59 = vsel %vm1073_vm1, %v1076_v2, %v1078_v27  ;;  %v1143_v0 = vand.u32 2147483647, %v7818_v39 }
 0x2e9   :  { %v922_v24 = vsel %vm6302_vm15, %v5554_v55, %v919_v3  ;;  %v6373_v9 = vand.u32 3, %v923_v56  ;;  %v993_v42 = vadd.s32 %v6241_v41, %v6235_v30  ;;  %v1008_v63 = vsel %vm4502_vm11, 0, %v4501_v40 }
 0x2ea   :  { %5110 = vcosq.f32 %v922_v24  ;;  %v6377_v12 = vand.u32 3, %v1755_v23  ;;  %v1009_v22 = vsub.s32 32, %v1008_v63  ;;  %v1013_v21 = vsub.s32 4294967266, %v1008_v63 }
 0x2eb   :  { %5112 = vsinq.f32 %v922_v24  ;;  %v1024_v33 = vsel %vm939_vm4, %v1023_v49, %v6296_v50  ;;  %v1095_v17 = vmul.u32 %v1088_v11, %v1079_v59  ;;  %vm1097_vm8 = vc.u32 %v6358_v19, %v6363_v16 }
 0x2ec   :  { %v1098_v48 = vadd.s32 1, %v6364_v18  ;;  %v1010_v4 = vshll.u32 %v6318_v32, %v1008_v63  ;;  %v1011_v29 = vshrl.u32 %v993_v42, %v1009_v22  ;;  %v1014_v30 = vadd.s32 127, %v1013_v21 }
 0x2ed   :  { %v6388_v41 = vand.u32 8388607, %v1143_v0  ;;  %v6391_v35 = vshrl.u32 %v6228_v13, 5  ;;  %vm932_vm10 = vcmp.eq.s32.totalorder %v6373_v9, 2  ;;  %vm6396_vm9 = vcmp.le.f32.partialorder %v937_v28, 0.7853982 }
 0x2ee   :  { %v1099_v51 = vsel %vm1097_vm8, %v1098_v48, %v6364_v18  ;;  %vm1758_vm0 = vcmp.eq.s32.totalorder %v6377_v12, 0  ;;  %vm1761_vm12 = vcmp.eq.s32.totalorder %v6377_v12, 2  ;;  %vm929_vm7 = vcmp.eq.s32.totalorder %v6373_v9, 0 }
 0x2ef   :  { %v1012_v32 = vor.u32 %v1011_v29, %v1010_v4  ;;  %v1015_v14 = vshll.u32 %v1014_v30, 23  ;;  %v1100_v13 = vadd.s32 %v1099_v51, %v1095_v17  ;;  %vm1757_vm13 = vcmp.lt.s32.totalorder %v6377_v12, 2 }
 0x2f0   :  { %vm928_vm14 = vcmp.lt.s32.totalorder %v6373_v9, 2  ;;  %v6408_v28 = vsel %vm6396_vm9, 0, %v1024_v33  ;;  %v1161_v25 = vshrl.u32 %v7808_v47, %v6280_v34  ;;  %v1164_v58 = vshrl.u32 %v7787_v61, %v6280_v34 }
 0x2f1   :  { %v1170_v62 = vshrl.u32 %v7811_v7, %v6280_v34  ;;  %vm926_vm2 = vweird.f32 %v5554_v55  ;;  %v1016_v1 = vor.u32 4788187, %v1015_v14  ;;  %v1101_v43 = vadd.s32 536870912, %v1100_v13 }
 0x2f2   :  { %v1151_v20 = vor.u32 8388608, %v6388_v41  ;;  %v1159_v38 = vshrl.u32 %v7804_v10, %v6280_v34  ;;  %v1160_v53 = vshll.u32 %v7804_v10, %v6261_v44  ;;  %v1163_v54 = vshll.u32 %v7808_v47, %v6261_v44 }
 0x2f3   :  { %v1167_v57 = vshrl.u32 %v7785_v31, %v6280_v34  ;;  %v1169_v6 = vshll.u32 %v7785_v31, %v6261_v44  ;;  %v1017_v56 = vand.u32 2147483647, %v1016_v1  ;;  %v1019_v52 = vcvt.s32.f32 %v1012_v32 }
 0x2f4   :  { %v6428_v46 = vshrl.u32 %v1101_v43, 30  ;;  %v1166_v8 = vshll.u32 %v7787_v61, %v6261_v44  ;;  %v5111_v60 = vpop.eup %5110  ;;  %v1162_v11 = vor.u32 %v1161_v25, %v1160_v53  ;;  %v1165_v26 = vor.u32 %v1164_v58, %v1163_v54 }
 0x2f5   :  { %v1171_v2 = vor.u32 %v1170_v62, %v1169_v6  ;;  %v1173_v27 = vshrl.u32 %v7815_v45, %v6280_v34  ;;  %v5113_v23 = vpop.eup %5112  ;;  %v933_v40 = vxor.u32 2147483648, %v5111_v60  ;;  %v1020_v5 = vmul.f32 %v1019_v52, %v1017_v56 }
 0x2f6   :  { %v1103_v3 = vshll.u32 %v6428_v46, 30  ;;  %v1172_v49 = vshll.u32 %v7811_v7, %v6261_v44  ;;  %v930_v18 = vxor.u32 2147483648, %v5113_v23  ;;  %v1168_v24 = vor.u32 %v1167_v57, %v1166_v8 }
 0x2f7   :  { %vm1175_vm3 = vcmp.lt.s32.totalorder %v6391_v35, 1  ;;  %vm1178_vm15 = vcmp.lt.s32.totalorder %v6391_v35, 4  ;;  %v1763_v59 = vsel %vm1761_vm12, %v933_v40, %v5113_v23  ;;  %v934_v34 = vsel %vm932_vm10, %v933_v40, %v5113_v23 }
 0x2f8   :  { %v1021_v42 = vxor.u32 2147483648, %v1020_v5  ;;  %v1104_v63 = vsub.s32 %v1100_v13, %v1103_v3  ;;  %v1760_v22 = vsel %vm1758_vm0, %v5111_v60, %v930_v18  ;;  %v931_v44 = vsel %vm929_vm7, %v5111_v60, %v930_v18 }
 0x2f9   :  { %v1174_v21 = vor.u32 %v1173_v27, %v1172_v49  ;;  %v1184_v33 = vsel %vm1178_vm15, %v1171_v2, 920167782  ;;  %v1764_v17 = vsel %vm1757_vm13, %v1760_v22, %v1763_v59  ;;  %v935_v48 = vsel %vm928_vm14, %v931_v44, %v934_v34 }
 0x2fa   :  { %v1022_v4 = vsel %vm939_vm4, %v1021_v42, %v1020_v5  ;;  %v1106_v29 = vsub.s32 0, %v1104_v63  ;;  %v1765_v30 = vsel %vm926_vm2, nan, %v1764_v17  ;;  %v936_v41 = vsel %vm926_vm2, nan, %v935_v48 }
 0x2fb   :  { %v1025_v51 = vsel %vm6396_vm9, %v5538_v36, %v1022_v4  ;;  %vm1177_vm5 = vcmp.lt.s32.totalorder %v6391_v35, 3  ;;  %2194 = vmatprep.mubr.f32.mxu0 %v1765_v30  ;;  %v1180_v12 = vsel %vm1178_vm15, %v1168_v24, 2102212464  ;;  %v1183_v32 = vsel %vm1175_vm3, %v1162_v11, %v1165_v26 }
 0x2fc   :  { %5114 = vcosq.f32 %v1025_v51  ;;  %v4504_v9 = vmin.u32 %v1106_v29, %v1104_v63  ;;  %2195 = vmatmul.mubr.f32.gmra.mrb[16].mxu0 %v936_v41  ;;  %v1859_v55 = vadd.s32 3, %v6408_v28  ;;  %v1185_v14 = vsel %vm1177_vm5, %v1168_v24, %v1184_v33 }
 0x2fd   :  { %5116 = vsinq.f32 %v1025_v51  ;;  %v1188_v50 = vsel %vm1178_vm15, %v1174_v21, 1326507024  ;;  %vm1176_vm6 = vcmp.lt.s32.totalorder %v6391_v35, 2  ;;  %v1179_v25 = vsel %vm1175_vm3, %v1159_v38, %v1162_v11 }
 0x2fe   :  { %v1108_v13 = vclz %v4504_v9  ;;  %v1187_v58 = vsel %vm1175_vm3, %v1165_v26, %v1168_v24  ;;  %v1181_v62 = vsel %vm1177_vm5, %v1165_v26, %v1180_v12  ;;  %v1186_v1 = vsel %vm1176_vm6, %v1183_v32, %v1185_v14 }
 0x2ff   :  { %v1189_v43 = vsel %vm1177_vm5, %v1171_v2, %v1188_v50  ;;  %v1191_v53 = vshll.u32 %v1151_v20, 8  ;;  %v1030_v57 = vand.u32 3, %v6408_v28  ;;  %v1182_v38 = vsel %vm1176_vm6, %v1179_v25, %v1181_v62 }
 0x300   :  { %v4505_v54 = vadd.s32 4294967294, %v1108_v13  ;;  %v1190_v6 = vsel %vm1176_vm6, %v1187_v58, %v1189_v43  ;;  %v1860_v11 = vand.u32 3, %v1859_v55  ;;  %v1096_v35 = vadd.s32 %v6363_v16, %v6358_v19 }
 0x301   :  { %v6482_v56 = vmul.u32.u64.low %v1191_v53, %v1186_v1  ;;  %v6483_v52 = vmul.u32.u64.high %v1191_v53, %v1186_v1, %v6482_v56  ;;  %v6486_v8 = vmul.u32.u64.low %v1191_v53, %v1190_v6  ;;  %v6487_v60 = vmul.u32.u64.high %v1191_v53, %v1190_v6, %v6486_v8 }
 0x302   :  { %vm4506_vm1 = vcmp.lt.s32.totalorder %v4505_v54, 0  ;;  %vm1031_vm4 = vcmp.lt.s32.totalorder %v1030_v57, 2  ;;  %v1198_v27 = vmul.u32 %v1191_v53, %v1182_v38  ;;  %vm1865_vm8 = vcmp.eq.s32.totalorder %v1860_v11, 2 }
 0x303   :  { %v1111_v26 = vsel %vm4506_vm1, 0, %v4505_v54  ;;  %v1201_v28 = vadd.s32 1, %v6483_v52  ;;  %vm1200_vm11 = vc.u32 %v6487_v60, %v6482_v56  ;;  %vm1035_vm10 = vcmp.eq.s32.totalorder %v1030_v57, 2 }
 0x304   :  { %v1112_v2 = vsub.s32 32, %v1111_v26  ;;  %v1116_v20 = vsub.s32 4294967266, %v1111_v26  ;;  %v1113_v40 = vshll.u32 %v1104_v63, %v1111_v26  ;;  %vm1862_vm9 = vcmp.eq.s32.totalorder %v1860_v11, 0 }
 0x305   :  { %v1202_v24 = vsel %vm1200_vm11, %v1201_v28, %v6483_v52  ;;  %vm1032_vm0 = vcmp.eq.s32.totalorder %v1030_v57, 0  ;;  %vm1861_vm12 = vcmp.lt.s32.totalorder %v1860_v11, 2  ;;  %vm1029_vm7 = vweird.f32 %v5538_v36 }
 0x306   :  { %v5115_v23 = vpop.eup %5114  ;;  %v1114_v5 = vshrl.u32 %v1096_v35, %v1112_v2  ;;  %v1117_v3 = vadd.s32 127, %v1116_v20  ;;  %v1203_v34 = vadd.s32 %v1202_v24, %v1198_v27  ;;  %v1126_v12 = vsub.s32 4, %v6428_v46 }
 0x307   :  { %v5117_v49 = vpop.eup %5116  ;;  %v1036_v18 = vxor.u32 2147483648, %v5115_v23  ;;  %vm1042_vm13 = vcmp.lt.s32.totalorder %v5637_v15, 0  ;;  %vm1041_vm14 = vcmp.le.f32.partialorder %v1040_v37, 0.7853982  ;;  %v1199_v37 = vadd.s32 %v6482_v56, %v6487_v60 }
 0x308   :  { %v1033_v19 = vxor.u32 2147483648, %v5117_v49  ;;  %v1115_v16 = vor.u32 %v1114_v5, %v1113_v40  ;;  %v1118_v59 = vshll.u32 %v1117_v3, 23  ;;  %v1204_v48 = vadd.s32 536870912, %v1203_v34 }
 0x309   :  { %v1867_v42 = vsel %vm1865_vm8, %v1036_v18, %v5117_v49  ;;  %v1037_v22 = vsel %vm1035_vm10, %v1036_v18, %v5117_v49  ;;  %v1127_v50 = vsel %vm1042_vm13, %v1126_v12, %v6428_v46  ;;  %vm1132_vm11 = vweird.f32 %v5637_v15 }
 0x30a   :  { %v1864_v63 = vsel %vm1862_vm9, %v5115_v23, %v1033_v19  ;;  %v1034_v44 = vsel %vm1032_vm0, %v5115_v23, %v1033_v19  ;;  %v1119_v21 = vor.u32 4788187, %v1118_v59  ;;  %v1122_v30 = vcvt.s32.f32 %v1115_v16 }
 0x30b   :  { %v1868_v33 = vsel %vm1861_vm12, %v1864_v63, %v1867_v42  ;;  %v1038_v17 = vsel %vm1031_vm4, %v1034_v44, %v1037_v22  ;;  %v6497_v51 = vshrl.u32 %v1204_v48, 30  ;;  %v1129_v58 = vsel %vm1041_vm14, 0, %v1127_v50 }
 0x30c   :  { %v1869_v4 = vsel %vm1029_vm7, nan, %v1868_v33  ;;  %v1120_v29 = vand.u32 2147483647, %v1119_v21  ;;  %v1039_v41 = vsel %vm1029_vm7, nan, %v1038_v17  ;;  %v1963_v43 = vadd.s32 3, %v1129_v58 }
 0x30d   :  { %2199 = vmatprep.mubr.f32.mxu0 %v1869_v4  ;;  %v1206_v32 = vshll.u32 %v6497_v51, 30  ;;  %v1133_v54 = vand.u32 3, %v1129_v58  ;;  %vm1145_vm8 = vcmp.lt.s32.totalorder %v7818_v39, 0  ;;  %vm1144_vm10 = vcmp.le.f32.partialorder %v1143_v0, 0.7853982 }
 0x30e   :  { %2200 = vmatmul.mubr.f32.gmra.mrb[18].mxu0 %v1039_v41  ;;  %v1123_v9 = vmul.f32 %v1122_v30, %v1120_v29  ;;  %v1964_v57 = vand.u32 3, %v1963_v43 }
 0x30f   :  { %v1207_v36 = vsub.s32 %v1203_v34, %v1206_v32  ;;  %vm1135_vm3 = vcmp.eq.s32.totalorder %v1133_v54, 0  ;;  %vm1138_vm6 = vcmp.eq.s32.totalorder %v1133_v54, 2  ;;  %vm1134_vm4 = vcmp.lt.s32.totalorder %v1133_v54, 2 }
 0x310   :  { %v1124_v55 = vxor.u32 2147483648, %v1123_v9  ;;  %vm1966_vm15 = vcmp.eq.s32.totalorder %v1964_v57, 0  ;;  %vm1969_vm5 = vcmp.eq.s32.totalorder %v1964_v57, 2  ;;  %vm1965_vm1 = vcmp.lt.s32.totalorder %v1964_v57, 2 }
 0x311   :  { %v1209_v25 = vsub.s32 0, %v1207_v36  ;;  %v1229_v34 = vsub.s32 4, %v6497_v51 }
 0x312   :  { %v1125_v14 = vsel %vm1042_vm13, %v1124_v55, %v1123_v9 }
 0x313   :  { %v1128_v13 = vsel %vm1041_vm14, %v5637_v15, %v1125_v14  ;;  %v4508_v62 = vmin.u32 %v1209_v25, %v1207_v36  ;;  %v1230_v15 = vsel %vm1145_vm8, %v1229_v34, %v6497_v51 }
 0x314   :  { %5118 = vcosq.f32 %v1128_v13  ;;  %v1232_v44 = vsel %vm1144_vm10, 0, %v1230_v15 }
 0x315   :  { %5120 = vsinq.f32 %v1128_v13  ;;  %v1211_v1 = vclz %v4508_v62  ;;  %v2067_v21 = vadd.s32 3, %v1232_v44  ;;  %v1236_v17 = vand.u32 3, %v1232_v44 }
 0x317   :  { %v4509_v53 = vadd.s32 4294967294, %v1211_v1  ;;  %v2068_v33 = vand.u32 3, %v2067_v21  ;;  %vm1241_vm0 = vcmp.eq.s32.totalorder %v1236_v17, 2  ;;  %vm1238_vm7 = vcmp.eq.s32.totalorder %v1236_v17, 0  ;;  %v4631_v21 = vld [vmem:[%s7760_s4 + $0x180] sm:$0xff] }
 0x318   :  { %vm1237_vm14 = vcmp.lt.s32.totalorder %v1236_v17, 2  ;;  %v4615_v17 = vld [vmem:[%s7760_s4 + $0x100] sm:$0xff] }
 0x319   :  { %vm4510_vm2 = vcmp.lt.s32.totalorder %v4509_v53, 0  ;;  %vm2073_vm9 = vcmp.eq.s32.totalorder %v2068_v33, 2  ;;  %vm2070_vm12 = vcmp.eq.s32.totalorder %v2068_v33, 0  ;;  %vm2069_vm13 = vcmp.lt.s32.totalorder %v2068_v33, 2  ;;  %v4632_v33 = vld [vmem:[%s7760_s4 + $0x188] sm:$0xff] }
 0x31a   :  { %v1214_v6 = vsel %vm4510_vm2, 0, %v4509_v53  ;;  %vm1235_vm2 = vweird.f32 %v7818_v39 }
 0x31b   :  { %v1215_v52 = vsub.s32 32, %v1214_v6  ;;  %v1219_v38 = vsub.s32 4294967266, %v1214_v6  ;;  %v1216_v26 = vshll.u32 %v1207_v36, %v1214_v6 }
 0x31d   :  { %v1217_v35 = vshrl.u32 %v1199_v37, %v1215_v52  ;;  %v1220_v2 = vadd.s32 127, %v1219_v38 }
 0x31e   :  { %v5119_v46 = vpop.eup %5118 }
 0x31f   :  { %v5121_v8 = vpop.eup %5120  ;;  %v1139_v11 = vxor.u32 2147483648, %v5119_v46  ;;  %v1218_v23 = vor.u32 %v1217_v35, %v1216_v26  ;;  %v1221_v40 = vshll.u32 %v1220_v2, 23 }
 0x320   :  { %v1136_v20 = vxor.u32 2147483648, %v5121_v8 }
 0x321   :  { %v1971_v27 = vsel %vm1969_vm5, %v1139_v11, %v5121_v8  ;;  %v1140_v28 = vsel %vm1138_vm6, %v1139_v11, %v5121_v8  ;;  %v1222_v49 = vor.u32 4788187, %v1221_v40  ;;  %v1225_v16 = vcvt.s32.f32 %v1218_v23 }
 0x322   :  { %v1968_v5 = vsel %vm1966_vm15, %v5119_v46, %v1136_v20  ;;  %v1137_v56 = vsel %vm1135_vm3, %v5119_v46, %v1136_v20  ;;  %vm7821_vm3 = vcmask 523264  }
 0x323   :  { %v1972_v60 = vsel %vm1965_vm1, %v1968_v5, %v1971_v27  ;;  %v1141_v3 = vsel %vm1134_vm4, %v1137_v56, %v1140_v28  ;;  %v1223_v19 = vand.u32 2147483647, %v1222_v49  ;;  %v5190_v56 = vld [vmem:[%s7759_s2 + $0x8] sm:$0xff]  ;;  %vm7822_vm15 = vmmov %vm7821_vm3  ;;  %v5193_v49 = vld [vmem:[%s7759_s2 + $0x20] sm:$0xff] }
 0x324   :  { %v1973_v18 = vsel %vm1132_vm11, nan, %v1972_v60  ;;  %v1142_v24 = vsel %vm1132_vm11, nan, %v1141_v3  ;;  %v5191_v60 = vld [vmem:[%s7759_s2 + $0x10] sm:$0xff]  ;;  %v5192_v3 = vld [vmem:[%s7759_s2 + $0x18] sm:$0xff]  ;;  %vm7823_vm5 = vmmov %vm7821_vm3 }
 0x325   :  { %2204 = vmatprep.mubr.f32.mxu0 %v1973_v18  ;;  %v1226_v59 = vmul.f32 %v1225_v16, %v1223_v19  ;;  %vm7824_vm6 = vmmov %vm7821_vm3  ;;  %v5194_v18 = vld [vmem:[%s7759_s2 + $0x28] sm:$0xff]  ;;  %v5196_v19 = vld [vmem:[%s7759_s2 + $0x38] sm:$0xff] }
 0x326   :  { %2205 = vmatmul.mubr.f32.gmra.mrb[20].mxu0 %v1142_v24  ;;  %vm7825_vm1 = vmmov %vm7821_vm3  ;;  %v5195_v24 = vld [vmem:[%s7759_s2 + $0x30] sm:$0xff] }
 0x327   :  { %v1227_v42 = vxor.u32 2147483648, %v1226_v59  ;;  %vm7826_vm4 = vmmov %vm7825_vm1 }
 0x328   :  { %vm7827_vm11 = vmmov %vm7825_vm1 }
 0x329   :  { %v1228_v22 = vsel %vm1145_vm8, %v1227_v42, %v1226_v59  ;;  %vm7828_vm8 = vcmask 261120  }
 0x32a   :  { %v1231_v63 = vsel %vm1144_vm10, %v7818_v39, %v1228_v22  ;;  %vm7829_vm10 = vmmov %vm7825_vm1 }
 0x32b   :  { %5122 = vcosq.f32 %v1231_v63 }
 0x32c   :  { %5124 = vsinq.f32 %v1231_v63 }
 0x335   :  { %v5123_v48 = vpop.eup %5122 }
 0x336   :  { %v5125_v4 = vpop.eup %5124  ;;  %v1242_v29 = vxor.u32 2147483648, %v5123_v48 }
 0x337   :  { %v1239_v30 = vxor.u32 2147483648, %v5125_v4 }
 0x338   :  { %v2075_v41 = vsel %vm2073_vm9, %v1242_v29, %v5125_v4  ;;  %v1243_v0 = vsel %vm1241_vm0, %v1242_v29, %v5125_v4  ;;  %v4616_v4 = vld [vmem:[%s7760_s4 + $0x108] sm:$0xff]  ;;  %v4633_v29 = vld [vmem:[%s7760_s4 + $0x190] sm:$0xff]  ;;  %vm7830_vm9 = vcmask 785408   ;;  %vm7831_vm0 = vmmov %vm7828_vm8 }
 0x339   :  { %v2072_v51 = vsel %vm2070_vm12, %v5123_v48, %v1239_v30  ;;  %v1240_v9 = vsel %vm1238_vm7, %v5123_v48, %v1239_v30  ;;  %v4981_v48 = vpack.c.bf16 %v4632_v33, %v4631_v21  ;;  %v4634_v30 = vld [vmem:[%s7760_s4 + $0x198] sm:$0xff]  ;;  %vm7832_vm12 = vmmov %vm7825_vm1 }
 0x33a   :  { %v2076_v12 = vsel %vm2069_vm13, %v2072_v51, %v2075_v41  ;;  %v1244_v32 = vsel %vm1237_vm14, %v1240_v9, %v1243_v0  ;;  %v4983_v41 = vpack.c.bf16 %v4616_v4, %v4615_v17  ;;  %v4985_v0 = vpack.c.bf16 %v4634_v30, %v4633_v29  ;;  %v4617_v51 = vld [vmem:[%s7760_s4 + $0x110] sm:$0xff]  ;;  %v4618_v9 = vld [vmem:[%s7760_s4 + $0x118] sm:$0xff]  ;;  %v6712_v29 = vld [vmem:[%s7761_s0] ss:$0 sm:$0xff] }
 0x33b   :  { %v2077_v55 = vsel %vm1235_vm2, nan, %v2076_v12  ;;  %v1245_v36 = vsel %vm1235_vm2, nan, %v1244_v32  ;;  %v4635_v12 = vld [vmem:[%s7760_s4 + $0x1a0] sm:$0xff]  ;;  %v4636_v32 = vld [vmem:[%s7760_s4 + $0x1a8] sm:$0xff]  ;;  %vm7833_vm7 = vmmov %vm7830_vm9 }
 0x33c   :  { %2209 = vmatprep.mubr.f32.mxu0 %v2077_v55  ;;  %v4987_v55 = vpack.c.bf16 %v4618_v9, %v4617_v51  ;;  %vm7834_vm13 = vmmov %vm7831_vm0 }
 0x33d   :  { %2210 = vmatmul.mubr.f32.gmra.mrb[22].mxu0 %v1245_v36  ;;  %v4989_v36 = vpack.c.bf16 %v4636_v32, %v4635_v12  ;;  %vm7835_vm14 = vmmov %vm7825_vm1 }
 0x33e   :  { %vm7836_vm2 = vmmov %vm7833_vm7 }
 0x37b   :  { %v4713_v14 = vpop.f32.mrb[8].mxu0 }
 0x37c   :  { %v4714_v50 = vpop.f32.mrb[9].mxu0 }
 0x37d   :  { %v4715_v13 = vadd.f32 %v4714_v50, %v4713_v14  ;;  %v4619_v14 = vld [vmem:[%s7760_s4 + $0x120] sm:$0xff]  ;;  %v4620_v50 = vld [vmem:[%s7760_s4 + $0x128] sm:$0xff] }
 0x387   :  { %v4716_v25 = vpop.f32.mrb[10].mxu0 }
 0x388   :  { %v4717_v58 = vpop.f32.mrb[11].mxu0 }
 0x389   :  { %v4718_v62 = vadd.f32 %v4717_v58, %v4716_v25  ;;  %v4638_v25 = vld [vmem:[%s7760_s4 + $0x1b8] sm:$0xff]  ;;  %v4991_v58 = vpack.c.bf16 %v4620_v50, %v4619_v14 }
 0x38b   :  { %v4965_v1 = vpack.c.bf16 %v4718_v62, %v4715_v13  ;;  %v4637_v13 = vld [vmem:[%s7760_s4 + $0x1b0] sm:$0xff] }
 0x38c   :  { %v4993_v62 = vpack.c.bf16 %v4638_v25, %v4637_v13 }
 0x38d   :  { %4966 = vmatprep.subr.bf16.mxu1 %v4965_v1 }
 0x38e   :  { %4968 = vmatpush3.bf16.msra.mxu1 %v4965_v1  ;;  %v4621_v1 = vld [vmem:[%s7760_s4 + $0x130] sm:$0xff] }
 0x398   :  { %v4719_v43 = vpop.f32.mrb[12].mxu0 }
 0x399   :  { %v4720_v53 = vpop.f32.mrb[13].mxu0 }
 0x39a   :  { %v4721_v54 = vadd.f32 %v4720_v53, %v4719_v43  ;;  %v4622_v43 = vld [vmem:[%s7760_s4 + $0x138] sm:$0xff]  ;;  %v4639_v53 = vld [vmem:[%s7760_s4 + $0x1c0] sm:$0xff] }
 0x3b5   :  { %v4722_v57 = vpop.f32.mrb[14].mxu0 }
 0x3b6   :  { %v4723_v39 = vpop.f32.mrb[15].mxu0 }
 0x3b7   :  { %v4724_v6 = vadd.f32 %v4723_v39, %v4722_v57  ;;  %v4995_v57 = vpack.c.bf16 %v4622_v43, %v4621_v1 }
 0x3b9   :  { %v4969_v37 = vpack.c.bf16 %v4724_v6, %v4721_v54  ;;  %v4640_v54 = vld [vmem:[%s7760_s4 + $0x1c8] sm:$0xff]  ;;  %v4623_v6 = vld [vmem:[%s7760_s4 + $0x140] sm:$0xff] }
 0x3ba   :  { %v4997_v39 = vpack.c.bf16 %v4640_v54, %v4639_v53 }
 0x3bb   :  { %4970 = vmatprep.subr.bf16.mxu1 %v4969_v37 }
 0x3bc   :  { %4972 = vmatpush3.bf16.msra.mxu1 %v4969_v37  ;;  %v4624_v37 = vld [vmem:[%s7760_s4 + $0x148] sm:$0xff] }
 0x3cf   :  { %v4725_v52 = vpop.f32.mrb[16].mxu0 }
 0x3d0   :  { %v4726_v38 = vpop.f32.mrb[17].mxu0 }
 0x3d1   :  { %v4727_v46 = vadd.f32 %v4726_v38, %v4725_v52  ;;  %v4641_v52 = vld [vmem:[%s7760_s4 + $0x1d0] sm:$0xff]  ;;  %v4642_v38 = vld [vmem:[%s7760_s4 + $0x1d8] sm:$0xff] }
 0x3e1   :  { %v4728_v8 = vpop.f32.mrb[18].mxu0 }
 0x3e2   :  { %v4729_v11 = vpop.f32.mrb[19].mxu0 }
 0x3e3   :  { %v4730_v26 = vadd.f32 %v4729_v11, %v4728_v8  ;;  %v5001_v8 = vpack.c.bf16 %v4642_v38, %v4641_v52  ;;  %v4625_v11 = vld [vmem:[%s7760_s4 + $0x150] sm:$0xff] }
 0x3e5   :  { %v4973_v35 = vpack.c.bf16 %v4730_v26, %v4727_v46  ;;  %v4999_v46 = vpack.c.bf16 %v4624_v37, %v4623_v6  ;;  %v4626_v26 = vld [vmem:[%s7760_s4 + $0x158] sm:$0xff] }
 0x3e7   :  { %4974 = vmatprep.subr.bf16.mxu1 %v4973_v35 }
 0x3e8   :  { %4976 = vmatpush3.bf16.msra.mxu1 %v4973_v35  ;;  %v4643_v35 = vld [vmem:[%s7760_s4 + $0x1e0] sm:$0xff] }
 0x3f9   :  { %v4731_v2 = vpop.f32.mrb[20].mxu0 }
 0x3fa   :  { %v4732_v20 = vpop.f32.mrb[21].mxu0 }
 0x3fb   :  { %v4733_v27 = vadd.f32 %v4732_v20, %v4731_v2  ;;  %v4644_v2 = vld [vmem:[%s7760_s4 + $0x1e8] sm:$0xff]  ;;  %v5003_v20 = vpack.c.bf16 %v4626_v26, %v4625_v11 }
 0x410   :  { %v4734_v28 = vpop.f32.mrb[22].mxu0 }
 0x411   :  { %v4735_v23 = vpop.f32.mrb[23].mxu0 }
 0x412   :  { %v4736_v40 = vadd.f32 %v4735_v23, %v4734_v28  ;;  %v4627_v28 = vld [vmem:[%s7760_s4 + $0x160] sm:$0xff]  ;;  %v4628_v23 = vld [vmem:[%s7760_s4 + $0x168] sm:$0xff] }
 0x414   :  { %v4977_v5 = vpack.c.bf16 %v4736_v40, %v4733_v27  ;;  %v5005_v27 = vpack.c.bf16 %v4644_v2, %v4643_v35  ;;  %v4645_v40 = vld [vmem:[%s7760_s4 + $0x1f0] sm:$0xff] }
 0x416   :  { %4978 = vmatprep.subr.bf16.mxu1 %v4977_v5 }
 0x417   :  { %4980 = vmatpush3.bf16.msra.mxu1 %v4977_v5  ;;  %v4646_v5 = vld [vmem:[%s7760_s4 + $0x1f8] sm:$0xff] }
 0x418   :  { %4982 = vmatprep.subr.bf16.mxu1 %v4981_v48 }
 0x41a   :  { %4882 = vmatmul.mubr.msk.f32.vlgmr.msra.gmra.mrb[8].mxu1 %vm7821_vm3, %v5190_v56  ;;  %v5007_v56 = vpack.c.bf16 %v4628_v23, %v4627_v28 }
 0x41b   :  { %4884 = vmatprep.mubr.msk.f32.mxu1 %vm7822_vm15, %v5191_v60  ;;  %4984 = vmatpush3.bf16.msra.mxu1 %v4983_v41  ;;  %v5009_v60 = vpack.c.bf16 %v4646_v5, %v4645_v40  ;;  %vm7837_vm15 = vmmov %vm7831_vm0 }
 0x41c   :  { %4986 = vmatprep.subr.bf16.mxu1 %v4985_v0 }
 0x41e   :  { %4885 = vmatmul.mubr.msk.f32.gmra.mrb[10].mxu1 %vm7823_vm5, %v5192_v3  ;;  %v4629_v3 = vld [vmem:[%s7760_s4 + $0x170] sm:$0xff]  ;;  %vm7838_vm5 = vmmov %vm7825_vm1 }
 0x41f   :  { %4887 = vmatprep.mubr.msk.f32.mxu1 %vm7824_vm6, %v5193_v49  ;;  %4988 = vmatpush3.bf16.msra.mxu1 %v4987_v55  ;;  %v4630_v49 = vld [vmem:[%s7760_s4 + $0x178] sm:$0xff]  ;;  %vm7839_vm6 = vmmov %vm7836_vm2 }
 0x420   :  { %4990 = vmatprep.subr.bf16.mxu1 %v4989_v36 }
 0x422   :  { %4888 = vmatmul.mubr.msk.f32.gmra.mrb[12].mxu1 %vm7825_vm1, %v5194_v18  ;;  %v5011_v18 = vpack.c.bf16 %v4630_v49, %v4629_v3 }
 0x423   :  { %4890 = vmatprep.mubr.msk.f32.mxu1 %vm7826_vm4, %v5195_v24  ;;  %4992 = vmatpush3.bf16.msra.mxu1 %v4991_v58  ;;  %vm7840_vm4 = vmmov %vm7831_vm0 }
 0x424   :  { %4994 = vmatprep.subr.bf16.mxu1 %v4993_v62 }
 0x426   :  { %4891 = vmatmul.mubr.msk.f32.gmra.mrb[14].mxu1 %vm7827_vm11, %v5196_v19  ;;  %vm7841_vm11 = vmmov %vm7831_vm0 }
 0x427   :  { %4996 = vmatpush3.bf16.msra.mxu1 %v4995_v57 }
 0x428   :  { %4998 = vmatprep.subr.bf16.mxu1 %v4997_v39 }
 0x42b   :  { %5000 = vmatpush3.bf16.msra.mxu1 %v4999_v46 }
 0x42c   :  { %5002 = vmatprep.subr.bf16.mxu1 %v5001_v8 }
 0x42f   :  { %5004 = vmatpush3.bf16.msra.mxu1 %v5003_v20 }
 0x430   :  { %5006 = vmatprep.subr.bf16.mxu1 %v5005_v27 }
 0x433   :  { %5008 = vmatpush3.bf16.msra.mxu1 %v5007_v56 }
 0x434   :  { %5010 = vmatprep.subr.bf16.mxu1 %v5009_v60 }
 0x437   :  { %5012 = vmatpush3.bf16.msra.mxu1 %v5011_v18 }
 0x4ed   :  { %v6545_v16 = vpop.f32.mrb[8].mxu1 }
 0x4ee   :  { %2354 = vrot.lane.b32.xlu0 %v6545_v16, %s5198_s3  ;;  %2330 = vrot.lane.b32.xlu1 %v6545_v16, %s5199_s7  ;;  %v6551_v59 = vpop.f32.mrb[9].mxu1 }
 0x4f1   :  { %v6553_v34 = vpop.f32.mrb[10].mxu1 }
 0x4f2   :  { %2378 = vrot.lane.b32.xlu1 %v6545_v16, %s5200_s8  ;;  %2328 = vrot.lane.b32.xlu0 %v6551_v59, %s5199_s7  ;;  %v6559_v42 = vpop.f32.mrb[11].mxu1 }
 0x4f5   :  { %v6561_v22 = vpop.f32.mrb[12].mxu1 }
 0x4f6   :  { %2352 = vrot.lane.b32.xlu1 %v6551_v59, %s5198_s3  ;;  %2376 = vrot.lane.b32.xlu0 %v6551_v59, %s5200_s8  ;;  %v6567_v15 = vpop.f32.mrb[13].mxu1 }
 0x4f9   :  { %v6569_v63 = vpop.f32.mrb[14].mxu1 }
 0x4fa   :  { %2358 = vrot.lane.b32.xlu0 %v6553_v34, %s5198_s3  ;;  %2334 = vrot.lane.b32.xlu1 %v6553_v34, %s5199_s7  ;;  %v6575_v44 = vpop.f32.mrb[15].mxu1 }
 0x4fe   :  { %2382 = vrot.lane.b32.xlu1 %v6553_v34, %s5200_s8  ;;  %2332 = vrot.lane.b32.xlu0 %v6559_v42, %s5199_s7 }
 0x502   :  { %2356 = vrot.lane.b32.xlu1 %v6559_v42, %s5198_s3  ;;  %2380 = vrot.lane.b32.xlu0 %v6559_v42, %s5200_s8 }
 0x506   :  { %2362 = vrot.lane.b32.xlu0 %v6561_v22, %s5198_s3  ;;  %2338 = vrot.lane.b32.xlu1 %v6561_v22, %s5199_s7 }
 0x50a   :  { %2360 = vrot.lane.b32.xlu1 %v6567_v15, %s5198_s3  ;;  %2336 = vrot.lane.b32.xlu0 %v6567_v15, %s5199_s7 }
 0x50e   :  { %2386 = vrot.lane.b32.xlu1 %v6561_v22, %s5200_s8  ;;  %2384 = vrot.lane.b32.xlu0 %v6567_v15, %s5200_s8 }
 0x512   :  { %2364 = vrot.lane.b32.xlu1 %v6575_v44, %s5198_s3  ;;  %2340 = vrot.lane.b32.xlu0 %v6575_v44, %s5199_s7 }
 0x516   :  { %2342 = vrot.lane.b32.xlu1 %v6569_v63, %s5199_s7  ;;  %2388 = vrot.lane.b32.xlu0 %v6575_v44, %s5200_s8 }
 0x51a   :  { %2390 = vrot.lane.b32.xlu1 %v6569_v63, %s5200_s8  ;;  %2366 = vrot.lane.b32.xlu0 %v6569_v63, %s5198_s3 }
 0x560   :  { %v2355_v24 = vpop.permute.xlu0 %2354  ;;  %v2331_v19 = vpop.permute.xlu1 %2330 }
 0x561   :  { %v2401_v21 = vsel %vm7828_vm8, %v6545_v16, %v2331_v19 }
 0x562   :  { %v2409_v33 = vsel %vm7829_vm10, %v2401_v21, %v2355_v24  ;;  %vm7842_vm10 = vmmov %vm7838_vm5 }
 0x564   :  { %v2379_v17 = vpop.permute.xlu1 %2378  ;;  %v2329_v48 = vpop.permute.xlu0 %2328 }
 0x565   :  { %v2417_v4 = vsel %vm7830_vm9, %v2409_v33, %v2379_v17  ;;  %v2400_v0 = vsel %vm7831_vm0, %v6551_v59, %v2329_v48  ;;  %vm7843_vm9 = vmmov %vm7838_vm5 }
 0x566   :  { %v6715_v30 = vmul.f32 %v6712_v29, %v2417_v4  ;;  %vm7844_vm0 = vmmov %vm7836_vm2 }
 0x568   :  { %v2538_v41 = vand.u32 2139095040, %v6715_v30  ;;  %v2353_v16 = vpop.permute.xlu1 %2352  ;;  %v2377_v51 = vpop.permute.xlu0 %2376  ;;  %v7780_v35 = vand.u32 2147483647, %v6715_v30 }
 0x569   :  { %v2408_v9 = vsel %vm7832_vm12, %v2400_v0, %v2353_v16  ;;  %vm7845_vm12 = vmmov %vm7844_vm0 }
 0x56a   :  { %v2539_v12 = vshrl.u32 %v2538_v41, 23  ;;  %v2416_v32 = vsel %vm7833_vm7, %v2408_v9, %v2377_v51  ;;  %v2542_v5 = vand.u32 8388607, %v7780_v35 }
 0x56b   :  { %v6723_v55 = vmul.f32 %v6712_v29, %v2416_v32 }
 0x56c   :  { %v4555_v36 = vadd.s32 4294967169, %v2539_v12  ;;  %v2359_v14 = vpop.permute.xlu0 %2358  ;;  %v2335_v50 = vpop.permute.xlu1 %2334  ;;  %v2543_v48 = vor.u32 8388608, %v2542_v5 }
 0x56d   :  { %v2435_v13 = vand.u32 2139095040, %v6723_v55  ;;  %v2403_v25 = vsel %vm7834_vm13, %v6553_v34, %v2335_v50  ;;  %v7781_v40 = vand.u32 2147483647, %v6723_v55 }
 0x56e   :  { %v2545_v58 = vadd.s32 1, %v4555_v36  ;;  %v2411_v62 = vsel %vm7835_vm14, %v2403_v25, %v2359_v14  ;;  %vm7846_vm14 = vmmov %vm7840_vm4 }
 0x56f   :  { %v2436_v59 = vshrl.u32 %v2435_v13, 23  ;;  %v2439_v17 = vand.u32 8388607, %v7781_v40 }
 0x570   :  { %v2383_v1 = vpop.permute.xlu1 %2382  ;;  %v2333_v43 = vpop.permute.xlu0 %2332  ;;  %vm2546_vm3 = vcmp.gt.s32.totalorder %v2545_v58, 0 }
 0x571   :  { %v4551_v53 = vadd.s32 4294967169, %v2436_v59  ;;  %v2419_v54 = vsel %vm7836_vm2, %v2411_v62, %v2383_v1  ;;  %v2402_v6 = vsel %vm7837_vm15, %v6559_v42, %v2333_v43  ;;  %v2547_v46 = vsel %vm2546_vm3, %v2545_v58, 0  ;;  %vm7847_vm3 = vmmov %vm7838_vm5 }
 0x572   :  { %v6731_v57 = vmul.f32 %v6712_v29, %v2419_v54  ;;  %v6742_v27 = vand.u32 31, %v2547_v46  ;;  %v6766_v32 = vshrl.u32 %v2547_v46, 5  ;;  %v2440_v50 = vor.u32 8388608, %v2439_v17  ;;  %vm7848_vm15 = vmmov %vm7844_vm0 }
 0x573   :  { %v2442_v39 = vadd.s32 1, %v4551_v53  ;;  %v6782_v43 = vshll.u32 %v2543_v48, 8 }
 0x574   :  { %v2357_v37 = vpop.permute.xlu1 %2356  ;;  %v2381_v52 = vpop.permute.xlu0 %2380  ;;  %v2744_v34 = vand.u32 2139095040, %v6731_v57  ;;  %v6749_v18 = vsub.s32 32, %v6742_v27  ;;  %v2561_v36 = vshll.u32 %v7785_v31, %v6742_v27  ;;  %v2564_v59 = vshll.u32 %v7811_v7, %v6742_v27 }
 0x575   :  { %v2410_v38 = vsel %vm7838_vm5, %v2402_v6, %v2357_v37  ;;  %vm2443_vm1 = vcmp.gt.s32.totalorder %v2442_v39, 0  ;;  %vm2570_vm13 = vcmp.lt.s32.totalorder %v6766_v32, 4 }
 0x576   :  { %v2418_v8 = vsel %vm7839_vm6, %v2410_v38, %v2381_v52  ;;  %v2745_v11 = vshrl.u32 %v2744_v34, 23  ;;  %v2444_v42 = vsel %vm2443_vm1, %v2442_v39, 0  ;;  %v2562_v9 = vshrl.u32 %v7811_v7, %v6749_v18  ;;  %vm7850_vm1 = vmmov %vm7840_vm4 }
 0x577   :  { %v6739_v26 = vmul.f32 %v6712_v29, %v2418_v8  ;;  %v6751_v24 = vand.u32 31, %v2444_v42  ;;  %v2565_v14 = vshrl.u32 %v7815_v45, %v6749_v18  ;;  %v6780_v62 = vshrl.u32 %v2444_v42, 5 }
 0x578   :  { %v2363_v2 = vpop.permute.xlu0 %2362  ;;  %v2339_v20 = vpop.permute.xlu1 %2338  ;;  %v4563_v28 = vadd.s32 4294967169, %v2745_v11  ;;  %v6784_v53 = vor.u32 %v2562_v9, %v2561_v36  ;;  %v6795_v11 = vshll.u32 %v2440_v50, 8 }
 0x579   :  { %v2641_v23 = vand.u32 2139095040, %v6739_v26  ;;  %v2405_v19 = vsel %vm7840_vm4, %v6561_v22, %v2339_v20  ;;  %v2447_v22 = vsub.s32 32, %v6751_v24  ;;  %v2566_v46 = vor.u32 %v2565_v14, %v2564_v59  ;;  %vm7851_vm4 = vmmov %vm7847_vm3 }
 0x57a   :  { %v2751_v56 = vadd.s32 1, %v4563_v28  ;;  %v2413_v41 = vsel %vm7842_vm10, %v2405_v19, %v2363_v2  ;;  %v2458_v8 = vshll.u32 %v7785_v31, %v6751_v24  ;;  %v6799_v2 = vshrl.u32 %v7804_v10, %v6749_v18 }
 0x57b   :  { %v2642_v60 = vshrl.u32 %v2641_v23, 23  ;;  %v2459_v54 = vshrl.u32 %v7811_v7, %v2447_v22  ;;  %v2462_v37 = vshrl.u32 %v7815_v45, %v2447_v22  ;;  %v2461_v20 = vshll.u32 %v7811_v7, %v6751_v24 }
 0x57c   :  { %v2361_v3 = vpop.permute.xlu1 %2360  ;;  %v2337_v49 = vpop.permute.xlu0 %2336  ;;  %vm2752_vm8 = vcmp.gt.s32.totalorder %v2751_v56, 0  ;;  %v6808_v5 = vsel %vm2570_vm13, %v6784_v53, 920167782  ;;  %vm2467_vm2 = vcmp.lt.s32.totalorder %v6780_v62, 4  ;;  %v2449_v9 = vshll.u32 %v7804_v10, %v6751_v24 }
 0x57d   :  { %v2404_v21 = vsel %vm7841_vm11, %v6567_v15, %v2337_v49  ;;  %v4559_v33 = vadd.s32 4294967169, %v2642_v60  ;;  %v2753_v13 = vsel %vm2752_vm8, %v2751_v56, 0  ;;  %v6810_v56 = vor.u32 %v2459_v54, %v2458_v8 }
 0x57e   :  { %v2412_v16 = vsel %vm7843_vm9, %v2404_v21, %v2361_v3  ;;  %v6791_v52 = vand.u32 31, %v2753_v13  ;;  %v2463_v49 = vor.u32 %v2462_v37, %v2461_v20  ;;  %v2453_v36 = vshrl.u32 %v7787_v61, %v2447_v22  ;;  %vm7852_vm9 = vmmov %vm7844_vm0 }
 0x57f   :  { %v2648_v4 = vadd.s32 1, %v4559_v33  ;;  %v2450_v33 = vshrl.u32 %v7808_v47, %v2447_v22  ;;  %v2456_v14 = vshrl.u32 %v7785_v31, %v2447_v22  ;;  %v2473_v50 = vsel %vm2467_vm2, %v6810_v56, 920167782 }
 0x580   :  { %v2387_v0 = vpop.permute.xlu1 %2386  ;;  %v2385_v51 = vpop.permute.xlu0 %2384  ;;  %v6816_v19 = vsub.s32 32, %v6791_v52  ;;  %v2767_v54 = vshll.u32 %v7785_v31, %v6791_v52  ;;  %vm2464_vm8 = vcmp.lt.s32.totalorder %v6780_v62, 1  ;;  %vm2466_vm10 = vcmp.lt.s32.totalorder %v6780_v62, 3 }
 0x581   :  { %v2421_v15 = vsel %vm7844_vm0, %v2413_v41, %v2387_v0  ;;  %v2420_v12 = vsel %vm7845_vm12, %v2412_v16, %v2385_v51  ;;  %vm2649_vm7 = vcmp.gt.s32.totalorder %v2648_v4, 0  ;;  %v6825_v41 = vshrl.u32 %v2753_v13, 5 }
 0x582   :  { %v6773_v25 = vmul.f32 %v6712_v29, %v2421_v15  ;;  %v6776_v58 = vmul.f32 %v6712_v29, %v2420_v12  ;;  %v2650_v34 = vsel %vm2649_vm7, %v2648_v4, 0  ;;  %v2448_v4 = vshrl.u32 %v7804_v10, %v2447_v22 }
 0x583   :  { %v6813_v60 = vand.u32 31, %v2650_v34  ;;  %v2452_v12 = vshll.u32 %v7808_v47, %v6751_v24  ;;  %v2477_v13 = vsel %vm2467_vm2, %v2463_v49, 1326507024  ;;  %v2768_v59 = vshrl.u32 %v7811_v7, %v6816_v19 }
 0x584   :  { %v2341_v1 = vpop.permute.xlu0 %2340  ;;  %v2950_v39 = vand.u32 2139095040, %v6773_v25  ;;  %v2847_v6 = vand.u32 2139095040, %v6776_v58  ;;  %v2365_v38 = vpop.permute.xlu1 %2364  ;;  %v2455_v22 = vshll.u32 %v7787_v61, %v6751_v24  ;;  %vm2776_vm5 = vcmp.lt.s32.totalorder %v6825_v41, 4 }
 0x585   :  { %v2406_v23 = vsel %vm7846_vm14, %v6575_v44, %v2341_v1  ;;  %v6821_v44 = vsel %vm2570_vm13, %v2566_v46, 1326507024  ;;  %v6831_v15 = vsub.s32 32, %v6813_v60  ;;  %v2451_v1 = vor.u32 %v2450_v33, %v2449_v9 }
 0x586   :  { %v2951_v42 = vshrl.u32 %v2950_v39, 23  ;;  %v2848_v28 = vshrl.u32 %v2847_v6, 23  ;;  %v2414_v48 = vsel %vm7847_vm3, %v2406_v23, %v2365_v38  ;;  %v2770_v38 = vshll.u32 %v7811_v7, %v6791_v52 }
 0x587   :  { %v2771_v46 = vshrl.u32 %v7815_v45, %v6816_v19  ;;  %v2665_v8 = vshrl.u32 %v7811_v7, %v6831_v15  ;;  %v6860_v23 = vor.u32 %v2768_v59, %v2767_v54  ;;  %v6862_v24 = vshrl.u32 %v2650_v34, 5 }
 0x588   :  { %v2389_v3 = vpop.permute.xlu0 %2388  ;;  %v4571_v21 = vadd.s32 4294967169, %v2951_v42  ;;  %v4567_v17 = vadd.s32 4294967169, %v2848_v28  ;;  %v2343_v16 = vpop.permute.xlu1 %2342  ;;  %v2454_v42 = vor.u32 %v2453_v36, %v2452_v12  ;;  %v2457_v28 = vor.u32 %v2456_v14, %v2455_v22 }
 0x589   :  { %v2422_v51 = vsel %vm7848_vm15, %v2414_v48, %v2389_v3  ;;  %v2407_v20 = vsel %vm7850_vm1, %v6569_v63, %v2343_v16  ;;  %v2668_v3 = vshrl.u32 %v7815_v45, %v6831_v15  ;;  %v2664_v33 = vshll.u32 %v7785_v31, %v6813_v60 }
 0x58a   :  { %v2957_v0 = vadd.s32 1, %v4571_v21  ;;  %v2854_v39 = vadd.s32 1, %v4567_v17  ;;  %v6847_v6 = vmul.f32 %v6712_v29, %v2422_v51  ;;  %v2772_v63 = vor.u32 %v2771_v46, %v2770_v38 }
 0x58b   :  { %v2667_v16 = vshll.u32 %v7811_v7, %v6813_v60  ;;  %v6874_v34 = vor.u32 %v2665_v8, %v2664_v33  ;;  %v2472_v9 = vsel %vm2464_vm8, %v2451_v1, %v2454_v42  ;;  %v2469_v59 = vsel %vm2467_vm2, %v2457_v28, 2102212464 }
 0x58c   :  { %7849 = vst [vmem:[#allocation2_spill] sm:$0xff] %v6847_v6  ;;  %v2367_v37 = vpop.permute.xlu0 %2366  ;;  %vm2958_vm6 = vcmp.gt.s32.totalorder %v2957_v0, 0  ;;  %v2391_v49 = vpop.permute.xlu1 %2390  ;;  %vm2855_vm11 = vcmp.gt.s32.totalorder %v2854_v39, 0  ;;  %v3053_v48 = vand.u32 2139095040, %v6847_v6  ;;  %v6888_v54 = vsel %vm2776_vm5, %v6860_v23, 920167782 }
 0x58d   :  { %v2415_v21 = vsel %vm7851_vm4, %v2407_v20, %v2367_v37  ;;  %v2959_v17 = vsel %vm2958_vm6, %v2957_v0, 0  ;;  %v2474_v0 = vsel %vm2466_vm10, %v2457_v28, %v2473_v50  ;;  %v2669_v12 = vor.u32 %v2668_v3, %v2667_v16 }
 0x58e   :  { %v2423_v51 = vsel %vm7852_vm9, %v2415_v21, %v2391_v49  ;;  %v6881_v36 = vand.u32 31, %v2959_v17  ;;  %v2856_v14 = vsel %vm2855_vm11, %v2854_v39, 0  ;;  %vm2673_vm0 = vcmp.lt.s32.totalorder %v6862_v24, 4 }
 0x58f   :  { %v3054_v37 = vshrl.u32 %v3053_v48, 23  ;;  %vm2465_vm12 = vcmp.lt.s32.totalorder %v6780_v62, 2  ;;  %v6894_v50 = vsel %vm2776_vm5, %v2772_v63, 1326507024  ;;  %v6897_v22 = vmul.f32 %v6712_v29, %v2423_v51 }
 0x590   :  { %v2475_v39 = vsel %vm2465_vm12, %v2472_v9, %v2474_v0  ;;  %v2476_v38 = vsel %vm2464_vm8, %v2454_v42, %v2457_v28  ;;  %v6903_v46 = vand.u32 31, %v2856_v14  ;;  %v2468_v8 = vsel %vm2464_vm8, %v2448_v4, %v2451_v1 }
 0x591   :  { %7853 = vst [vmem:[#allocation3_spill] sm:$0xff] %v6897_v22  ;;  %v2470_v20 = vsel %vm2466_vm10, %v2454_v42, %v2469_v59  ;;  %v2478_v3 = vsel %vm2466_vm10, %v6810_v56, %v2477_v13  ;;  %v6915_v29 = vsel %vm2673_vm0, %v6874_v34, 920167782  ;;  %v6919_v28 = vsel %vm2673_vm0, %v2669_v12, 1326507024 }
 0x592   :  { %v6922_v49 = vsub.s32 32, %v6881_v36  ;;  %v2552_v4 = vshll.u32 %v7804_v10, %v6742_v27  ;;  %v4575_v1 = vadd.s32 4294967169, %v3054_v37  ;;  %v2479_v42 = vsel %vm2465_vm12, %v2476_v38, %v2478_v3 }
 0x593   :  { %v6929_v56 = vmul.u32.u64.low %v6795_v11, %v2475_v39  ;;  %v6930_v13 = vmul.u32.u64.high %v6795_v11, %v2475_v39, %v6929_v56  ;;  %v6933_v21 = vshrl.u32 %v2959_v17, 5  ;;  %v6935_v33 = vshrl.u32 %v2856_v14, 5 }
 0x594   :  { %v3156_v48 = vand.u32 2139095040, %v6897_v22  ;;  %v2471_v63 = vsel %vm2465_vm12, %v2468_v8, %v2470_v20  ;;  %v2973_v16 = vshll.u32 %v7785_v31, %v6881_v36  ;;  %v6943_v51 = vsub.s32 32, %v6903_v46 }
 0x595   :  { %v6946_v9 = vmul.u32.u64.low %v6795_v11, %v2479_v42  ;;  %v6947_v0 = vmul.u32.u64.high %v6795_v11, %v2479_v42, %v6946_v9  ;;  %v2974_v17 = vshrl.u32 %v7811_v7, %v6922_v49  ;;  %v6953_v12 = vshll.u32 %v7811_v7, %v6881_v36 }
 0x596   :  { %v6957_v62 = vshrl.u32 %v7815_v45, %v6922_v49  ;;  %v2553_v14 = vshrl.u32 %v7808_v47, %v6749_v18  ;;  %v3060_v59 = vadd.s32 1, %v4575_v1  ;;  %v2490_v37 = vadd.s32 1, %v6930_v13 }
 0x597   :  { %v2555_v39 = vshll.u32 %v7808_v47, %v6742_v27  ;;  %v2556_v38 = vshrl.u32 %v7787_v61, %v6749_v18  ;;  %v3157_v8 = vshrl.u32 %v3156_v48, 23  ;;  %v2558_v3 = vshll.u32 %v7787_v61, %v6742_v27 }
 0x598   :  { %v2554_v20 = vor.u32 %v2553_v14, %v2552_v4  ;;  %v2559_v42 = vshrl.u32 %v7785_v31, %v6749_v18  ;;  %v2871_v9 = vshrl.u32 %v7811_v7, %v6943_v51  ;;  %v2487_v1 = vmul.u32 %v6795_v11, %v2471_v63 }
 0x599   :  { %vm2489_vm7 = vc.u32 %v6947_v0, %v6929_v56  ;;  %v2557_v35 = vor.u32 %v2556_v38, %v2555_v39  ;;  %vm2567_vm14 = vcmp.lt.s32.totalorder %v6766_v32, 1  ;;  %vm2569_vm2 = vcmp.lt.s32.totalorder %v6766_v32, 3 }
 0x59a   :  { %v2491_v40 = vsel %vm2489_vm7, %v2490_v37, %v6930_v13  ;;  %v2560_v22 = vor.u32 %v2559_v42, %v2558_v3  ;;  %v2874_v27 = vshrl.u32 %v7815_v45, %v6943_v51  ;;  %v2581_v48 = vsel %vm2569_vm2, %v6784_v53, %v6821_v44 }
 0x59b   :  { %v2492_v18 = vadd.s32 %v2491_v40, %v2487_v1  ;;  %v2575_v4 = vsel %vm2567_vm14, %v2554_v20, %v2557_v35  ;;  %vm2568_vm3 = vcmp.lt.s32.totalorder %v6766_v32, 2  ;;  %vm3061_vm15 = vcmp.gt.s32.totalorder %v3060_v59, 0 }
 0x59c   :  { %v2572_v11 = vsel %vm2570_vm13, %v2560_v22, 2102212464  ;;  %v2577_v13 = vsel %vm2569_vm2, %v2560_v22, %v6808_v5  ;;  %v2579_v63 = vsel %vm2567_vm14, %v2557_v35, %v2560_v22  ;;  %v2571_v39 = vsel %vm2567_vm14, %v6799_v2, %v2554_v20 }
 0x59d   :  { %v2493_v14 = vadd.s32 536870912, %v2492_v18  ;;  %v2578_v37 = vsel %vm2568_vm3, %v2575_v4, %v2577_v13  ;;  %v2582_v40 = vsel %vm2568_vm3, %v2579_v63, %v2581_v48  ;;  %v2573_v38 = vsel %vm2569_vm2, %v2557_v35, %v2572_v11 }
 0x59e   :  { %v6992_v53 = vmul.u32.u64.low %v6782_v43, %v2582_v40  ;;  %v6993_v44 = vmul.u32.u64.high %v6782_v43, %v2582_v40, %v6992_v53  ;;  %vm2982_vm13 = vcmp.lt.s32.totalorder %v6933_v21, 4  ;;  %v7003_v42 = vor.u32 %v2974_v17, %v2973_v16 }
 0x59f   :  { %v6996_v3 = vshrl.u32 %v2493_v14, 30  ;;  %v6999_v5 = vmul.u32.u64.low %v6782_v43, %v2578_v37  ;;  %v7000_v22 = vmul.u32.u64.high %v6782_v43, %v2578_v37, %v6999_v5  ;;  %v2870_v1 = vshll.u32 %v7785_v31, %v6903_v46 }
 0x5a0   :  { %v2873_v35 = vshll.u32 %v7811_v7, %v6903_v46  ;;  %vm2879_vm6 = vcmp.lt.s32.totalorder %v6935_v33, 4  ;;  %v2978_v2 = vor.u32 %v6957_v62, %v6953_v12  ;;  %v3062_v20 = vsel %vm3061_vm15, %v3060_v59, 0 }
 0x5a1   :  { %v2495_v4 = vshll.u32 %v6996_v3, 30  ;;  %v2574_v48 = vsel %vm2568_vm3, %v2571_v39, %v2573_v38  ;;  %v7016_v16 = vor.u32 %v2871_v9, %v2870_v1  ;;  %v4579_v11 = vadd.s32 4294967169, %v3157_v8 }
 0x5a2   :  { %v2875_v17 = vor.u32 %v2874_v27, %v2873_v35  ;;  %vm2592_vm1 = vc.u32 %v6993_v44, %v6999_v5  ;;  %v2593_v63 = vadd.s32 1, %v7000_v22  ;;  %v7784_v12 = vand.u32 2147483647, %v6739_v26 }
 0x5a3   :  { %v7020_v13 = vsub.s32 %v2492_v18, %v2495_v4  ;;  %v2659_v62 = vshrl.u32 %v7787_v61, %v6831_v15  ;;  %v7029_v32 = vsel %vm2982_vm13, %v7003_v42, 920167782  ;;  %v7031_v59 = vand.u32 31, %v3062_v20 }
 0x5a4   :  { %v2590_v8 = vmul.u32 %v6782_v43, %v2574_v48  ;;  %v2662_v9 = vshrl.u32 %v7785_v31, %v6831_v15  ;;  %v2594_v18 = vsel %vm2592_vm1, %v2593_v63, %v7000_v22  ;;  %v2658_v14 = vshll.u32 %v7808_v47, %v6813_v60 }
 0x5a5   :  { %7854 = vst [vmem:[#allocation4_spill] sm:$0xff] %v7031_v59  ;;  %v2498_v27 = vsub.s32 0, %v7020_v13  ;;  %v2661_v37 = vshll.u32 %v7787_v61, %v6813_v60  ;;  %v7044_v40 = vsel %vm2982_vm13, %v2978_v2, 1326507024  ;;  %v7046_v39 = vshrl.u32 %v3062_v20, 5 }
 0x5a6   :  { %v2595_v43 = vadd.s32 %v2594_v18, %v2590_v8  ;;  %v2656_v38 = vshrl.u32 %v7808_v47, %v6831_v15  ;;  %vm2434_vm4 = vcmp.lt.s32.totalorder %v6723_v55, 0  ;;  %v2645_v22 = vand.u32 8388607, %v7784_v12 }
 0x5a7   :  { %7855 = vst [vmem:[#allocation5_spill] sm:$0xff] %v7046_v39  ;;  %v4552_v53 = vmin.u32 %v2498_v27, %v7020_v13  ;;  %v2660_v1 = vor.u32 %v2659_v62, %v2658_v14  ;;  %v2663_v35 = vor.u32 %v2662_v9, %v2661_v37  ;;  %v7057_v2 = vsel %vm2879_vm6, %v7016_v16, 920167782 }
 0x5a8   :  { %v3163_v20 = vadd.s32 1, %v4579_v11  ;;  %v2596_v4 = vadd.s32 536870912, %v2595_v43  ;;  %v2655_v48 = vshll.u32 %v7804_v10, %v6813_v60  ;;  %v7063_v63 = vsel %vm2879_vm6, %v2875_v17, 1326507024 }
 0x5a9   :  { %v7066_v8 = vsub.s32 32, %v7031_v59  ;;  %v7070_v62 = vshll.u32 %v7785_v31, %v7031_v59  ;;  %v2500_v9 = vclz %v4552_v53  ;;  %v7074_v27 = vshll.u32 %v7811_v7, %v7031_v59 }
 0x5aa   :  { %v7858_v11 = vand.u32 2147483647, %v6723_v55  ;;  %v2597_v17 = vshrl.u32 %v2596_v4, 30  ;;  %v2657_v18 = vor.u32 %v2656_v38, %v2655_v48  ;;  %vm2670_vm8 = vcmp.lt.s32.totalorder %v6862_v24, 1 }
 0x5ab   :  { %7856 = vst [vmem:[#allocation6_spill] sm:$0xff] %v7066_v8  ;;  %7857 = vst [vmem:[#allocation7_spill] sm:$0xff] %v7074_v27  ;;  %v4553_v14 = vadd.s32 4294967294, %v2500_v9  ;;  %v2646_v37 = vor.u32 8388608, %v2645_v22  ;;  %vm2672_vm10 = vcmp.lt.s32.totalorder %v6862_v24, 3  ;;  %v2682_v53 = vsel %vm2670_vm8, %v2660_v1, %v2663_v35 }
 0x5ac   :  { %vm7078_vm11 = vcmp.le.f32.partialorder %v7858_v11, 0.7853982  ;;  %vm3164_vm9 = vcmp.gt.s32.totalorder %v3163_v20, 0  ;;  %v2518_v12 = vsub.s32 4, %v6996_v3  ;;  %v2598_v31 = vshll.u32 %v2597_v17, 30 }
 0x5ad   :  { %v2684_v11 = vsel %vm2672_vm10, %v6874_v34, %v6919_v28  ;;  %v2488_v38 = vadd.s32 %v6929_v56, %v6947_v0  ;;  %vm4554_vm12 = vcmp.lt.s32.totalorder %v4553_v14, 0  ;;  %vm2671_vm7 = vcmp.lt.s32.totalorder %v6862_v24, 2 }
 0x5ae   :  { %v2675_v22 = vsel %vm2673_vm0, %v2663_v35, 2102212464  ;;  %v2503_v4 = vsel %vm4554_vm12, 0, %v4553_v14  ;;  %vm2537_vm14 = vcmp.lt.s32.totalorder %v6715_v30, 0  ;;  %v7097_v48 = vsub.s32 %v2595_v43, %v2598_v31 }
 0x5af   :  { %v2678_v9 = vsel %vm2670_vm8, %v2657_v18, %v2660_v1  ;;  %v2685_v34 = vsel %vm2671_vm7, %v2682_v53, %v2684_v11  ;;  %v2504_v28 = vsub.s32 32, %v2503_v4  ;;  %v2508_v61 = vsub.s32 4294967266, %v2503_v4 }
 0x5b0   :  { %v2680_v56 = vsel %vm2672_vm10, %v2663_v35, %v6915_v29  ;;  %v2686_v0 = vshll.u32 %v2646_v37, 8  ;;  %v2505_v59 = vshll.u32 %v7020_v13, %v2503_v4  ;;  %v2519_v31 = vsel %vm2434_vm4, %v2518_v12, %v6996_v3 }
 0x5b1   :  { %v2601_v43 = vsub.s32 0, %v7097_v48  ;;  %v2654_v14 = vshrl.u32 %v7804_v10, %v6831_v15  ;;  %v2506_v6 = vshrl.u32 %v2488_v38, %v2504_v28  ;;  %v2509_v53 = vadd.s32 127, %v2508_v61 }
 0x5b2   :  { %v7113_v11 = vmul.u32.u64.low %v2686_v0, %v2685_v34  ;;  %v7114_v39 = vmul.u32.u64.high %v2686_v0, %v2685_v34, %v7113_v11  ;;  %v2676_v13 = vsel %vm2672_vm10, %v2660_v1, %v2675_v22  ;;  %v2681_v3 = vsel %vm2671_vm7, %v2678_v9, %v2680_v56 }
 0x5b3   :  { %v4556_v27 = vmin.u32 %v2601_v43, %v7097_v48  ;;  %v2674_v29 = vsel %vm2670_vm8, %v2654_v14, %v2657_v18  ;;  %v2507_v12 = vor.u32 %v2506_v6, %v2505_v59  ;;  %v2510_v35 = vshll.u32 %v2509_v53, 23 }
 0x5b4   :  { %v2521_v15 = vsel %vm7078_vm11, 0, %v2519_v31  ;;  %v2621_v61 = vsub.s32 4, %v2597_v17  ;;  %v7127_v37 = vshrl.u32 %v7811_v7, %v7066_v8  ;;  %v7131_v38 = vshrl.u32 %v7815_v45, %v7066_v8 }
 0x5b5   :  { %v7134_v18 = vsel %vm3164_vm9, %v3163_v20, 0  ;;  %v2603_v1 = vclz %v4556_v27  ;;  %v2511_v22 = vor.u32 4788187, %v2510_v35  ;;  %v2677_v6 = vsel %vm2671_vm7, %v2674_v29, %v2676_v13 }
 0x5b6   :  { %v7138_v59 = vmul.u32.u64.low %v2686_v0, %v2681_v3  ;;  %v7139_v4 = vmul.u32.u64.high %v2686_v0, %v2681_v3, %v7138_v59  ;;  %v7142_v9 = vand.u32 3, %v2521_v15  ;;  %v2591_v34 = vadd.s32 %v6999_v5, %v6993_v44 }
 0x5b7   :  { %v4557_v28 = vadd.s32 4294967294, %v2603_v1  ;;  %v7794_v56 = vand.u32 2147483647, %v6731_v57  ;;  %v2512_v31 = vand.u32 2147483647, %v2511_v22  ;;  %v2514_v20 = vcvt.s32.f32 %v2507_v12 }
 0x5b8   :  { %v3349_v43 = vadd.s32 3, %v2521_v15  ;;  %v2622_v27 = vsel %vm2537_vm14, %v2621_v61, %v2597_v17  ;;  %v2693_v24 = vmul.u32 %v2686_v0, %v2677_v6  ;;  %vm2695_vm2 = vc.u32 %v7114_v39, %v7138_v59 }
 0x5b9   :  { %vm4558_vm0 = vcmp.lt.s32.totalorder %v4557_v28, 0  ;;  %v2759_v14 = vshrl.u32 %v7808_v47, %v6816_v19  ;;  %v2515_v53 = vmul.f32 %v2514_v20, %v2512_v31  ;;  %v2696_v44 = vadd.s32 1, %v7139_v4 }
 0x5ba   :  { %v2606_v11 = vsel %vm4558_vm0, 0, %v4557_v28  ;;  %v7861_v5 = vmov 2131351028   ;;  %v7862_v13 = vand.u32 2147483647, %v6715_v30  ;;  %v2758_v35 = vshll.u32 %v7804_v10, %v6791_v52 }
 0x5bb   :  { %v2762_v29 = vshrl.u32 %v7861_v5, %v6816_v19  ;;  %v2607_v17 = vsub.s32 32, %v2606_v11  ;;  %v2611_v0 = vsub.s32 4294967266, %v2606_v11  ;;  %v2748_v12 = vand.u32 8388607, %v7794_v56 }
 0x5bc   :  { %vm7158_vm3 = vcmp.le.f32.partialorder %v7862_v13, 0.7853982  ;;  %v2516_v15 = vxor.u32 2147483648, %v2515_v53  ;;  %v2608_v61 = vshll.u32 %v7097_v48, %v2606_v11  ;;  %v2697_v1 = vsel %vm2695_vm2, %v2696_v44, %v7139_v4 }
 0x5bd   :  { %v2761_v22 = vshll.u32 %v7808_v47, %v6791_v52  ;;  %v2609_v6 = vshrl.u32 %v2591_v34, %v2607_v17  ;;  %v2612_v28 = vadd.s32 127, %v2611_v0  ;;  %v2698_v31 = vadd.s32 %v2697_v1, %v2693_v24 }
 0x5be   :  { %v7865_v20 = vmov 2102212464   ;;  %v2517_v56 = vsel %vm2434_vm4, %v2516_v15, %v2515_v53  ;;  %v2760_v45 = vor.u32 %v2759_v14, %v2758_v35  ;;  %v2764_v8 = vshll.u32 %v7861_v5, %v6791_v52 }
 0x5bf   :  { %v2765_v13 = vshrl.u32 %v7865_v20, %v6816_v19  ;;  %v2763_v7 = vor.u32 %v2762_v29, %v2761_v22  ;;  %v2520_v48 = vsel %vm7078_vm11, %v6723_v55, %v2517_v56  ;;  %v2610_v4 = vor.u32 %v2609_v6, %v2608_v61 }
 0x5c0   :  { %v2613_v11 = vshll.u32 %v2612_v28, 23  ;;  %v2699_v34 = vadd.s32 536870912, %v2698_v31  ;;  %5126 = vcosq.f32 %v2520_v48  ;;  %v2749_v24 = vor.u32 8388608, %v2748_v12 }
 0x5c1   :  { %v2766_v44 = vor.u32 %v2765_v13, %v2764_v8  ;;  %vm2773_vm15 = vcmp.lt.s32.totalorder %v6825_v41, 1  ;;  %5128 = vsinq.f32 %v2520_v48  ;;  %vm2775_vm1 = vcmp.lt.s32.totalorder %v6825_v41, 3 }
 0x5c2   :  { %v2614_v17 = vor.u32 4788187, %v2613_v11  ;;  %v2700_v53 = vshrl.u32 %v2699_v34, 30  ;;  %v2781_v52 = vsel %vm2773_vm15, %v2760_v45, %v2763_v7  ;;  %v2787_v8 = vsel %vm2775_vm1, %v6860_v23, %v6894_v50 }
 0x5c3   :  { %v2783_v60 = vsel %vm2775_vm1, %v2766_v44, %v6888_v54  ;;  %v2785_v56 = vsel %vm2773_vm15, %v2763_v7, %v2766_v44  ;;  %v2617_v29 = vcvt.s32.f32 %v2610_v4  ;;  %vm2774_vm4 = vcmp.lt.s32.totalorder %v6825_v41, 2 }
 0x5c4   :  { %v2615_v14 = vand.u32 2147483647, %v2614_v17  ;;  %v2701_v0 = vshll.u32 %v2700_v53, 30  ;;  %v3350_v12 = vand.u32 3, %v3349_v43  ;;  %v2624_v35 = vsel %vm7158_vm3, 0, %v2622_v27 }
 0x5c5   :  { %v2788_v54 = vsel %vm2774_vm4, %v2785_v56, %v2787_v8  ;;  %v2789_v15 = vshll.u32 %v2749_v24, 8  ;;  %vm2527_vm11 = vcmp.eq.s32.totalorder %v7142_v9, 0  ;;  %vm2640_vm8 = vcmp.lt.s32.totalorder %v6739_v26, 0 }
 0x5c6   :  { %v2618_v61 = vmul.f32 %v2617_v29, %v2615_v14  ;;  %v7199_v1 = vsub.s32 %v2698_v31, %v2701_v0  ;;  %v2784_v23 = vsel %vm2774_vm4, %v2781_v52, %v2783_v60  ;;  %vm2526_vm10 = vcmp.lt.s32.totalorder %v7142_v9, 2 }
 0x5c7   :  { %vm2530_vm9 = vcmp.eq.s32.totalorder %v7142_v9, 2  ;;  %v2778_v50 = vsel %vm2776_vm5, %v2766_v44, 2102212464  ;;  %v7207_v43 = vmul.u32.u64.low %v2789_v15, %v2788_v54  ;;  %v7208_v27 = vmul.u32.u64.high %v2789_v15, %v2788_v54, %v7207_v43 }
 0x5c8   :  { %vm2524_vm12 = vweird.f32 %v6723_v55  ;;  %v2619_v22 = vxor.u32 2147483648, %v2618_v61  ;;  %v3453_v6 = vadd.s32 3, %v2624_v35  ;;  %v2704_v28 = vsub.s32 0, %v7199_v1 }
 0x5c9   :  { %v2757_v31 = vshrl.u32 %v7804_v10, %v6816_v19  ;;  %vm3351_vm7 = vcmp.lt.s32.totalorder %v3350_v12, 2  ;;  %vm3352_vm0 = vcmp.eq.s32.totalorder %v3350_v12, 0  ;;  %v2779_v24 = vsel %vm2775_vm1, %v2763_v7, %v2778_v50 }
 0x5ca   :  { %v7214_v13 = vmul.u32.u64.low %v2789_v15, %v2784_v23  ;;  %v7215_v48 = vmul.u32.u64.high %v2789_v15, %v2784_v23, %v7214_v13  ;;  %v2620_v4 = vsel %vm2537_vm14, %v2619_v22, %v2618_v61  ;;  %v4560_v11 = vmin.u32 %v2704_v28, %v7199_v1  ;;  %v5127_v44 = vpop.eup %5126 }
 0x5cb   :  { %v2777_v34 = vsel %vm2773_vm15, %v2757_v31, %v2760_v45  ;;  %vm3355_vm5 = vcmp.eq.s32.totalorder %v3350_v12, 2  ;;  %v2623_v19 = vsel %vm7158_vm3, %v6715_v30, %v2620_v4  ;;  %v7228_v17 = vand.u32 3, %v2624_v35  ;;  %v5129_v60 = vpop.eup %5128 }
 0x5cc   :  { %v2724_v52 = vsub.s32 4, %v2700_v53  ;;  %v2531_v56 = vxor.u32 2147483648, %v5127_v44  ;;  %5130 = vcosq.f32 %v2623_v19  ;;  %v7230_v8 = vand.u32 3, %v3453_v6 }
 0x5cd   :  { %v2706_v14 = vclz %v4560_v11  ;;  %v2528_v29 = vxor.u32 2147483648, %v5129_v60  ;;  %5132 = vsinq.f32 %v2623_v19  ;;  %v2694_v7 = vadd.s32 %v7138_v59, %v7114_v39 }
 0x5ce   :  { %v2780_v45 = vsel %vm2774_vm4, %v2777_v34, %v2779_v24  ;;  %v2532_v3 = vsel %vm2530_vm9, %v2531_v56, %v5129_v60  ;;  %v3357_v0 = vsel %vm3355_vm5, %v2531_v56, %v5129_v60  ;;  %vm2798_vm14 = vc.u32 %v7208_v27, %v7214_v13 }
 0x5cf   :  { %v4561_v35 = vadd.s32 4294967294, %v2706_v14  ;;  %v2529_v54 = vsel %vm2527_vm11, %v5127_v44, %v2528_v29  ;;  %v3354_v61 = vsel %vm3352_vm0, %v5127_v44, %v2528_v29  ;;  %v2725_v23 = vsel %vm2640_vm8, %v2724_v52, %v2700_v53 }
 0x5d0   :  { %v2799_v39 = vadd.s32 1, %v7215_v48  ;;  %v2533_v41 = vsel %vm2526_vm10, %v2529_v54, %v2532_v3  ;;  %v3358_v59 = vsel %vm3351_vm7, %v3354_v61, %v3357_v0  ;;  %v2796_v50 = vmul.u32 %v2789_v15, %v2780_v45 }
 0x5d1   :  { %vm4562_vm2 = vcmp.lt.s32.totalorder %v4561_v35, 0  ;;  %v2534_v43 = vsel %vm2524_vm12, nan, %v2533_v41  ;;  %v3359_v22 = vsel %vm2524_vm12, nan, %v3358_v59  ;;  %v2844_v9 = vand.u32 2147483647, %v6776_v58 }
 0x5d2   :  { %v2709_v6 = vsel %vm4562_vm2, 0, %v4561_v35  ;;  %v2800_v28 = vsel %vm2798_vm14, %v2799_v39, %v7215_v48  ;;  %4185 = vmatprep.mubr.f32.mxu1 %v3359_v22  ;;  %vm2627_vm3 = vweird.f32 %v6715_v30  ;;  %vm2629_vm15 = vcmp.lt.s32.totalorder %v7228_v17, 2 }
 0x5d3   :  { %v2710_v53 = vsub.s32 32, %v2709_v6  ;;  %v2714_v31 = vsub.s32 4294967266, %v2709_v6  ;;  %v2801_v4 = vadd.s32 %v2800_v28, %v2796_v50  ;;  %4186 = vmatmul.mubr.f32.vlgmr.msra.gmra.mrb[16].mxu1 %v2534_v43  ;;  %vm2630_vm1 = vcmp.eq.s32.totalorder %v7228_v17, 0 }
 0x5d4   :  { %vm2633_vm4 = vcmp.eq.s32.totalorder %v7228_v17, 2  ;;  %v7866_v55 = vand.u32 2147483647, %v6739_v26  ;;  %v2711_v15 = vshll.u32 %v7199_v1, %v2709_v6  ;;  %vm3455_vm10 = vcmp.lt.s32.totalorder %v7230_v8, 2 }
 0x5d5   :  { %v2712_v48 = vshrl.u32 %v2694_v7, %v2710_v53  ;;  %v2715_v11 = vadd.s32 127, %v2714_v31  ;;  %v2802_v34 = vadd.s32 536870912, %v2801_v4  ;;  %vm3456_vm9 = vcmp.eq.s32.totalorder %v7230_v8, 0 }
 0x5d6   :  { %vm7261_vm11 = vcmp.le.f32.partialorder %v7866_v55, 0.7853982  ;;  %vm3459_vm12 = vcmp.eq.s32.totalorder %v7230_v8, 2  ;;  %v5131_v44 = vpop.eup %5130  ;;  %v2851_v1 = vand.u32 8388607, %v2844_v9  ;;  %v2862_v29 = vshrl.u32 %v7808_v47, %v6943_v51 }
 0x5d7   :  { %v2727_v24 = vsel %vm7261_vm11, 0, %v2725_v23  ;;  %v2713_v19 = vor.u32 %v2712_v48, %v2711_v15  ;;  %v2716_v52 = vshll.u32 %v2715_v11, 23  ;;  %v7271_v60 = vshrl.u32 %v2802_v34, 30  ;;  %v5133_v56 = vpop.eup %5132 }
 0x5d8   :  { %v2634_v14 = vxor.u32 2147483648, %v5131_v44  ;;  %v2864_v7 = vshll.u32 %v7808_v47, %v6903_v46  ;;  %v2865_v45 = vshrl.u32 %v7861_v5, %v6943_v51  ;;  %v2631_v3 = vxor.u32 2147483648, %v5133_v56 }
 0x5d9   :  { %v2717_v0 = vor.u32 4788187, %v2716_v52  ;;  %v2804_v35 = vshll.u32 %v7271_v60, 30  ;;  %v2868_v54 = vshrl.u32 %v7865_v20, %v6943_v51  ;;  %v2720_v39 = vcvt.s32.f32 %v2713_v19 }
 0x5da   :  { %v3461_v61 = vsel %vm3459_vm12, %v2634_v14, %v5133_v56  ;;  %v2635_v23 = vsel %vm2633_vm4, %v2634_v14, %v5133_v56  ;;  %v2867_v41 = vshll.u32 %v7861_v5, %v6903_v46  ;;  %v3458_v59 = vsel %vm3456_vm9, %v5131_v44, %v2631_v3 }
 0x5db   :  { %v2632_v50 = vsel %vm2630_vm1, %v5131_v44, %v2631_v3  ;;  %v2718_v43 = vand.u32 2147483647, %v2717_v0  ;;  %v7294_v22 = vsub.s32 %v2801_v4, %v2804_v35  ;;  %v3462_v6 = vsel %vm3455_vm10, %v3458_v59, %v3461_v61 }
 0x5dc   :  { %v2636_v28 = vsel %vm2629_vm15, %v2632_v50, %v2635_v23  ;;  %v2861_v53 = vshll.u32 %v7804_v10, %v6903_v46  ;;  %v2866_v31 = vor.u32 %v2865_v45, %v2864_v7  ;;  %v3463_v55 = vsel %vm2627_vm3, nan, %v3462_v6 }
 0x5dd   :  { %v2721_v15 = vmul.f32 %v2720_v39, %v2718_v43  ;;  %v2807_v48 = vsub.s32 0, %v7294_v22  ;;  %v2869_v11 = vor.u32 %v2868_v54, %v2867_v41  ;;  %v7307_v4 = vor.u32 %v7127_v37, %v7070_v62  ;;  %4190 = vmatprep.mubr.f32.mxu1 %v3463_v55 }
 0x5de   :  { %v2637_v17 = vsel %vm2627_vm3, nan, %v2636_v28  ;;  %vm2743_vm7 = vcmp.lt.s32.totalorder %v6731_v57, 0  ;;  %v2863_v8 = vor.u32 %v2862_v29, %v2861_v53  ;;  %v3557_v34 = vadd.s32 3, %v2727_v24 }
 0x5df   :  { %4191 = vmatmul.mubr.f32.gmra.mrb[18].mxu1 %v2637_v17  ;;  %v2722_v46 = vxor.u32 2147483648, %v2721_v15  ;;  %v7312_v44 = vand.u32 3, %v2727_v24  ;;  %v4564_v19 = vmin.u32 %v2807_v48, %v7294_v22  ;;  %v2852_v52 = vor.u32 8388608, %v2851_v1 }
 0x5e0   :  { %v2860_v56 = vshrl.u32 %v7804_v10, %v6943_v51  ;;  %vm2876_vm0 = vcmp.lt.s32.totalorder %v6935_v33, 1  ;;  %vm2878_vm5 = vcmp.lt.s32.totalorder %v6935_v33, 3  ;;  %v7869_v62 = vand.u32 2147483647, %v6731_v57 }
 0x5e1   :  { %v2723_v30 = vsel %vm2640_vm8, %v2722_v46, %v2721_v15  ;;  %v2809_v24 = vclz %v4564_v19  ;;  %v2888_v1 = vsel %vm2876_vm0, %v2866_v31, %v2869_v11  ;;  %v2890_v51 = vsel %vm2878_vm5, %v7016_v16, %v7063_v63 }
 0x5e2   :  { %vm7323_vm14 = vcmp.le.f32.partialorder %v7869_v62, 0.7853982  ;;  %v2726_v14 = vsel %vm7261_vm11, %v6739_v26, %v2723_v30  ;;  %v2881_v29 = vsel %vm2879_vm6, %v2869_v11, 2102212464  ;;  %v2884_v7 = vsel %vm2876_vm0, %v2863_v8, %v2866_v31 }
 0x5e3   :  { %v2886_v45 = vsel %vm2878_vm5, %v2869_v11, %v7057_v2  ;;  %5134 = vcosq.f32 %v2726_v14  ;;  %v4565_v3 = vadd.s32 4294967294, %v2809_v24  ;;  %v2827_v0 = vsub.s32 4, %v7271_v60 }
 0x5e4   :  { %vm2877_vm8 = vcmp.lt.s32.totalorder %v6935_v33, 2  ;;  %5136 = vsinq.f32 %v2726_v14  ;;  %v2880_v16 = vsel %vm2876_vm0, %v2860_v56, %v2863_v8  ;;  %v2892_v12 = vshll.u32 %v2852_v52, 8 }
 0x5e5   :  { %v2891_v63 = vsel %vm2877_vm8, %v2888_v1, %v2890_v51  ;;  %vm4566_vm6 = vcmp.lt.s32.totalorder %v4565_v3, 0  ;;  %v2882_v35 = vsel %vm2878_vm5, %v2866_v31, %v2881_v29  ;;  %v2887_v2 = vsel %vm2877_vm8, %v2884_v7, %v2886_v45 }
 0x5e6   :  { %v2947_v54 = vand.u32 2147483647, %v6773_v25  ;;  %v3558_v61 = vand.u32 3, %v3557_v34  ;;  %v2812_v23 = vsel %vm4566_vm6, 0, %v4565_v3  ;;  %vm2736_vm2 = vcmp.eq.s32.totalorder %v7312_v44, 2 }
 0x5e7   :  { %v7354_v39 = vmul.u32.u64.low %v2892_v12, %v2891_v63  ;;  %v7355_v41 = vmul.u32.u64.high %v2892_v12, %v2891_v63, %v7354_v39  ;;  %v2797_v59 = vadd.s32 %v7214_v13, %v7208_v27  ;;  %v2813_v50 = vsub.s32 32, %v2812_v23 }
 0x5e8   :  { %v2817_v43 = vsub.s32 4294967266, %v2812_v23  ;;  %v2828_v6 = vsel %vm2743_vm7, %v2827_v0, %v7271_v60  ;;  %vm2733_vm3 = vcmp.eq.s32.totalorder %v7312_v44, 0  ;;  %v2814_v28 = vshll.u32 %v7294_v22, %v2812_v23 }
 0x5e9   :  { %v2883_v53 = vsel %vm2877_vm8, %v2880_v16, %v2882_v35  ;;  %v7367_v31 = vmul.u32.u64.low %v2892_v12, %v2887_v2  ;;  %v7368_v55 = vmul.u32.u64.high %v2892_v12, %v2887_v2, %v7367_v31  ;;  %vm2732_vm15 = vcmp.lt.s32.totalorder %v7312_v44, 2 }
 0x5ea   :  { %v2815_v27 = vshrl.u32 %v2797_v59, %v2813_v50  ;;  %v2818_v13 = vadd.s32 127, %v2817_v43  ;;  %v2954_v15 = vand.u32 8388607, %v2947_v54  ;;  %v2965_v60 = vshrl.u32 %v7808_v47, %v6922_v49 }
 0x5eb   :  { %vm2730_vm1 = vweird.f32 %v6739_v26  ;;  %vm3559_vm4 = vcmp.lt.s32.totalorder %v3558_v61, 2  ;;  %vm3560_vm11 = vcmp.eq.s32.totalorder %v3558_v61, 0  ;;  %vm3563_vm10 = vcmp.eq.s32.totalorder %v3558_v61, 2 }
 0x5ec   :  { %v2830_v33 = vsel %vm7323_vm14, 0, %v2828_v6  ;;  %v2816_v22 = vor.u32 %v2815_v27, %v2814_v28  ;;  %v2819_v48 = vshll.u32 %v2818_v13, 23  ;;  %vm2901_vm9 = vc.u32 %v7355_v41, %v7367_v31 }
 0x5ed   :  { %v2964_v11 = vshll.u32 %v7804_v10, %v6881_v36  ;;  %v2899_v17 = vmul.u32 %v2892_v12, %v2883_v53  ;;  %v2902_v8 = vadd.s32 1, %v7368_v55  ;;  %v2968_v46 = vshrl.u32 %v7861_v5, %v6922_v49  ;;  %v5135_v19 = vpop.eup %5134 }
 0x5ee   :  { %v2971_v34 = vshrl.u32 %v7865_v20, %v6922_v49  ;;  %v2820_v52 = vor.u32 4788187, %v2819_v48  ;;  %v2955_v56 = vor.u32 8388608, %v2954_v15  ;;  %v2967_v62 = vshll.u32 %v7808_v47, %v6881_v36  ;;  %v5137_v24 = vpop.eup %5136 }
 0x5ef   :  { %v2966_v30 = vor.u32 %v2965_v60, %v2964_v11  ;;  %v2737_v1 = vxor.u32 2147483648, %v5135_v19  ;;  %v2903_v51 = vsel %vm2901_vm9, %v2902_v8, %v7368_v55  ;;  %v2970_v14 = vshll.u32 %v7861_v5, %v6881_v36  ;;  %v7872_v60 = vld [vmem:[#allocation7_spill] sm:$0xff] }
 0x5f0   :  { %vm2979_vm12 = vcmp.lt.s32.totalorder %v6933_v21, 1  ;;  %v2734_v29 = vxor.u32 2147483648, %v5137_v24  ;;  %v2821_v7 = vand.u32 2147483647, %v2820_v52  ;;  %v2823_v45 = vcvt.s32.f32 %v2816_v22 }
 0x5f1   :  { %v2904_v3 = vadd.s32 %v2903_v51, %v2899_v17  ;;  %v3565_v0 = vsel %vm3563_vm10, %v2737_v1, %v5137_v24  ;;  %v2738_v16 = vsel %vm2736_vm2, %v2737_v1, %v5137_v24  ;;  %v2969_v63 = vor.u32 %v2968_v46, %v2967_v62 }
 0x5f2   :  { %v2972_v12 = vor.u32 %v2971_v34, %v2970_v14  ;;  %v3562_v35 = vsel %vm3560_vm11, %v5135_v19, %v2734_v29  ;;  %v2735_v2 = vsel %vm2733_vm3, %v5135_v19, %v2734_v29  ;;  %v2824_v23 = vmul.f32 %v2823_v45, %v2821_v7  ;;  %v7874_v29 = vld [vmem:[#allocation2_spill] sm:$0xff] }
 0x5f3   :  { %v2905_v36 = vadd.s32 536870912, %v2904_v3  ;;  %v3566_v39 = vsel %vm3559_vm4, %v3562_v35, %v3565_v0  ;;  %v2739_v59 = vsel %vm2732_vm15, %v2735_v2, %v2738_v16  ;;  %vm2980_vm0 = vcmp.lt.s32.totalorder %v6933_v21, 2  ;;  %v7875_v0 = vld [vmem:[#allocation6_spill] sm:$0xff] }
 0x5f4   :  { %vm2981_vm5 = vcmp.lt.s32.totalorder %v6933_v21, 3  ;;  %v3567_v50 = vsel %vm2730_vm1, nan, %v3566_v39  ;;  %v2740_v43 = vsel %vm2730_vm1, nan, %v2739_v59  ;;  %v2825_v6 = vxor.u32 2147483648, %v2824_v23 }
 0x5f5   :  { %v7409_v28 = vshrl.u32 %v2905_v36, 30  ;;  %4195 = vmatprep.mubr.f32.mxu1 %v3567_v50  ;;  %v2987_v61 = vsel %vm2979_vm12, %v2966_v30, %v2969_v63  ;;  %v2989_v44 = vsel %vm2981_vm5, %v2972_v12, %v7029_v32  ;;  %v2991_v53 = vsel %vm2979_vm12, %v2969_v63, %v2972_v12 }
 0x5f6   :  { %v2993_v26 = vsel %vm2981_vm5, %v7003_v42, %v7044_v40  ;;  %4196 = vmatmul.mubr.f32.gmra.mrb[20].mxu1 %v2740_v43  ;;  %v2826_v55 = vsel %vm2743_vm7, %v2825_v6, %v2824_v23  ;;  %v3661_v27 = vadd.s32 3, %v2830_v33  ;;  %v3081_v32 = vor.u32 %v7131_v38, %v7872_v60  ;;  %v7876_v23 = vld [vmem:[#allocation4_spill] sm:$0xff] }
 0x5f7   :  { %v2907_v13 = vshll.u32 %v7409_v28, 30  ;;  %v2994_v15 = vsel %vm2980_vm0, %v2991_v53, %v2993_v26  ;;  %v2829_v22 = vsel %vm7323_vm14, %v6731_v57, %v2826_v55  ;;  %v2984_v42 = vsel %vm2982_vm13, %v2972_v12, 2102212464 }
 0x5f8   :  { %v2995_v40 = vshll.u32 %v2955_v56, 8  ;;  %5138 = vcosq.f32 %v2829_v22  ;;  %v2963_v11 = vshrl.u32 %v7804_v10, %v6922_v49  ;;  %v2990_v17 = vsel %vm2980_vm0, %v2987_v61, %v2989_v44  ;;  %v7873_v56 = vld [vmem:[#allocation5_spill] sm:$0xff] }
 0x5f9   :  { %v7434_v48 = vsub.s32 %v2904_v3, %v2907_v13  ;;  %5140 = vsinq.f32 %v2829_v22  ;;  %v2834_v8 = vand.u32 3, %v2830_v33  ;;  %v3662_v37 = vand.u32 3, %v3661_v27 }
 0x5fa   :  { %v7440_v38 = vmul.u32.u64.low %v2995_v40, %v2994_v15  ;;  %v7441_v46 = vmul.u32.u64.high %v2995_v40, %v2994_v15, %v7440_v38  ;;  %v2983_v19 = vsel %vm2979_vm12, %v2963_v11, %v2966_v30  ;;  %v2985_v52 = vsel %vm2981_vm5, %v2969_v63, %v2984_v42 }
 0x5fb   :  { %v2910_v34 = vsub.s32 0, %v7434_v48  ;;  %vm3085_vm13 = vcmp.lt.s32.totalorder %v7873_v56, 4  ;;  %v7449_v49 = vmul.u32.u64.low %v2995_v40, %v2990_v17  ;;  %v7450_v62 = vmul.u32.u64.high %v2995_v40, %v2990_v17, %v7449_v49 }
 0x5fc   :  { %v7456_v33 = vsel %vm3085_vm13, %v7307_v4, 920167782  ;;  %v7459_v24 = vand.u32 31, %v7134_v18  ;;  %v7464_v30 = vsel %vm3085_vm13, %v3081_v32, 1326507024  ;;  %vm2836_vm7 = vcmp.eq.s32.totalorder %v2834_v8, 0 }
 0x5fd   :  { %v4568_v1 = vmin.u32 %v2910_v34, %v7434_v48  ;;  %vm2839_vm14 = vcmp.eq.s32.totalorder %v2834_v8, 2  ;;  %v2986_v51 = vsel %vm2980_vm0, %v2983_v19, %v2985_v52  ;;  %vm3663_vm8 = vcmp.lt.s32.totalorder %v3662_v37, 2 }
 0x5fe   :  { %vm3664_vm6 = vcmp.eq.s32.totalorder %v3662_v37, 0  ;;  %vm2835_vm2 = vcmp.lt.s32.totalorder %v2834_v8, 2  ;;  %vm3004_vm3 = vc.u32 %v7441_v46, %v7449_v49  ;;  %v3050_v7 = vand.u32 2147483647, %v7874_v29 }
 0x5ff   :  { %v2912_v14 = vclz %v4568_v1  ;;  %vm2833_vm15 = vweird.f32 %v6731_v57  ;;  %vm3667_vm1 = vcmp.eq.s32.totalorder %v3662_v37, 2  ;;  %v2900_v45 = vadd.s32 %v7367_v31, %v7355_v41 }
 0x600   :  { %v3005_v3 = vadd.s32 1, %v7450_v62  ;;  %v3068_v21 = vshrl.u32 %v7808_v47, %v7875_v0  ;;  %v2930_v63 = vsub.s32 4, %v7409_v28  ;;  %v3002_v12 = vmul.u32 %v2995_v40, %v2986_v51 }
 0x601   :  { %v4569_v16 = vadd.s32 4294967294, %v2912_v14  ;;  %v3071_v35 = vshrl.u32 %v7861_v5, %v7875_v0  ;;  %v3067_v36 = vshll.u32 %v7804_v10, %v7876_v23  ;;  %v3070_v41 = vshll.u32 %v7808_v47, %v7876_v23 }
 0x602   :  { %v3006_v2 = vsel %vm3004_vm3, %v3005_v3, %v7450_v62  ;;  %v3074_v31 = vshrl.u32 %v7865_v20, %v7875_v0  ;;  %v5139_v39 = vpop.eup %5138  ;;  %v3057_v50 = vand.u32 8388607, %v3050_v7  ;;  %v3073_v43 = vshll.u32 %v7861_v5, %v7876_v23 }
 0x603   :  { %vm4570_vm4 = vcmp.lt.s32.totalorder %v4569_v16, 0  ;;  %v3007_v59 = vadd.s32 %v3006_v2, %v3002_v12  ;;  %v5141_v6 = vpop.eup %5140  ;;  %v2840_v61 = vxor.u32 2147483648, %v5139_v39  ;;  %v3069_v53 = vor.u32 %v3068_v21, %v3067_v36 }
 0x604   :  { %v2915_v44 = vsel %vm4570_vm4, 0, %v4569_v16  ;;  %v3072_v26 = vor.u32 %v3071_v35, %v3070_v41  ;;  %v2837_v55 = vxor.u32 2147483648, %v5141_v6  ;;  %v3075_v15 = vor.u32 %v3074_v31, %v3073_v43 }
 0x605   :  { %v2916_v27 = vsub.s32 32, %v2915_v44  ;;  %v2920_v13 = vsub.s32 4294967266, %v2915_v44  ;;  %v3669_v60 = vsel %vm3667_vm1, %v2840_v61, %v5141_v6  ;;  %v2841_v32 = vsel %vm2839_vm14, %v2840_v61, %v5141_v6 }
 0x606   :  { %v2917_v22 = vshll.u32 %v7434_v48, %v2915_v44  ;;  %v3008_v42 = vadd.s32 536870912, %v3007_v59  ;;  %v3666_v40 = vsel %vm3664_vm6, %v5139_v39, %v2837_v55  ;;  %v2838_v11 = vsel %vm2836_vm7, %v5139_v39, %v2837_v55 }
 0x607   :  { %v2918_v17 = vshrl.u32 %v2900_v45, %v2916_v27  ;;  %v2921_v38 = vadd.s32 127, %v2920_v13  ;;  %v3670_v34 = vsel %vm3663_vm8, %v3666_v40, %v3669_v60  ;;  %v2842_v19 = vsel %vm2835_vm2, %v2838_v11, %v2841_v32 }
 0x608   :  { %vm2846_vm11 = vcmp.lt.s32.totalorder %v6776_v58, 0  ;;  %v3009_v52 = vshrl.u32 %v3008_v42, 30  ;;  %v3671_v62 = vsel %vm2833_vm15, nan, %v3670_v34  ;;  %v3058_v48 = vor.u32 8388608, %v3057_v50 }
 0x609   :  { %v2919_v1 = vor.u32 %v2918_v17, %v2917_v22  ;;  %v2922_v51 = vshll.u32 %v2921_v38, 23  ;;  %4200 = vmatprep.mubr.f32.mxu1 %v3671_v62  ;;  %v2843_v14 = vsel %vm2833_vm15, nan, %v2842_v19  ;;  %vm3082_vm10 = vcmp.lt.s32.totalorder %v7873_v56, 1 }
 0x60a   :  { %v3010_v3 = vshll.u32 %v3009_v52, 30  ;;  %vm3084_vm9 = vcmp.lt.s32.totalorder %v7873_v56, 3  ;;  %4201 = vmatmul.mubr.f32.gmra.mrb[22].mxu1 %v2843_v14  ;;  %v2931_v37 = vsel %vm2846_vm11, %v2930_v63, %v7409_v28  ;;  %v3090_v45 = vsel %vm3082_vm10, %v3069_v53, %v3072_v26 }
 0x60b   :  { %v2923_v8 = vor.u32 4788187, %v2922_v51  ;;  %v3092_v21 = vsel %vm3084_vm9, %v3075_v15, %v7456_v33  ;;  %vm3083_vm12 = vcmp.lt.s32.totalorder %v7873_v56, 2  ;;  %v3087_v16 = vsel %vm3085_vm13, %v3075_v15, 2102212464  ;;  %v7881_v51 = vld [vmem:[#allocation3_spill] sm:$0xff] }
 0x60c   :  { %v7513_v57 = vsub.s32 %v3007_v59, %v3010_v3  ;;  %v3094_v12 = vsel %vm3082_vm10, %v3072_v26, %v3075_v15  ;;  %v2926_v2 = vcvt.s32.f32 %v2919_v1  ;;  %v3096_v28 = vsel %vm3084_vm9, %v7307_v4, %v7464_v30  ;;  %v4227_v56 = vld [vmem:[%s7762_s5 + $0x8] sm:$0xff] }
 0x60d   :  { %v2924_v35 = vand.u32 2147483647, %v2923_v8  ;;  %v3098_v63 = vshll.u32 %v3058_v48, 8  ;;  %v3066_v23 = vshrl.u32 %v7804_v10, %v7875_v0  ;;  %v3093_v36 = vsel %vm3083_vm12, %v3090_v45, %v3092_v21 }
 0x60e   :  { %v3013_v33 = vsub.s32 0, %v7513_v57  ;;  %v3097_v41 = vsel %vm3083_vm12, %v3094_v12, %v3096_v28  ;;  %vm7533_vm0 = vcmp.le.f32.partialorder %v2844_v9, 0.7853982  ;;  %v3088_v43 = vsel %vm3084_vm9, %v3072_v26, %v3087_v16 }
 0x60f   :  { %v2927_v39 = vmul.f32 %v2926_v2, %v2924_v35  ;;  %v7537_v4 = vmul.u32.u64.low %v3098_v63, %v3097_v41  ;;  %v7538_v30 = vmul.u32.u64.high %v3098_v63, %v3097_v41, %v7537_v4  ;;  %v2933_v59 = vsel %vm7533_vm0, 0, %v2931_v37 }
 0x610   :  { %v4572_v0 = vmin.u32 %v3013_v33, %v7513_v57  ;;  %v3086_v50 = vsel %vm3082_vm10, %v3066_v23, %v3069_v53  ;;  %v3033_v9 = vsub.s32 4, %v3009_v52  ;;  %v7551_v27 = vsub.s32 32, %v7459_v24 }
 0x611   :  { %v2928_v6 = vxor.u32 2147483648, %v2927_v39  ;;  %v7547_v61 = vmul.u32.u64.low %v3098_v63, %v3093_v36  ;;  %v7548_v44 = vmul.u32.u64.high %v3098_v63, %v3093_v36, %v7547_v61  ;;  %v3765_v15 = vadd.s32 3, %v2933_v59 }
 0x612   :  { %v3015_v55 = vclz %v4572_v0  ;;  %v3089_v60 = vsel %vm3083_vm12, %v3086_v50, %v3088_v43  ;;  %vm2949_vm5 = vcmp.lt.s32.totalorder %v6773_v25, 0  ;;  %v7562_v32 = vand.u32 3, %v2933_v59 }
 0x613   :  { %v2929_v13 = vsel %vm2846_vm11, %v2928_v6, %v2927_v39  ;;  %vm3107_vm13 = vc.u32 %v7538_v30, %v7547_v61  ;;  %v3034_v22 = vsel %vm2949_vm5, %v3033_v9, %v3009_v52  ;;  %v3108_v42 = vadd.s32 1, %v7548_v44 }
 0x614   :  { %v2932_v53 = vsel %vm7533_vm0, %v6776_v58, %v2929_v13  ;;  %v4573_v26 = vadd.s32 4294967294, %v3015_v55  ;;  %vm7569_vm7 = vcmp.le.f32.partialorder %v2947_v54, 0.7853982  ;;  %v3105_v40 = vmul.u32 %v3098_v63, %v3089_v60 }
 0x615   :  { %5142 = vcosq.f32 %v2932_v53  ;;  %v3766_v11 = vand.u32 3, %v3765_v15  ;;  %v3003_v17 = vadd.s32 %v7449_v49, %v7441_v46  ;;  %v3109_v34 = vsel %vm3107_vm13, %v3108_v42, %v7548_v44 }
 0x616   :  { %5144 = vsinq.f32 %v2932_v53  ;;  %vm4574_vm14 = vcmp.lt.s32.totalorder %v4573_v26, 0  ;;  %v3036_v62 = vsel %vm7569_vm7, 0, %v3034_v22  ;;  %v3110_v1 = vadd.s32 %v3109_v34, %v3105_v40 }
 0x617   :  { %v3018_v38 = vsel %vm4574_vm14, 0, %v4573_v26  ;;  %v7579_v54 = vshrl.u32 %v7134_v18, 5  ;;  %vm2942_vm8 = vcmp.eq.s32.totalorder %v7562_v32, 2  ;;  %v3153_v48 = vand.u32 2147483647, %v7881_v51 }
 0x618   :  { %v3019_v19 = vsub.s32 32, %v3018_v38  ;;  %v3023_v52 = vsub.s32 4294967266, %v3018_v38  ;;  %vm2939_vm6 = vcmp.eq.s32.totalorder %v7562_v32, 0  ;;  %v3020_v46 = vshll.u32 %v7513_v57, %v3018_v38 }
 0x619   :  { %v3111_v3 = vadd.s32 536870912, %v3110_v1  ;;  %vm3767_vm2 = vcmp.lt.s32.totalorder %v3766_v11, 2  ;;  %vm3768_vm3 = vcmp.eq.s32.totalorder %v3766_v11, 0  ;;  %vm3771_vm15 = vcmp.eq.s32.totalorder %v3766_v11, 2 }
 0x61a   :  { %v3021_v49 = vshrl.u32 %v3003_v17, %v3019_v19  ;;  %v3024_v14 = vadd.s32 127, %v3023_v52  ;;  %vm2938_vm1 = vcmp.lt.s32.totalorder %v7562_v32, 2  ;;  %v7586_v8 = vadd.s32 3, %v3036_v62 }
 0x61b   :  { %v3171_v18 = vshrl.u32 %v7808_v47, %v7551_v27  ;;  %vm2936_vm4 = vweird.f32 %v6776_v58  ;;  %v7591_v21 = vand.u32 3, %v3036_v62  ;;  %v7593_v57 = vshrl.u32 %v3111_v3, 30 }
 0x61c   :  { %v3022_v37 = vor.u32 %v3021_v49, %v3020_v46  ;;  %v3025_v45 = vshll.u32 %v3024_v14, 23  ;;  %v7596_v16 = vadd.s32 %v7547_v61, %v7538_v30  ;;  %v3169_v12 = vshrl.u32 %v7804_v10, %v7551_v27  ;;  %v4226_v46 = vld [vmem:[%s7762_s5] sm:$0xff] }
 0x61d   :  { %v3170_v35 = vshll.u32 %v7804_v10, %v7459_v24  ;;  %v3174_v2 = vshrl.u32 %v7861_v5, %v7551_v27  ;;  %v3113_v63 = vshll.u32 %v7593_v57, 30  ;;  %v3160_v33 = vand.u32 8388607, %v3153_v48 }
 0x61e   :  { %v3026_v28 = vor.u32 4788187, %v3025_v45  ;;  %v3173_v23 = vshll.u32 %v7808_v47, %v7459_v24  ;;  %v3176_v31 = vshll.u32 %v7861_v5, %v7459_v24  ;;  %v3177_v10 = vshrl.u32 %v7865_v20, %v7551_v27 }
 0x61f   :  { %v5143_v36 = vpop.eup %5142  ;;  %v3172_v41 = vor.u32 %v3171_v18, %v3170_v35  ;;  %v7882_v39 = vmov 920167782   ;;  %v3029_v50 = vcvt.s32.f32 %v3022_v37  ;;  %v7615_v43 = vsub.s32 %v3110_v1, %v3113_v63 }
 0x620   :  { %v3180_v4 = vshrl.u32 %v7882_v39, %v7551_v27  ;;  %v5145_v30 = vpop.eup %5144  ;;  %v2943_v59 = vxor.u32 2147483648, %v5143_v36  ;;  %v3027_v0 = vand.u32 2147483647, %v3026_v28  ;;  %v3175_v9 = vor.u32 %v3174_v2, %v3173_v23 }
 0x621   :  { %v2940_v6 = vxor.u32 2147483648, %v5145_v30  ;;  %v3179_v47 = vshll.u32 %v7865_v20, %v7459_v24  ;;  %v7883_v61 = vmov 1326507024   ;;  %v3116_v15 = vsub.s32 0, %v7615_v43 }
 0x622   :  { %v3183_v5 = vshrl.u32 %v7883_v61, %v7551_v27  ;;  %v3773_v44 = vsel %vm3771_vm15, %v2943_v59, %v5145_v30  ;;  %v2944_v55 = vsel %vm2942_vm8, %v2943_v59, %v5145_v30  ;;  %v3030_v13 = vmul.f32 %v3029_v50, %v3027_v0 }
 0x623   :  { %v3770_v60 = vsel %vm3768_vm3, %v5143_v36, %v2940_v6  ;;  %v2941_v53 = vsel %vm2939_vm6, %v5143_v36, %v2940_v6  ;;  %v3181_v26 = vor.u32 %v3180_v4, %v3179_v47  ;;  %v3182_v20 = vshll.u32 %v7882_v39, %v7459_v24 }
 0x624   :  { %v3774_v22 = vsel %vm3767_vm2, %v3770_v60, %v3773_v44  ;;  %v2945_v27 = vsel %vm2938_vm1, %v2941_v53, %v2944_v55  ;;  %v3031_v42 = vxor.u32 2147483648, %v3030_v13  ;;  %v4576_v40 = vmin.u32 %v3116_v15, %v7615_v43  ;;  %v4228_v60 = vld [vmem:[%s7762_s5 + $0x10] sm:$0xff]  ;;  %v4229_v53 = vld [vmem:[%s7762_s5 + $0x18] sm:$0xff] }
 0x625   :  { %v3775_v17 = vsel %vm2936_vm4, nan, %v3774_v22  ;;  %v2946_v38 = vsel %vm2936_vm4, nan, %v2945_v27  ;;  %v3161_v34 = vor.u32 8388608, %v3160_v33  ;;  %v3178_v19 = vor.u32 %v3177_v10, %v3176_v31 }
 0x626   :  { %4205 = vmatprep.mubr.f32.mxu1 %v3775_v17  ;;  %v3032_v24 = vsel %vm2949_vm5, %v3031_v42, %v3030_v13  ;;  %v3118_v11 = vclz %v4576_v40  ;;  %v3184_v52 = vor.u32 %v3183_v5, %v3182_v20  ;;  %vm3185_vm11 = vcmp.lt.s32.totalorder %v7579_v54, 1 }
 0x627   :  { %4206 = vmatmul.mubr.f32.gmra.mrb[24].mxu1 %v2946_v38  ;;  %v3035_v32 = vsel %vm7569_vm7, %v6773_v25, %v3032_v24  ;;  %vm3186_vm10 = vcmp.lt.s32.totalorder %v7579_v54, 2  ;;  %vm3188_vm9 = vcmp.lt.s32.totalorder %v7579_v54, 4  ;;  %v3193_v58 = vsel %vm3185_vm11, %v3172_v41, %v3175_v9 }
 0x628   :  { %5146 = vcosq.f32 %v3035_v32  ;;  %v4577_v62 = vadd.s32 4294967294, %v3118_v11  ;;  %vm3187_vm12 = vcmp.lt.s32.totalorder %v7579_v54, 3  ;;  %v3194_v1 = vsel %vm3188_vm9, %v3181_v26, 920167782 }
 0x629   :  { %5148 = vsinq.f32 %v3035_v32  ;;  %v3190_v49 = vsel %vm3188_vm9, %v3178_v19, 2102212464  ;;  %v3195_v14 = vsel %vm3187_vm12, %v3178_v19, %v3194_v1  ;;  %v3197_v3 = vsel %vm3185_vm11, %v3175_v9, %v3178_v19 }
 0x62a   :  { %vm4578_vm0 = vcmp.lt.s32.totalorder %v4577_v62, 0  ;;  %v3189_v18 = vsel %vm3185_vm11, %v3169_v12, %v3172_v41  ;;  %v3196_v37 = vsel %vm3186_vm10, %v3193_v58, %v3195_v14  ;;  %v3198_v45 = vsel %vm3188_vm9, %v3184_v52, 1326507024 }
 0x62b   :  { %v3121_v35 = vsel %vm4578_vm0, 0, %v4577_v62  ;;  %v3199_v2 = vsel %vm3187_vm12, %v3181_v26, %v3198_v45  ;;  %v3201_v28 = vshll.u32 %v3161_v34, 8  ;;  %v5013_v63 = vpack.c.bf16 %v4227_v56, %v4226_v46 }
 0x62c   :  { %v3122_v33 = vsub.s32 32, %v3121_v35  ;;  %v3126_v23 = vsub.s32 4294967266, %v3121_v35  ;;  %v3191_v36 = vsel %vm3187_vm12, %v3175_v9, %v3190_v49  ;;  %v3200_v31 = vsel %vm3186_vm10, %v3197_v3, %v3199_v2 }
 0x62d   :  { %v7669_v10 = vmul.u32.u64.low %v3201_v28, %v3200_v31  ;;  %v7670_v12 = vmul.u32.u64.high %v3201_v28, %v3200_v31, %v7669_v10  ;;  %v7672_v41 = vmul.u32.u64.low %v3201_v28, %v3196_v37  ;;  %v7673_v39 = vmul.u32.u64.high %v3201_v28, %v3196_v37, %v7672_v41  ;;  %5014 = vmatprep.subr.bf16.mxu0 %v5013_v63 }
 0x62e   :  { %v3870_v4 = vand.u32 3, %v7586_v8  ;;  %v3123_v30 = vshll.u32 %v7615_v43, %v3121_v35  ;;  %v3124_v59 = vshrl.u32 %v7596_v16, %v3122_v33  ;;  %v3127_v0 = vadd.s32 127, %v3126_v23  ;;  %5016 = vmatpush3.bf16.msra.mxu0 %v5013_v63 }
 0x62f   :  { %v3192_v50 = vsel %vm3186_vm10, %v3189_v18, %v3191_v36  ;;  %vm3041_vm5 = vcmp.lt.s32.totalorder %v7591_v21, 2  ;;  %vm3042_vm13 = vcmp.eq.s32.totalorder %v7591_v21, 0  ;;  %vm3210_vm7 = vc.u32 %v7670_v12, %v7672_v41 }
 0x630   :  { %v3125_v6 = vor.u32 %v3124_v59, %v3123_v30  ;;  %v3128_v9 = vshll.u32 %v3127_v0, 23  ;;  %v3211_v8 = vadd.s32 1, %v7673_v39  ;;  %vm3871_vm14 = vcmp.lt.s32.totalorder %v3870_v4, 2 }
 0x631   :  { %vm3045_vm8 = vcmp.eq.s32.totalorder %v7591_v21, 2  ;;  %v3208_v43 = vmul.u32 %v3201_v28, %v3192_v50  ;;  %vm3872_vm6 = vcmp.eq.s32.totalorder %v3870_v4, 0  ;;  %vm3875_vm2 = vcmp.eq.s32.totalorder %v3870_v4, 2 }
 0x632   :  { %v5147_v47 = vpop.eup %5146  ;;  %v3129_v16 = vor.u32 4788187, %v3128_v9  ;;  %v3212_v5 = vsel %vm3210_vm7, %v3211_v8, %v7673_v39  ;;  %v3132_v13 = vcvt.s32.f32 %v3125_v6  ;;  %v3136_v22 = vsub.s32 4, %v7593_v57 }
 0x633   :  { %v5149_v61 = vpop.eup %5148  ;;  %v3046_v54 = vxor.u32 2147483648, %v5147_v47  ;;  %v3213_v15 = vadd.s32 %v3212_v5, %v3208_v43  ;;  %v5017_v27 = vpack.c.bf16 %v4229_v53, %v4228_v60  ;;  %vm3039_vm3 = vweird.f32 %v6773_v25 }
 0x634   :  { %v3043_v44 = vxor.u32 2147483648, %v5149_v61  ;;  %v3130_v55 = vand.u32 2147483647, %v3129_v16  ;;  %vm3052_vm15 = vcmp.lt.s32.totalorder %v7874_v29, 0  ;;  %vm3051_vm1 = vcmp.le.f32.partialorder %v3050_v7, 0.7853982 }
 0x635   :  { %v3877_v26 = vsel %vm3875_vm2, %v3046_v54, %v5149_v61  ;;  %v3047_v20 = vsel %vm3045_vm8, %v3046_v54, %v5149_v61  ;;  %v3214_v38 = vadd.s32 536870912, %v3213_v15  ;;  %5018 = vmatprep.subr.bf16.mxu0 %v5017_v27  ;;  %v3137_v58 = vsel %vm3052_vm15, %v3136_v22, %v7593_v57 }
 0x636   :  { %v3874_v42 = vsel %vm3872_vm6, %v5147_v47, %v3043_v44  ;;  %v3044_v40 = vsel %vm3042_vm13, %v5147_v47, %v3043_v44  ;;  %v3133_v17 = vmul.f32 %v3132_v13, %v3130_v55  ;;  %5020 = vmatpush3.bf16.msra.mxu0 %v5017_v27  ;;  %v3139_v1 = vsel %vm3051_vm1, 0, %v3137_v58 }
 0x637   :  { %v3878_v34 = vsel %vm3871_vm14, %v3874_v42, %v3877_v26  ;;  %v3048_v19 = vsel %vm3041_vm5, %v3044_v40, %v3047_v20  ;;  %v3215_v52 = vshrl.u32 %v3214_v38, 30  ;;  %v3973_v49 = vadd.s32 3, %v3139_v1 }
 0x638   :  { %v3879_v24 = vsel %vm3039_vm3, nan, %v3878_v34  ;;  %v3134_v11 = vxor.u32 2147483648, %v3133_v17  ;;  %v3049_v32 = vsel %vm3039_vm3, nan, %v3048_v19  ;;  %v3143_v3 = vand.u32 3, %v3139_v1 }
 0x639   :  { %4210 = vmatprep.mubr.f32.mxu1 %v3879_v24  ;;  %v3216_v62 = vshll.u32 %v3215_v52, 30  ;;  %v3974_v37 = vand.u32 3, %v3973_v49  ;;  %v3209_v63 = vadd.s32 %v7672_v41, %v7670_v12  ;;  %vm3142_vm13 = vweird.f32 %v7874_v29 }
 0x63a   :  { %4211 = vmatmul.mubr.f32.gmra.mrb[26].mxu1 %v3049_v32  ;;  %v3135_v25 = vsel %vm3052_vm15, %v3134_v11, %v3133_v17  ;;  %vm3144_vm4 = vcmp.lt.s32.totalorder %v3143_v3, 2  ;;  %vm3145_vm11 = vcmp.eq.s32.totalorder %v3143_v3, 0  ;;  %vm3148_vm10 = vcmp.eq.s32.totalorder %v3143_v3, 2 }
 0x63b   :  { %v3138_v21 = vsel %vm3051_vm1, %v7874_v29, %v3135_v25  ;;  %v3217_v46 = vsub.s32 %v3213_v15, %v3216_v62  ;;  %vm3975_vm12 = vcmp.lt.s32.totalorder %v3974_v37, 2  ;;  %vm3979_vm0 = vcmp.eq.s32.totalorder %v3974_v37, 2 }
 0x63c   :  { %5150 = vcosq.f32 %v3138_v21  ;;  %vm3976_vm5 = vcmp.eq.s32.totalorder %v3974_v37, 0  ;;  %v3239_v61 = vsub.s32 4, %v3215_v52  ;;  %vm3155_vm7 = vcmp.lt.s32.totalorder %v7881_v51, 0 }
 0x63d   :  { %5152 = vsinq.f32 %v3138_v21  ;;  %v3219_v56 = vsub.s32 0, %v3217_v46  ;;  %vm3154_vm14 = vcmp.le.f32.partialorder %v3153_v48, 0.7853982 }
 0x63e   :  { %v3240_v5 = vsel %vm3155_vm7, %v3239_v61, %v3215_v52 }
 0x63f   :  { %v4580_v14 = vmin.u32 %v3219_v56, %v3217_v46  ;;  %v3242_v55 = vsel %vm3154_vm14, 0, %v3240_v5 }
 0x640   :  { %v4077_v13 = vadd.s32 3, %v3242_v55  ;;  %v3246_v60 = vand.u32 3, %v3242_v55 }
 0x641   :  { %v3221_v18 = vclz %v4580_v14 }
 0x642   :  { %v4078_v15 = vand.u32 3, %v4077_v13  ;;  %vm3251_vm6 = vcmp.eq.s32.totalorder %v3246_v60, 2  ;;  %vm3248_vm3 = vcmp.eq.s32.totalorder %v3246_v60, 0  ;;  %vm3247_vm1 = vcmp.lt.s32.totalorder %v3246_v60, 2 }
 0x643   :  { %v4581_v45 = vadd.s32 4294967294, %v3221_v18 }
 0x644   :  { %vm4083_vm8 = vcmp.eq.s32.totalorder %v4078_v15, 2  ;;  %vm4080_vm2 = vcmp.eq.s32.totalorder %v4078_v15, 0  ;;  %vm4079_vm15 = vcmp.lt.s32.totalorder %v4078_v15, 2 }
 0x645   :  { %vm4582_vm9 = vcmp.lt.s32.totalorder %v4581_v45, 0 }
 0x646   :  { %v5151_v57 = vpop.eup %5150  ;;  %v3224_v2 = vsel %vm4582_vm9, 0, %v4581_v45 }
 0x647   :  { %v5153_v7 = vpop.eup %5152  ;;  %v3149_v35 = vxor.u32 2147483648, %v5151_v57  ;;  %v3225_v33 = vsub.s32 32, %v3224_v2  ;;  %v3229_v23 = vsub.s32 4294967266, %v3224_v2  ;;  %v3226_v10 = vshll.u32 %v3217_v46, %v3224_v2 }
 0x648   :  { %v3146_v28 = vxor.u32 2147483648, %v5153_v7 }
 0x649   :  { %v3981_v36 = vsel %vm3979_vm0, %v3149_v35, %v5153_v7  ;;  %v3150_v31 = vsel %vm3148_vm10, %v3149_v35, %v5153_v7  ;;  %v3227_v30 = vshrl.u32 %v3209_v63, %v3225_v33  ;;  %v3230_v59 = vadd.s32 127, %v3229_v23 }
 0x64a   :  { %v3978_v39 = vsel %vm3976_vm5, %v5151_v57, %v3146_v28  ;;  %v3147_v4 = vsel %vm3145_vm11, %v5151_v57, %v3146_v28  ;;  %vm7884_vm11 = vcmask 261120   ;;  %v4359_v33 = vlaneseq }
 0x64b   :  { %v3982_v0 = vsel %vm3975_vm12, %v3978_v39, %v3981_v36  ;;  %v3151_v50 = vsel %vm3144_vm4, %v3147_v4, %v3150_v31  ;;  %v3228_v12 = vor.u32 %v3227_v30, %v3226_v10  ;;  %v3231_v41 = vshll.u32 %v3230_v59, 23  ;;  %vm7885_vm10 = vmmov %vm7884_vm11 }
 0x64c   :  { %v3983_v6 = vsel %vm3142_vm13, nan, %v3982_v0  ;;  %v3152_v9 = vsel %vm3142_vm13, nan, %v3151_v50  ;;  %vm3245_vm4 = vweird.f32 %v7881_v51  ;;  %vm7886_vm9 = vmmov %vm7885_vm10  ;;  %v4360_v23 = vand.u32 127, %v4359_v33 }
 0x64d   :  { %4215 = vmatprep.mubr.f32.mxu1 %v3983_v6  ;;  %v3232_v8 = vor.u32 4788187, %v3231_v41  ;;  %v3235_v16 = vcvt.s32.f32 %v3228_v12  ;;  %vm7887_vm12 = vmmov %vm7886_vm9 }
 0x64e   :  { %4216 = vmatmul.mubr.f32.gmra.mrb[28].mxu1 %v3152_v9  ;;  %vm7888_vm0 = vmmov %vm7886_vm9 }
 0x64f   :  { %v3233_v47 = vand.u32 2147483647, %v3232_v8  ;;  %vm7889_vm5 = vmmov %vm7888_vm0 }
 0x650   :  { %vm7890_vm13 = vmmov %vm7888_vm0 }
 0x651   :  { %v3236_v43 = vmul.f32 %v3235_v16, %v3233_v47 }
 0x653   :  { %v3237_v54 = vxor.u32 2147483648, %v3236_v43 }
 0x655   :  { %v3238_v29 = vsel %vm3155_vm7, %v3237_v54, %v3236_v43  ;;  %vm7891_vm7 = vmmov %vm7888_vm0 }
 0x656   :  { %v3241_v44 = vsel %vm3154_vm14, %v7881_v51, %v3238_v29  ;;  %vm4361_vm14 = vcmp.lt.s32.totalorder %v4360_v23, 8 }
 0x657   :  { %5154 = vcosq.f32 %v3241_v44 }
 0x658   :  { %5156 = vsinq.f32 %v3241_v44 }
 0x661   :  { %v5155_v53 = vpop.eup %5154 }
 0x662   :  { %v5157_v26 = vpop.eup %5156  ;;  %v3252_v20 = vxor.u32 2147483648, %v5155_v53 }
 0x663   :  { %v3249_v22 = vxor.u32 2147483648, %v5157_v26 }
 0x664   :  { %v4085_v27 = vsel %vm4083_vm8, %v3252_v20, %v5157_v26  ;;  %v3253_v48 = vsel %vm3251_vm6, %v3252_v20, %v5157_v26 }
 0x665   :  { %v4082_v42 = vsel %vm4080_vm2, %v5155_v53, %v3249_v22  ;;  %v3250_v40 = vsel %vm3248_vm3, %v5155_v53, %v3249_v22 }
 0x666   :  { %v4086_v17 = vsel %vm4079_vm15, %v4082_v42, %v4085_v27  ;;  %v3254_v38 = vsel %vm3247_vm1, %v3250_v40, %v3253_v48 }
 0x667   :  { %v4087_v34 = vsel %vm3245_vm4, nan, %v4086_v17  ;;  %v3255_v19 = vsel %vm3245_vm4, nan, %v3254_v38 }
 0x668   :  { %4220 = vmatprep.mubr.f32.mxu1 %v4087_v34 }
 0x669   :  { %4221 = vmatmul.mubr.f32.gmra.mrb[30].mxu1 %v3255_v19 }
 0x6a6   :  { %v4785_v24 = vpop.f32.mrb[16].mxu1 }
 0x6a7   :  { %v4786_v11 = vpop.f32.mrb[17].mxu1 }
 0x6a8   :  { %v4787_v52 = vadd.f32 %v4786_v11, %v4785_v24 }
 0x6aa   :  { %4901 = vmatprep.mubr.msk.f32.mxu0 %vm7884_vm11, %v4787_v52 }
 0x6b2   :  { %v4788_v32 = vpop.f32.mrb[18].mxu1 }
 0x6b3   :  { %v4789_v58 = vpop.f32.mrb[19].mxu1 }
 0x6b4   :  { %v4790_v25 = vadd.f32 %v4789_v58, %v4788_v32 }
 0x6b6   :  { %4902 = vmatmul.mubr.msk.f32.vlgmr.msra.gmra.mrb[24].mxu0 %vm7885_vm10, %v4790_v25 }
 0x6c9   :  { %v4791_v62 = vpop.f32.mrb[20].mxu1 }
 0x6ca   :  { %v4792_v21 = vpop.f32.mrb[21].mxu1 }
 0x6cb   :  { %v4793_v1 = vadd.f32 %v4792_v21, %v4791_v62 }
 0x6cd   :  { %4904 = vmatprep.mubr.msk.f32.mxu0 %vm7886_vm9, %v4793_v1 }
 0x6dd   :  { %v4794_v51 = vpop.f32.mrb[22].mxu1 }
 0x6de   :  { %v4795_v46 = vpop.f32.mrb[23].mxu1 }
 0x6df   :  { %v4796_v56 = vadd.f32 %v4795_v46, %v4794_v51 }
 0x6e1   :  { %4905 = vmatmul.mubr.msk.f32.gmra.mrb[26].mxu0 %vm7887_vm12, %v4796_v56 }
 0x6fa   :  { %v4797_v49 = vpop.f32.mrb[24].mxu1 }
 0x6fb   :  { %v4798_v14 = vpop.f32.mrb[25].mxu1 }
 0x6fc   :  { %v4799_v3 = vadd.f32 %v4798_v14, %v4797_v49 }
 0x6fe   :  { %4907 = vmatprep.mubr.msk.f32.mxu0 %vm7888_vm0, %v4799_v3 }
 0x70d   :  { %v4800_v18 = vpop.f32.mrb[26].mxu1 }
 0x70e   :  { %v4801_v37 = vpop.f32.mrb[27].mxu1 }
 0x70f   :  { %v4802_v45 = vadd.f32 %v4801_v37, %v4800_v18 }
 0x711   :  { %4908 = vmatmul.mubr.msk.f32.gmra.mrb[28].mxu0 %vm7889_vm5, %v4802_v45 }
 0x721   :  { %v4803_v57 = vpop.f32.mrb[28].mxu1 }
 0x722   :  { %v4804_v7 = vpop.f32.mrb[29].mxu1 }
 0x723   :  { %v4805_v35 = vadd.f32 %v4804_v7, %v4803_v57 }
 0x725   :  { %4910 = vmatprep.mubr.msk.f32.mxu0 %vm7890_vm13, %v4805_v35 }
 0x73c   :  { %v4806_v2 = vpop.f32.mrb[30].mxu1 }
 0x73d   :  { %v4807_v28 = vpop.f32.mrb[31].mxu1 }
 0x73e   :  { %v4808_v63 = vadd.f32 %v4807_v28, %v4806_v2 }
 0x740   :  { %4911 = vmatmul.mubr.msk.f32.gmra.mrb[30].mxu0 %vm7891_vm7, %v4808_v63 }
 0x789   :  { %v4903_v36 = vpop.f32.mrb[24].mxu0 }
 0x78a   :  { %v4320_v31 = vpop.f32.mrb[25].mxu0  ;;  %v4363_v10 = vsel %vm4361_vm14, %v4903_v36, -1e+30 }
 0x78b   :  { %4372 = vmax.xlane.f32.xlu1 %v4363_v10  ;;  %v4362_v39 = vsel %vm4361_vm14, %v4320_v31, -1e+30 }
 0x78c   :  { %4370 = vmax.xlane.f32.xlu0 %v4362_v39 }
 0x7b4   :  { %v4906_v4 = vpop.f32.mrb[26].mxu0 }
 0x7b5   :  { %v4330_v30 = vpop.f32.mrb[27].mxu0  ;;  %v4365_v59 = vsel %vm4361_vm14, %v4906_v4, -1e+30 }
 0x7b6   :  { %4376 = vmax.xlane.f32.xlu0 %v4365_v59  ;;  %v4364_v0 = vsel %vm4361_vm14, %v4330_v30, -1e+30 }
 0x7ba   :  { %4374 = vmax.xlane.f32.xlu0 %v4364_v0 }
 0x7e4   :  { %v4909_v50 = vpop.f32.mrb[28].mxu0 }
 0x7e5   :  { %v4340_v6 = vpop.f32.mrb[29].mxu0  ;;  %v4367_v9 = vsel %vm4361_vm14, %v4909_v50, -1e+30 }
 0x7e6   :  { %4380 = vmax.xlane.f32.xlu0 %v4367_v9  ;;  %v4366_v12 = vsel %vm4361_vm14, %v4340_v6, -1e+30 }
 0x7e7   :  { %4378 = vmax.xlane.f32.xlu1 %v4366_v12 }
 0x813   :  { %v4912_v41 = vpop.f32.mrb[30].mxu0 }
 0x814   :  { %v4350_v8 = vpop.f32.mrb[31].mxu0  ;;  %v4369_v47 = vsel %vm4361_vm14, %v4912_v41, -1e+30 }
 0x815   :  { %4384 = vmax.xlane.f32.xlu0 %v4369_v47  ;;  %v4368_v16 = vsel %vm4361_vm14, %v4350_v8, -1e+30 }
 0x816   :  { %4382 = vmax.xlane.f32.xlu1 %v4368_v16 }
 0x818   :  { %v4373_v43 = vpop.xlane.xlu1 %4372 }
 0x819   :  { %v4387_v61 = vsub.f32 %v4363_v10, %v4373_v43  ;;  %v4371_v54 = vpop.xlane.xlu0 %4370 }
 0x81a   :  { %v4386_v29 = vsub.f32 %v4362_v39, %v4371_v54 }
 0x81b   :  { %v4396_v5 = vmul.f32 1.442695, %v4387_v61 }
 0x81c   :  { %v4394_v44 = vmul.f32 1.442695, %v4386_v29 }
 0x81d   :  { %5158 = vpow2.f32 %v4396_v5 }
 0x81e   :  { %5160 = vpow2.f32 %v4394_v44 }
 0x827   :  { %v5159_v55 = vpop.eup %5158 }
 0x828   :  { %v5161_v13 = vpop.eup %5160  ;;  %4412 = vadd.xlane.f32.xlu0 %v5159_v55 }
 0x829   :  { %4410 = vadd.xlane.f32.xlu1 %v5161_v13 }
 0x843   :  { %v4377_v15 = vpop.xlane.xlu0 %4376 }
 0x844   :  { %v4389_v60 = vsub.f32 %v4365_v59, %v4377_v15 }
 0x846   :  { %v4400_v53 = vmul.f32 1.442695, %v4389_v60 }
 0x847   :  { %v4375_v26 = vpop.xlane.xlu0 %4374 }
 0x848   :  { %5162 = vpow2.f32 %v4400_v53  ;;  %v4388_v20 = vsub.f32 %v4364_v0, %v4375_v26 }
 0x84a   :  { %v4398_v22 = vmul.f32 1.442695, %v4388_v20 }
 0x84c   :  { %5164 = vpow2.f32 %v4398_v22 }
 0x852   :  { %v5163_v27 = vpop.eup %5162 }
 0x853   :  { %4416 = vadd.xlane.f32.xlu0 %v5163_v27 }
 0x856   :  { %v5165_v48 = vpop.eup %5164 }
 0x857   :  { %4414 = vadd.xlane.f32.xlu1 %v5165_v48 }
 0x873   :  { %v4381_v42 = vpop.xlane.xlu0 %4380 }
 0x874   :  { %v4391_v40 = vsub.f32 %v4367_v9, %v4381_v42  ;;  %v4379_v17 = vpop.xlane.xlu1 %4378 }
 0x875   :  { %v4390_v38 = vsub.f32 %v4366_v12, %v4379_v17 }
 0x876   :  { %v4404_v34 = vmul.f32 1.442695, %v4391_v40 }
 0x877   :  { %v4402_v19 = vmul.f32 1.442695, %v4390_v38 }
 0x878   :  { %5166 = vpow2.f32 %v4404_v34 }
 0x879   :  { %5168 = vpow2.f32 %v4402_v19 }
 0x882   :  { %v5167_v24 = vpop.eup %5166 }
 0x883   :  { %v5169_v11 = vpop.eup %5168  ;;  %4420 = vadd.xlane.f32.xlu0 %v5167_v24 }
 0x884   :  { %4418 = vadd.xlane.f32.xlu1 %v5169_v11 }
 0x8a2   :  { %v4385_v52 = vpop.xlane.xlu0 %4384 }
 0x8a3   :  { %v4393_v32 = vsub.f32 %v4369_v47, %v4385_v52  ;;  %v4383_v58 = vpop.xlane.xlu1 %4382 }
 0x8a4   :  { %v4392_v25 = vsub.f32 %v4368_v16, %v4383_v58 }
 0x8a5   :  { %v4408_v62 = vmul.f32 1.442695, %v4393_v32 }
 0x8a6   :  { %v4406_v21 = vmul.f32 1.442695, %v4392_v25 }
 0x8a7   :  { %5170 = vpow2.f32 %v4408_v62 }
 0x8a8   :  { %5172 = vpow2.f32 %v4406_v21 }
 0x8b1   :  { %v5171_v1 = vpop.eup %5170 }
 0x8b2   :  { %v5173_v51 = vpop.eup %5172  ;;  %4424 = vadd.xlane.f32.xlu0 %v5171_v1 }
 0x8b3   :  { %4422 = vadd.xlane.f32.xlu1 %v5173_v51 }
 0x8b5   :  { %v4413_v46 = vpop.xlane.xlu0 %4412 }
 0x8b6   :  { %5174 = vlog2.f32 %v4413_v46  ;;  %v4411_v56 = vpop.xlane.xlu1 %4410 }
 0x8b7   :  { %5176 = vlog2.f32 %v4411_v56 }
 0x8c0   :  { %v5175_v49 = vpop.eup %5174 }
 0x8c1   :  { %v5177_v14 = vpop.eup %5176  ;;  %v4429_v3 = vmul.f32 0.6931472, %v5175_v49 }
 0x8c2   :  { %v4427_v18 = vmul.f32 0.6931472, %v5177_v14 }
 0x8c3   :  { %v4443_v37 = vsub.f32 %v4387_v61, %v4429_v3 }
 0x8c4   :  { %v4442_v45 = vsub.f32 %v4386_v29, %v4427_v18 }
 0x8c5   :  { %4451 = vst [vmem:[%s7763_s6 + $0x8] sm:$0xff] %v4443_v37 }
 0x8c6   :  { %4450 = vst [vmem:[%s7763_s6] sm:$0xff] %v4442_v45 }
 0x8e0   :  { %v4417_v57 = vpop.xlane.xlu0 %4416 }
 0x8e1   :  { %5178 = vlog2.f32 %v4417_v57 }
 0x8e4   :  { %v4415_v7 = vpop.xlane.xlu1 %4414 }
 0x8e5   :  { %5180 = vlog2.f32 %v4415_v7 }
 0x8eb   :  { %v5179_v35 = vpop.eup %5178 }
 0x8ec   :  { %v4433_v2 = vmul.f32 0.6931472, %v5179_v35 }
 0x8ee   :  { %v4445_v28 = vsub.f32 %v4389_v60, %v4433_v2 }
 0x8ef   :  { %v5181_v63 = vpop.eup %5180 }
 0x8f0   :  { %4453 = vst [vmem:[%s7763_s6 + $0x18] sm:$0xff] %v4445_v28  ;;  %v4431_v33 = vmul.f32 0.6931472, %v5181_v63 }
 0x8f2   :  { %v4444_v23 = vsub.f32 %v4388_v20, %v4431_v33 }
 0x8f4   :  { %4452 = vst [vmem:[%s7763_s6 + $0x10] sm:$0xff] %v4444_v23 }
 0x910   :  { %v4421_v36 = vpop.xlane.xlu0 %4420 }
 0x911   :  { %5182 = vlog2.f32 %v4421_v36  ;;  %v4419_v31 = vpop.xlane.xlu1 %4418 }
 0x912   :  { %5184 = vlog2.f32 %v4419_v31 }
 0x91b   :  { %v5183_v10 = vpop.eup %5182 }
 0x91c   :  { %v5185_v39 = vpop.eup %5184  ;;  %v4437_v4 = vmul.f32 0.6931472, %v5183_v10 }
 0x91d   :  { %v4435_v30 = vmul.f32 0.6931472, %v5185_v39 }
 0x91e   :  { %v4447_v59 = vsub.f32 %v4391_v40, %v4437_v4 }
 0x91f   :  { %v4446_v0 = vsub.f32 %v4390_v38, %v4435_v30 }
 0x920   :  { %4455 = vst [vmem:[%s7763_s6 + $0x28] sm:$0xff] %v4447_v59 }
 0x921   :  { %4454 = vst [vmem:[%s7763_s6 + $0x20] sm:$0xff] %v4446_v0 }
 0x93f   :  { %v4425_v50 = vpop.xlane.xlu0 %4424 }
 0x940   :  { %5186 = vlog2.f32 %v4425_v50  ;;  %v4423_v6 = vpop.xlane.xlu1 %4422 }
 0x941   :  { %5188 = vlog2.f32 %v4423_v6 }
 0x94a   :  { %v5187_v9 = vpop.eup %5186 }
 0x94b   :  { %v5189_v12 = vpop.eup %5188  ;;  %v4441_v41 = vmul.f32 0.6931472, %v5187_v9 }
 0x94c   :  { %v4439_v8 = vmul.f32 0.6931472, %v5189_v12 }
 0x94d   :  { %v4449_v47 = vsub.f32 %v4393_v32, %v4441_v41 }
 0x94e   :  { %v4448_v16 = vsub.f32 %v4392_v25, %v4439_v8 }
 0x94f   :  { %4457 = vst [vmem:[%s7763_s6 + $0x38] sm:$0xff] %v4449_v47 }
 0x950   :  { %4456 = vst [vmem:[%s7763_s6 + $0x30] sm:$0xff] %v4448_v16 }

</bundles_post_ra>
